<compile_context>
chip_gen: v6e
topology: v6e:2x2x1
jax: 0.10.0
libtpu: 0.0.40
codegen_flags: <defaults>
</compile_context>

<pallas_src>
import jax
import jax.numpy as jnp
from jax.experimental import pallas as pl
from jax.experimental.pallas import tpu as pltpu

TM_MAX = 256  # rows per grid step; keeps VMEM ~6 MiB and pipelines x/out DMA


# ---------------------------------------------------------------------------
# Fused Pallas kernel: o = relu(x @ W1 + b1) @ W2 + b2   (bf16 weights, f32 acc)
# ---------------------------------------------------------------------------
def _mlp_fused_kernel(x_ref, w1_ref, b1_ref, w2_ref, b2_ref, o_ref):
    xb = x_ref[...].astype(jnp.bfloat16)                                # [TM, K]
    h = jnp.dot(xb, w1_ref[...], preferred_element_type=jnp.float32)    # MXU, f32 acc
    h = jnp.maximum(h + b1_ref[...], 0.0)                               # bias + ReLU (VPU)
    o = jnp.dot(h.astype(jnp.bfloat16), w2_ref[...],
                preferred_element_type=jnp.float32)                     # [TM, 4]
    o_ref[...] = (o + b2_ref[...]).astype(o_ref.dtype)


def _mlp_call(M_pad, TM, K, H, N, single_buffer_weights):
    """Build the pallas_call for a given padded row count / tile size."""

    def const_spec(shape):
        # Weights/biases keep a constant block index across the M grid; a
        # single VMEM buffer is enough (saves ~1.5 MiB of useless double
        # buffering for W1) when the jax build supports pipeline_mode here.
        if single_buffer_weights:
            return pl.BlockSpec(shape, lambda i: (0, 0),
                                pipeline_mode=pl.Buffered(1))
        return pl.BlockSpec(shape, lambda i: (0, 0))

    flops = 2 * M_pad * K * H + 2 * M_pad * H * N
    bytes_accessed = (4 * M_pad * K      # x (f32)
                      + 2 * K * H        # W1 (bf16)
                      + 4 * H            # b1 (f32)
                      + 2 * H * N        # W2 (bf16)
                      + 4 * N            # b2 (f32)
                      + 4 * M_pad * N)   # out (f32)

    return pl.pallas_call(
        _mlp_fused_kernel,
        out_shape=jax.ShapeDtypeStruct((M_pad, N), jnp.float32),
        grid=(M_pad // TM,),
        in_specs=[
            pl.BlockSpec((TM, K), lambda i: (i, 0)),   # x row tile (pipelined)
            const_spec((K, H)),                        # W1  bf16, fetched once
            const_spec((1, H)),                        # b1  f32
            const_spec((H, N)),                        # W2  bf16 (unpadded, N=4)
            const_spec((1, N)),                        # b2  f32
        ],
        out_specs=pl.BlockSpec((TM, N), lambda i: (i, 0)),
        compiler_params=pltpu.CompilerParams(
            dimension_semantics=("parallel",)),        # v7x: 2 TCs share row tiles
        cost_estimate=pl.CostEstimate(
            flops=flops, transcendentals=0, bytes_accessed=bytes_accessed),
    )


def mlp_forward(x, kernel_params):
    """x: [M, 768] f32 -> [M, 4] f32 via one fused Pallas kernel."""
    w1, b1, w2, b2 = kernel_params
    M, K = x.shape
    Kw, H = w1.shape
    Hw, N = w2.shape
    assert K == Kw and H == Hw and b1.shape == (1, H) and b2.shape == (1, N)

    # Pad rows to the f32 sublane tile (8), then to a multiple of the M tile.
    M_sub = ((M + 7) // 8) * 8
    TM = min(TM_MAX, M_sub)
    M_pad = ((M_sub + TM - 1) // TM) * TM
    x_pad = x if M_pad == M else jnp.pad(x, ((0, M_pad - M), (0, 0)))

    out_pad = None
    last_err = None
    # First attempt requests single-buffered weight specs; fall back to the
    # default (double-buffered) specs if this jax build rejects pipeline_mode
    # on top-level pallas_call BlockSpecs.
    for single_buffer in (True, False):
        try:
            out_pad = _mlp_call(M_pad, TM, K, H, N, single_buffer)(
                x_pad, w1, b1, w2, b2)
            break
        except Exception as e:  # jax-version dependent feature
            last_err = e
    if out_pad is None:
        raise last_err
    return out_pad[:M]  # drop row padding -> [M, 4]


# ---------------------------------------------------------------------------
# Parameter init (PyTorch nn.Linear default: U(-1/sqrt(fan_in), 1/sqrt(fan_in)))
# ---------------------------------------------------------------------------
def init_torch_params(key, d_in=768, d_hidden=1024, d_out=4):
    dims = [d_in, d_hidden, d_out]
    params = []
    for i in range(len(dims) - 1):
        key, kw, kb = jax.random.split(key, 3)
        bound = 1.0 / (dims[i] ** 0.5)
        w = jax.random.uniform(kw, (dims[i + 1], dims[i]),
                               minval=-bound, maxval=bound, dtype=jnp.float32)
        b = jax.random.uniform(kb, (dims[i + 1],),
                               minval=-bound, maxval=bound, dtype=jnp.float32)
        params.append((w, b))
    return params


def to_kernel_params(torch_params):
    """One-time layout/dtype hoist: W pre-transposed to (in, out) and cast to
    bf16 (halves the weight DMA that dominates this kernel); biases kept f32
    as (1, out) rows.  No output-dim padding (N=4 stays 4)."""
    (w1, b1), (w2, b2) = torch_params
    w1_t = jnp.asarray(w1.T, dtype=jnp.bfloat16)     # (768, 1024) bf16
    b1_r = jnp.asarray(b1.reshape(1, -1), jnp.float32)
    w2_t = jnp.asarray(w2.T, dtype=jnp.bfloat16)     # (1024, 4) bf16
    b2_r = jnp.asarray(b2.reshape(1, -1), jnp.float32)
    return (w1_t, b1_r, w2_t, b2_r)


# ---------------------------------------------------------------------------
# References
# ---------------------------------------------------------------------------
def reference_forward_f32(x, torch_params):
    """Torch-semantics f32 forward."""
    (w1, b1), (w2, b2) = torch_params
    h = jnp.maximum(x @ w1.T + b1, 0.0)
    return h @ w2.T + b2


def reference_forward_matched(x, kernel_params):
    """Same bf16-weight / f32-accumulation recipe as the kernel, in plain jnp."""
    w1, b1, w2, b2 = kernel_params
    h = jnp.dot(x.astype(jnp.bfloat16), w1,
                preferred_element_type=jnp.float32) + b1
    h = jnp.maximum(h, 0.0)
    return jnp.dot(h.astype(jnp.bfloat16), w2,
                   preferred_element_type=jnp.float32) + b2


# ---------------------------------------------------------------------------
if __name__ == "__main__":
    # EfficientPunctBERT hardcodes 768 -> 1024 -> 4; only the row count is free.
    M, D_IN, D_HID, D_OUT = 8, 768, 1024, 4

    key = jax.random.PRNGKey(0)
    kx, kp = jax.random.split(key)
    x = jax.random.normal(kx, (M, D_IN), dtype=jnp.float32)
    torch_params = init_torch_params(kp, D_IN, D_HID, D_OUT)
    kernel_params = to_kernel_params(torch_params)

    out = jax.block_until_ready(mlp_forward(x, kernel_params))
    assert out.shape == (M, D_OUT), out.shape

    # (a) Tight check against a jnp implementation using the identical bf16
    #     recipe (only accumulation-order differences remain).
    ref_matched = reference_forward_matched(x, kernel_params)
    assert jnp.allclose(out, ref_matched, atol=2e-3, rtol=2e-3), \
        float(jnp.max(jnp.abs(out - ref_matched)))

    # (b) Looser check against the f32 torch-semantics forward; the slack
    #     covers the intentional bf16 weight quantization (f32 accumulation).
    ref_f32 = reference_forward_f32(x, torch_params)
    assert jnp.allclose(out, ref_f32, atol=5e-2, rtol=5e-2), \
        float(jnp.max(jnp.abs(out - ref_f32)))

    print("KERNEL_OK")
</pallas_src>

<mosaic_0001>
module attributes {stable_mosaic.version = 11 : i64} {
  func.func @_mlp_fused_kernel(%arg0: i32, %arg1: memref<8x768xf32, #tpu.memory_space<vmem>>, %arg2: memref<768x1024xbf16, #tpu.memory_space<vmem>>, %arg3: memref<1x1024xf32, #tpu.memory_space<vmem>>, %arg4: memref<1024x4xbf16, #tpu.memory_space<vmem>>, %arg5: memref<1x4xf32, #tpu.memory_space<vmem>>, %arg6: memref<8x4xf32, #tpu.memory_space<vmem>>) attributes {dimension_semantics = [#tpu.dimension_semantics<parallel>], iteration_bounds = array<i64: 1>, scalar_prefetch = 0 : i64, scratch_operands = 0 : i64, tpu.core_type = #tpu.core_type<tc>, window_params = [{transform_indices = @transform_0, window_bounds = array<i64: 8, 768>}, {pipeline_mode = #tpu.pipeline_mode<synchronous>, transform_indices = @transform_1, window_bounds = array<i64: 768, 1024>}, {pipeline_mode = #tpu.pipeline_mode<synchronous>, transform_indices = @transform_2, window_bounds = array<i64: 1, 1024>}, {pipeline_mode = #tpu.pipeline_mode<synchronous>, transform_indices = @transform_3, window_bounds = array<i64: 1024, 4>}, {pipeline_mode = #tpu.pipeline_mode<synchronous>, transform_indices = @transform_4, window_bounds = array<i64: 1, 4>}, {transform_indices = @transform_5, window_bounds = array<i64: 8, 4>}]} {
    %c0 = arith.constant 0 : index
    %c0_0 = arith.constant 0 : index
    %0 = vector.load %arg1[%c0, %c0_0] : memref<8x768xf32, #tpu.memory_space<vmem>>, vector<8x768xf32>
    %1 = arith.truncf %0 : vector<8x768xf32> to vector<8x768xbf16>
    %c0_1 = arith.constant 0 : index
    %c0_2 = arith.constant 0 : index
    %2 = vector.load %arg2[%c0_1, %c0_2] : memref<768x1024xbf16, #tpu.memory_space<vmem>>, vector<768x1024xbf16>
    %cst = arith.constant dense<0.000000e+00> : vector<8x1024xf32>
    %3 = tpu.matmul %1, %2, %cst {dimension_numbers = #tpu.dot_dimension_numbers<[1], [0], [0], [1], [0, 0, 1, 1], [], []>} : vector<8x768xbf16>, vector<768x1024xbf16>, vector<8x1024xf32> -> vector<8x1024xf32>
    %c0_3 = arith.constant 0 : index
    %c0_4 = arith.constant 0 : index
    %4 = vector.load %arg3[%c0_3, %c0_4] : memref<1x1024xf32, #tpu.memory_space<vmem>>, vector<1x1024xf32>
    %5 = vector.broadcast %4 : vector<1x1024xf32> to vector<8x1024xf32>
    %6 = arith.addf %3, %5 : vector<8x1024xf32>
    %cst_5 = arith.constant 0.000000e+00 : f32
    %7 = vector.broadcast %cst_5 : f32 to vector<8x1024xf32>
    %8 = arith.maximumf %6, %7 : vector<8x1024xf32>
    %9 = arith.truncf %8 : vector<8x1024xf32> to vector<8x1024xbf16>
    %c0_6 = arith.constant 0 : index
    %c0_7 = arith.constant 0 : index
    %10 = vector.load %arg4[%c0_6, %c0_7] : memref<1024x4xbf16, #tpu.memory_space<vmem>>, vector<1024x4xbf16>
    %cst_8 = arith.constant dense<0.000000e+00> : vector<8x4xf32>
    %11 = tpu.matmul %9, %10, %cst_8 {dimension_numbers = #tpu.dot_dimension_numbers<[1], [0], [0], [1], [0, 0, 1, 1], [], []>} : vector<8x1024xbf16>, vector<1024x4xbf16>, vector<8x4xf32> -> vector<8x4xf32>
    %c0_9 = arith.constant 0 : index
    %c0_10 = arith.constant 0 : index
    %12 = vector.load %arg5[%c0_9, %c0_10] : memref<1x4xf32, #tpu.memory_space<vmem>>, vector<1x4xf32>
    %13 = vector.broadcast %12 : vector<1x4xf32> to vector<8x4xf32>
    %14 = arith.addf %11, %13 : vector<8x4xf32>
    %c0_11 = arith.constant 0 : index
    %c0_12 = arith.constant 0 : index
    %15 = vector.load %arg6[%c0_11, %c0_12] : memref<8x4xf32, #tpu.memory_space<vmem>>, vector<8x4xf32>
    tpu.vector_store %arg6[%c0_11, %c0_12], %14 {strides = array<i32>} : memref<8x4xf32, #tpu.memory_space<vmem>>, vector<8x4xf32>,
    return
  }
  func.func @transform_0(%arg0: i32) -> (i32, i32) {
    %c0_i32 = arith.constant 0 : i32
    %c0_i32_0 = arith.constant 0 : i32
    return %arg0, %c0_i32 : i32, i32
  }
  func.func @transform_1(%arg0: i32) -> (i32, i32) {
    %c0_i32 = arith.constant 0 : i32
    %c0_i32_0 = arith.constant 0 : i32
    %c0_i32_1 = arith.constant 0 : i32
    return %c0_i32, %c0_i32_0 : i32, i32
  }
  func.func @transform_2(%arg0: i32) -> (i32, i32) {
    %c0_i32 = arith.constant 0 : i32
    %c0_i32_0 = arith.constant 0 : i32
    %c0_i32_1 = arith.constant 0 : i32
    return %c0_i32, %c0_i32_0 : i32, i32
  }
  func.func @transform_3(%arg0: i32) -> (i32, i32) {
    %c0_i32 = arith.constant 0 : i32
    %c0_i32_0 = arith.constant 0 : i32
    %c0_i32_1 = arith.constant 0 : i32
    return %c0_i32, %c0_i32_0 : i32, i32
  }
  func.func @transform_4(%arg0: i32) -> (i32, i32) {
    %c0_i32 = arith.constant 0 : i32
    %c0_i32_0 = arith.constant 0 : i32
    %c0_i32_1 = arith.constant 0 : i32
    return %c0_i32, %c0_i32_0 : i32, i32
  }
  func.func @transform_5(%arg0: i32) -> (i32, i32) {
    %c0_i32 = arith.constant 0 : i32
    %c0_i32_0 = arith.constant 0 : i32
    return %arg0, %c0_i32 : i32, i32
  }
}

module attributes {stable_mosaic.version = 11 : i64} {
  func.func @_mlp_fused_kernel(%arg0: i32, %arg1: memref<8x768xf32, #tpu.memory_space<vmem>>, %arg2: memref<768x1024xbf16, #tpu.memory_space<vmem>>, %arg3: memref<1x1024xf32, #tpu.memory_space<vmem>>, %arg4: memref<1024x4xbf16, #tpu.memory_space<vmem>>, %arg5: memref<1x4xf32, #tpu.memory_space<vmem>>, %arg6: memref<8x4xf32, #tpu.memory_space<vmem>>) attributes {dimension_semantics = [#tpu.dimension_semantics<parallel>], iteration_bounds = array<i64: 1>, scalar_prefetch = 0 : i64, scratch_operands = 0 : i64, tpu.core_type = #tpu.core_type<tc>, window_params = [{transform_indices = @transform_0, window_bounds = array<i64: 8, 768>}, {pipeline_mode = #tpu.pipeline_mode<synchronous>, transform_indices = @transform_1, window_bounds = array<i64: 768, 1024>}, {pipeline_mode = #tpu.pipeline_mode<synchronous>, transform_indices = @transform_2, window_bounds = array<i64: 1, 1024>}, {pipeline_mode = #tpu.pipeline_mode<synchronous>, transform_indices = @transform_3, window_bounds = array<i64: 1024, 4>}, {pipeline_mode = #tpu.pipeline_mode<synchronous>, transform_indices = @transform_4, window_bounds = array<i64: 1, 4>}, {transform_indices = @transform_5, window_bounds = array<i64: 8, 4>}]} {
    %c0 = arith.constant 0 : index
    %c0_0 = arith.constant 0 : index
    %0 = vector.load %arg1[%c0, %c0_0] : memref<8x768xf32, #tpu.memory_space<vmem>>, vector<8x768xf32>
    %1 = arith.truncf %0 : vector<8x768xf32> to vector<8x768xbf16>
    %c0_1 = arith.constant 0 : index
    %c0_2 = arith.constant 0 : index
    %2 = vector.load %arg2[%c0_1, %c0_2] : memref<768x1024xbf16, #tpu.memory_space<vmem>>, vector<768x1024xbf16>
    %cst = arith.constant dense<0.000000e+00> : vector<8x1024xf32>
    %3 = tpu.matmul %1, %2, %cst {dimension_numbers = #tpu.dot_dimension_numbers<[1], [0], [0], [1], [0, 0, 1, 1], [], []>} : vector<8x768xbf16>, vector<768x1024xbf16>, vector<8x1024xf32> -> vector<8x1024xf32>
    %c0_3 = arith.constant 0 : index
    %c0_4 = arith.constant 0 : index
    %4 = vector.load %arg3[%c0_3, %c0_4] : memref<1x1024xf32, #tpu.memory_space<vmem>>, vector<1x1024xf32>
    %5 = vector.broadcast %4 : vector<1x1024xf32> to vector<8x1024xf32>
    %6 = arith.addf %3, %5 : vector<8x1024xf32>
    %cst_5 = arith.constant 0.000000e+00 : f32
    %7 = vector.broadcast %cst_5 : f32 to vector<8x1024xf32>
    %8 = arith.maximumf %6, %7 : vector<8x1024xf32>
    %9 = arith.truncf %8 : vector<8x1024xf32> to vector<8x1024xbf16>
    %c0_6 = arith.constant 0 : index
    %c0_7 = arith.constant 0 : index
    %10 = vector.load %arg4[%c0_6, %c0_7] : memref<1024x4xbf16, #tpu.memory_space<vmem>>, vector<1024x4xbf16>
    %cst_8 = arith.constant dense<0.000000e+00> : vector<8x4xf32>
    %11 = tpu.matmul %9, %10, %cst_8 {dimension_numbers = #tpu.dot_dimension_numbers<[1], [0], [0], [1], [0, 0, 1, 1], [], []>} : vector<8x1024xbf16>, vector<1024x4xbf16>, vector<8x4xf32> -> vector<8x4xf32>
    %c0_9 = arith.constant 0 : index
    %c0_10 = arith.constant 0 : index
    %12 = vector.load %arg5[%c0_9, %c0_10] : memref<1x4xf32, #tpu.memory_space<vmem>>, vector<1x4xf32>
    %13 = vector.broadcast %12 : vector<1x4xf32> to vector<8x4xf32>
    %14 = arith.addf %11, %13 : vector<8x4xf32>
    %c0_11 = arith.constant 0 : index
    %c0_12 = arith.constant 0 : index
    %15 = vector.load %arg6[%c0_11, %c0_12] : memref<8x4xf32, #tpu.memory_space<vmem>>, vector<8x4xf32>
    tpu.vector_store %arg6[%c0_11, %c0_12], %14 {strides = array<i32>} : memref<8x4xf32, #tpu.memory_space<vmem>>, vector<8x4xf32>,
    return
  }
  func.func @transform_0(%arg0: i32) -> (i32, i32) {
    %c0_i32 = arith.constant 0 : i32
    %c0_i32_0 = arith.constant 0 : i32
    return %arg0, %c0_i32 : i32, i32
  }
  func.func @transform_1(%arg0: i32) -> (i32, i32) {
    %c0_i32 = arith.constant 0 : i32
    %c0_i32_0 = arith.constant 0 : i32
    %c0_i32_1 = arith.constant 0 : i32
    return %c0_i32, %c0_i32_0 : i32, i32
  }
  func.func @transform_2(%arg0: i32) -> (i32, i32) {
    %c0_i32 = arith.constant 0 : i32
    %c0_i32_0 = arith.constant 0 : i32
    %c0_i32_1 = arith.constant 0 : i32
    return %c0_i32, %c0_i32_0 : i32, i32
  }
  func.func @transform_3(%arg0: i32) -> (i32, i32) {
    %c0_i32 = arith.constant 0 : i32
    %c0_i32_0 = arith.constant 0 : i32
    %c0_i32_1 = arith.constant 0 : i32
    return %c0_i32, %c0_i32_0 : i32, i32
  }
  func.func @transform_4(%arg0: i32) -> (i32, i32) {
    %c0_i32 = arith.constant 0 : i32
    %c0_i32_0 = arith.constant 0 : i32
    %c0_i32_1 = arith.constant 0 : i32
    return %c0_i32, %c0_i32_0 : i32, i32
  }
  func.func @transform_5(%arg0: i32) -> (i32, i32) {
    %c0_i32 = arith.constant 0 : i32
    %c0_i32_0 = arith.constant 0 : i32
    return %arg0, %c0_i32 : i32, i32
  }
}

</mosaic_0001>

<bundles_post_ra>
// kernel: tpu_custom_call.1
= control target key start
LH: loop header
LB: loop body
LE: loop exit
PB: predicated region body
PF: predicated region fallthrough
CT: control target
= control target key end

     0   :  { %10 = vsyncpa [#allocation3], 0  ;;  %s4634_s0 = inlined_call_operand.hbm [shape: f32[8,768], index: 0, kind: input, shape index: {}]   ;;  %s4635_s1 = inlined_call_operand.hbm [shape: bf16[768,1024], index: 1, kind: input, shape index: {}]   ;;  %s4636_s2 = inlined_call_operand.hbm [shape: f32[1,1024], index: 2, kind: input, shape index: {}]   ;;  %s4637_s3 = inlined_call_operand.vmem [shape: bf16[1024,4], index: 3, kind: input, shape index: {}]   ;;  %s4638_s4 = inlined_call_operand.hbm [shape: f32[1,4], index: 4, kind: input, shape index: {}]   ;;  %s4639_s5 = inlined_call_operand.vmem [shape: f32[8,4], index: 5, kind: output, shape index: {}]  }
   0x1   :  { %11 = vsyncpa [#allocation5], 0 }
   0x2   :  { %12 = vsyncpa [#allocation8], 0  ;;  %s4318_s18 = smov [#allocation4]  }
   0x3   :  { %s28_s19 = sshll.u32 %s4318_s18, 4  ;;  %s29_s19 = int_to_ptr.vmem [resolvable:$true] %s28_s19 }
   0x4   :  { %s4240_s20 = scalar_lea.vmem %s29_s19, 49152  ;;  %p4245_p1 = scmp.lt.s32.totalorder %s29_s19, %s29_s19 }
   0x5   :  { %p4241_p0 = scmp.ne.s32.totalorder %s29_s19, %s4240_s20  ;;  %p4246_p2 = scmp.lt.s32.totalorder %s4240_s20, %s4240_s20 }
   0x7   :  { %p4247_p3 = por %p4246_p2, %p4245_p1 }
   0x9   :  { %p4248_p4 = pnand %p4247_p3, %p4241_p0 }
   0xb   :  { %4251 = shalt.err (!%p4248_p4)
}
   0xc   :  { %s4319_s21 = smov 512   ;;  %s4320_s22 = smov 32  }
   0xd   :  { %34 = dma.hbm_to_vmem [thread:$0]  %s4635_s1, 49152, %s29_s19, [#allocation5], %s4319_s21, %s4319_s21, %s4320_s22  }
   0xe   :  { %s4321_s25 = smov [#allocation2]   ;;  %s4322_s27 = smov [#allocation6]  }
   0xf   :  { %s19_s26 = sshll.u32 %s4321_s25, 4  ;;  %s41_s28 = sshll.u32 %s4322_s27, 4  ;;  %s20_s26 = int_to_ptr.vmem [resolvable:$true] %s19_s26  ;;  %s42_s28 = int_to_ptr.vmem [resolvable:$true] %s41_s28 }
  0x10   :  { %s4260_s29 = scalar_lea.vmem %s20_s26, 768  ;;  %p4265_p6 = scmp.lt.s32.totalorder %s20_s26, %s20_s26 }
  0x11   :  { %p4261_p5 = scmp.ne.s32.totalorder %s20_s26, %s4260_s29  ;;  %p4266_p7 = scmp.lt.s32.totalorder %s4260_s29, %s4260_s29 }
  0x13   :  { %p4267_p8 = por %p4266_p7, %p4265_p6 }
  0x15   :  { %p4268_p9 = pnand %p4267_p8, %p4261_p5 }
  0x17   :  { %4271 = shalt.err (!%p4268_p9)
}
  0x18   :  { %22 = dma.hbm_to_vmem [thread:$0]  %s4634_s0, 768, %s20_s26, [#allocation3]  }
  0x19   :  { %s4280_s7 = scalar_lea.vmem %s42_s28, 128  ;;  %p4285_p11 = scmp.lt.s32.totalorder %s42_s28, %s42_s28 }
  0x1a   :  { %p4281_p10 = scmp.ne.s32.totalorder %s42_s28, %s4280_s7  ;;  %p4286_p12 = scmp.lt.s32.totalorder %s4280_s7, %s4280_s7 }
  0x1c   :  { %p4287_p13 = por %p4286_p12, %p4285_p11 }
  0x1e   :  { %p4288_p0 = pnand %p4287_p13, %p4281_p10 }
  0x20   :  { %4291 = shalt.err (!%p4288_p0)
}
  0x21   :  { %44 = dma.hbm_to_vmem [thread:$0]  %s4636_s2, 128, %s42_s28, [#allocation5]  }
  0x22   :  { %s4323_s9 = smov [#allocation7]  }
  0x23   :  { %s53_s10 = sshll.u32 %s4323_s9, 4  ;;  %s54_s10 = int_to_ptr.vmem [resolvable:$true] %s53_s10 }
  0x24   :  { %s4300_s11 = scalar_lea.vmem %s54_s10, 16  ;;  %s4304_s12 = scalar_lea.vmem %s54_s10, 32 }
  0x25   :  { %p4301_p1 = scmp.ne.s32.totalorder %s54_s10, %s4300_s11  ;;  %p4305_p2 = scmp.lt.s32.totalorder %s54_s10, %s54_s10 }
  0x26   :  { %p4306_p3 = scmp.lt.s32.totalorder %s4304_s12, %s4300_s11 }
  0x28   :  { %p4307_p4 = por %p4306_p3, %p4305_p2 }
  0x2a   :  { %p4308_p5 = pnand %p4307_p4, %p4301_p1 }
  0x2c   :  { %4311 = shalt.err (!%p4308_p5)
}
  0x2d   :  { %56 = dma.hbm_to_vmem [thread:$0]  %s4638_s4, 16, %s54_s10, [#allocation8]  }
  0x2e   :  { %4312 = dma.done.wait [#allocation3], 768  }
  0x2f   :  { %4313 = vsyncadd [#allocation3], 4294966528 }
  0x30   :  { %4314 = dma.done.wait [#allocation5], 49280  }
  0x31   :  { %4315 = vsyncadd [#allocation5], 4294918016 }
  0x32   :  { %4316 = dma.done.wait [#allocation8], 16  }
  0x33   :  { %4317 = vsyncadd [#allocation8], 4294967280  ;;  %v138_v0 = vld [vmem:[#allocation4 + $0x1c0] sm:$0xff]  ;;  %v71_v53 = vld [vmem:[#allocation2 + $0x8] sm:$0xff]  ;;  %vm3615_vm0 = vcmask 31744  }
  0x34   :  { %v142_v1 = vld [vmem:[#allocation4 + $0x1e0] sm:$0xff]  ;;  %v73_v54 = vld [vmem:[#allocation2 + $0x18] sm:$0xff]  ;;  %v4366_v58 = vpack.c.bf16 %v71_v53, %v71_v53 }
  0x35   :  { %v266_v2 = vld [vmem:[#allocation4 + $0x5c0] sm:$0xff]  ;;  %v3681_v3 = vcombine.high %v138_v0, %v142_v1  ;;  %v3680_v5 = vcombine.low %v138_v0, %v142_v1  ;;  %v4368_v59 = vpack.c.bf16 %v73_v54, %v73_v54 }
  0x36   :  { %v270_v4 = vld [vmem:[#allocation4 + $0x5e0] sm:$0xff]  ;;  %2460 = vmatprep.mubr.bf16.mxu0 %v4366_v58 }
  0x37   :  { %v130_v6 = vld [vmem:[#allocation4 + $0x180] sm:$0xff]  ;;  %v3809_v8 = vcombine.high %v266_v2, %v270_v4  ;;  %v3808_v9 = vcombine.low %v266_v2, %v270_v4  ;;  %2428 = vmatprep.subr.bf16.mxu0 %v3681_v3  ;;  %2501 = vmatprep.mubr.bf16.mxu1 %v4368_v59 }
  0x38   :  { %v134_v7 = vld [vmem:[#allocation4 + $0x1a0] sm:$0xff]  ;;  %2429 = vmatpush1.bf16.msra.mxu0 %v3680_v5 }
  0x39   :  { %v3673_v10 = vcombine.high %v130_v6, %v134_v7  ;;  %v258_v11 = vld [vmem:[#allocation4 + $0x580] sm:$0xff]  ;;  %2469 = vmatprep.subr.bf16.mxu1 %v3809_v8  ;;  %v3672_v18 = vcombine.low %v130_v6, %v134_v7 }
  0x3a   :  { %v262_v12 = vld [vmem:[#allocation4 + $0x5a0] sm:$0xff]  ;;  %2470 = vmatpush1.bf16.msra.mxu1 %v3808_v9 }
  0x3b   :  { %v122_v13 = vld [vmem:[#allocation4 + $0x140] sm:$0xff]  ;;  %v3801_v14 = vcombine.high %v258_v11, %v262_v12  ;;  %2430 = vmatprep.subr.bf16.mxu0 %v3673_v10  ;;  %v3800_v19 = vcombine.low %v258_v11, %v262_v12 }
  0x3c   :  { %v126_v15 = vld [vmem:[#allocation4 + $0x160] sm:$0xff]  ;;  %2431 = vmatpush1.bf16.msra.mxu0 %v3672_v18 }
  0x3d   :  { %v250_v16 = vld [vmem:[#allocation4 + $0x540] sm:$0xff]  ;;  %v3665_v20 = vcombine.high %v122_v13, %v126_v15  ;;  %2471 = vmatprep.subr.bf16.mxu1 %v3801_v14  ;;  %v3664_v26 = vcombine.low %v122_v13, %v126_v15 }
  0x3e   :  { %v254_v17 = vld [vmem:[#allocation4 + $0x560] sm:$0xff]  ;;  %2472 = vmatpush1.bf16.msra.mxu1 %v3800_v19 }
  0x3f   :  { %v3793_v21 = vcombine.high %v250_v16, %v254_v17  ;;  %v114_v22 = vld [vmem:[#allocation4 + $0x100] sm:$0xff]  ;;  %2432 = vmatprep.subr.bf16.mxu0 %v3665_v20  ;;  %v3792_v27 = vcombine.low %v250_v16, %v254_v17 }
  0x40   :  { %v118_v23 = vld [vmem:[#allocation4 + $0x120] sm:$0xff]  ;;  %2433 = vmatpush1.bf16.msra.mxu0 %v3664_v26 }
  0x41   :  { %v242_v24 = vld [vmem:[#allocation4 + $0x500] sm:$0xff]  ;;  %v3657_v28 = vcombine.high %v114_v22, %v118_v23  ;;  %2473 = vmatprep.subr.bf16.mxu1 %v3793_v21  ;;  %v3656_v34 = vcombine.low %v114_v22, %v118_v23 }
  0x42   :  { %v246_v25 = vld [vmem:[#allocation4 + $0x520] sm:$0xff]  ;;  %2474 = vmatpush1.bf16.msra.mxu1 %v3792_v27 }
  0x43   :  { %v3785_v29 = vcombine.high %v242_v24, %v246_v25  ;;  %v106_v30 = vld [vmem:[#allocation4 + $0xc0] sm:$0xff]  ;;  %2434 = vmatprep.subr.bf16.mxu0 %v3657_v28  ;;  %v3784_v35 = vcombine.low %v242_v24, %v246_v25 }
  0x44   :  { %v110_v31 = vld [vmem:[#allocation4 + $0xe0] sm:$0xff]  ;;  %2435 = vmatpush1.bf16.msra.mxu0 %v3656_v34 }
  0x45   :  { %v234_v32 = vld [vmem:[#allocation4 + $0x4c0] sm:$0xff]  ;;  %v3649_v36 = vcombine.high %v106_v30, %v110_v31  ;;  %2475 = vmatprep.subr.bf16.mxu1 %v3785_v29  ;;  %v3648_v42 = vcombine.low %v106_v30, %v110_v31 }
  0x46   :  { %v238_v33 = vld [vmem:[#allocation4 + $0x4e0] sm:$0xff]  ;;  %2476 = vmatpush1.bf16.msra.mxu1 %v3784_v35 }
  0x47   :  { %v3777_v37 = vcombine.high %v234_v32, %v238_v33  ;;  %v98_v38 = vld [vmem:[#allocation4 + $0x80] sm:$0xff]  ;;  %2436 = vmatprep.subr.bf16.mxu0 %v3649_v36  ;;  %v3776_v43 = vcombine.low %v234_v32, %v238_v33 }
  0x48   :  { %v102_v39 = vld [vmem:[#allocation4 + $0xa0] sm:$0xff]  ;;  %2437 = vmatpush1.bf16.msra.mxu0 %v3648_v42 }
  0x49   :  { %v226_v40 = vld [vmem:[#allocation4 + $0x480] sm:$0xff]  ;;  %v3641_v44 = vcombine.high %v98_v38, %v102_v39  ;;  %2477 = vmatprep.subr.bf16.mxu1 %v3777_v37  ;;  %v3640_v50 = vcombine.low %v98_v38, %v102_v39 }
  0x4a   :  { %v230_v41 = vld [vmem:[#allocation4 + $0x4a0] sm:$0xff]  ;;  %2478 = vmatpush1.bf16.msra.mxu1 %v3776_v43 }
  0x4b   :  { %v3769_v45 = vcombine.high %v226_v40, %v230_v41  ;;  %v90_v46 = vld [vmem:[#allocation4 + $0x40] sm:$0xff]  ;;  %2438 = vmatprep.subr.bf16.mxu0 %v3641_v44  ;;  %v3768_v51 = vcombine.low %v226_v40, %v230_v41 }
  0x4c   :  { %v94_v47 = vld [vmem:[#allocation4 + $0x60] sm:$0xff]  ;;  %2439 = vmatpush1.bf16.msra.mxu0 %v3640_v50 }
  0x4d   :  { %v218_v48 = vld [vmem:[#allocation4 + $0x440] sm:$0xff]  ;;  %v3633_v52 = vcombine.high %v90_v46, %v94_v47  ;;  %2479 = vmatprep.subr.bf16.mxu1 %v3769_v45  ;;  %v3632_v62 = vcombine.low %v90_v46, %v94_v47 }
  0x4e   :  { %v222_v49 = vld [vmem:[#allocation4 + $0x460] sm:$0xff]  ;;  %2480 = vmatpush1.bf16.msra.mxu1 %v3768_v51 }
  0x4f   :  { %v3761_v55 = vcombine.high %v218_v48, %v222_v49  ;;  %v82_v56 = vld [vmem:[#allocation4] sm:$0xff]  ;;  %2440 = vmatprep.subr.bf16.mxu0 %v3633_v52  ;;  %v3760_v63 = vcombine.low %v218_v48, %v222_v49 }
  0x50   :  { %v86_v57 = vld [vmem:[#allocation4 + $0x20] sm:$0xff]  ;;  %2441 = vmatpush1.bf16.msra.mxu0 %v3632_v62 }
  0x51   :  { %v210_v60 = vld [vmem:[#allocation4 + $0x400] sm:$0xff]  ;;  %v3625_v0 = vcombine.high %v82_v56, %v86_v57  ;;  %2481 = vmatprep.subr.bf16.mxu1 %v3761_v55  ;;  %v3624_v6 = vcombine.low %v82_v56, %v86_v57 }
  0x52   :  { %v214_v61 = vld [vmem:[#allocation4 + $0x420] sm:$0xff]  ;;  %2482 = vmatpush1.bf16.msra.mxu1 %v3760_v63 }
  0x53   :  { %v3753_v1 = vcombine.high %v210_v60, %v214_v61  ;;  %v202_v2 = vld [vmem:[#allocation4 + $0x3c0] sm:$0xff]  ;;  %2442 = vmatprep.subr.bf16.mxu0 %v3625_v0  ;;  %v3752_v7 = vcombine.low %v210_v60, %v214_v61 }
  0x54   :  { %v206_v3 = vld [vmem:[#allocation4 + $0x3e0] sm:$0xff]  ;;  %2443 = vmatpush1.bf16.msra.mxu0 %v3624_v6  ;;  %v139_v6 = vld [vmem:[#allocation4 + $0x1c8] sm:$0xff] }
  0x55   :  { %v330_v4 = vld [vmem:[#allocation4 + $0x7c0] sm:$0xff]  ;;  %v3745_v8 = vcombine.high %v202_v2, %v206_v3  ;;  %2483 = vmatprep.subr.bf16.mxu1 %v3753_v1  ;;  %v3744_v14 = vcombine.low %v202_v2, %v206_v3 }
  0x56   :  { %v334_v5 = vld [vmem:[#allocation4 + $0x7e0] sm:$0xff]  ;;  %2484 = vmatpush1.bf16.msra.mxu1 %v3752_v7  ;;  %v143_v7 = vld [vmem:[#allocation4 + $0x1e8] sm:$0xff] }
  0x57   :  { %v3873_v9 = vcombine.high %v330_v4, %v334_v5  ;;  %v194_v10 = vld [vmem:[#allocation4 + $0x380] sm:$0xff]  ;;  %2444 = vmatprep.subr.bf16.mxu0 %v3745_v8  ;;  %v3872_v15 = vcombine.low %v330_v4, %v334_v5 }
  0x58   :  { %v198_v11 = vld [vmem:[#allocation4 + $0x3a0] sm:$0xff]  ;;  %2445 = vmatpush2.bf16.msra.mxu0 %v3744_v14 }
  0x59   :  { %v322_v12 = vld [vmem:[#allocation4 + $0x780] sm:$0xff]  ;;  %v3737_v16 = vcombine.high %v194_v10, %v198_v11  ;;  %2485 = vmatprep.subr.bf16.mxu1 %v3873_v9  ;;  %v3736_v22 = vcombine.low %v194_v10, %v198_v11  ;;  %v70_v9 = vld [vmem:[#allocation2] sm:$0xff] }
  0x5a   :  { %v326_v13 = vld [vmem:[#allocation4 + $0x7a0] sm:$0xff]  ;;  %2486 = vmatpush2.bf16.msra.mxu1 %v3872_v15 }
  0x5b   :  { %v3865_v17 = vcombine.high %v322_v12, %v326_v13  ;;  %v186_v18 = vld [vmem:[#allocation4 + $0x340] sm:$0xff]  ;;  %2446 = vmatprep.subr.bf16.mxu0 %v3737_v16  ;;  %v3864_v23 = vcombine.low %v322_v12, %v326_v13  ;;  %v3683_v13 = vcombine.high %v139_v6, %v143_v7  ;;  %v4372_v16 = vpack.c.bf16 %v70_v9, %v70_v9 }
  0x5c   :  { %v190_v19 = vld [vmem:[#allocation4 + $0x360] sm:$0xff]  ;;  %2447 = vmatpush2.bf16.msra.mxu0 %v3736_v22  ;;  %v3682_v22 = vcombine.low %v139_v6, %v143_v7  ;;  %v87_v7 = vld [vmem:[#allocation4 + $0x28] sm:$0xff] }
  0x5d   :  { %v314_v20 = vld [vmem:[#allocation4 + $0x740] sm:$0xff]  ;;  %v3729_v24 = vcombine.high %v186_v18, %v190_v19  ;;  %2487 = vmatprep.subr.bf16.mxu1 %v3865_v17  ;;  %v3728_v30 = vcombine.low %v186_v18, %v190_v19  ;;  %v131_v17 = vld [vmem:[#allocation4 + $0x188] sm:$0xff]  ;;  %v75_v19 = vld [vmem:[#allocation2 + $0x28] sm:$0xff] }
  0x5e   :  { %v318_v21 = vld [vmem:[#allocation4 + $0x760] sm:$0xff]  ;;  %2488 = vmatpush2.bf16.msra.mxu1 %v3864_v23  ;;  %v135_v18 = vld [vmem:[#allocation4 + $0x1a8] sm:$0xff] }
  0x5f   :  { %v3857_v25 = vcombine.high %v314_v20, %v318_v21  ;;  %v178_v26 = vld [vmem:[#allocation4 + $0x300] sm:$0xff]  ;;  %2448 = vmatprep.subr.bf16.mxu0 %v3729_v24  ;;  %v3856_v31 = vcombine.low %v314_v20, %v318_v21  ;;  %v3675_v24 = vcombine.high %v131_v17, %v135_v18 }
  0x60   :  { %v182_v27 = vld [vmem:[#allocation4 + $0x320] sm:$0xff]  ;;  %2449 = vmatpush2.bf16.msra.mxu0 %v3728_v30 }
  0x61   :  { %v306_v28 = vld [vmem:[#allocation4 + $0x700] sm:$0xff]  ;;  %v3721_v32 = vcombine.high %v178_v26, %v182_v27  ;;  %2489 = vmatprep.subr.bf16.mxu1 %v3857_v25  ;;  %v3720_v38 = vcombine.low %v178_v26, %v182_v27  ;;  %v123_v27 = vld [vmem:[#allocation4 + $0x148] sm:$0xff] }
  0x62   :  { %v310_v29 = vld [vmem:[#allocation4 + $0x720] sm:$0xff]  ;;  %2490 = vmatpush2.bf16.msra.mxu1 %v3856_v31  ;;  %v3674_v31 = vcombine.low %v131_v17, %v135_v18 }
  0x63   :  { %v3849_v33 = vcombine.high %v306_v28, %v310_v29  ;;  %v170_v34 = vld [vmem:[#allocation4 + $0x2c0] sm:$0xff]  ;;  %2450 = vmatprep.subr.bf16.mxu0 %v3721_v32  ;;  %v3848_v39 = vcombine.low %v306_v28, %v310_v29  ;;  %v4376_v28 = vpack.c.bf16 %v75_v19, %v75_v19  ;;  %v127_v29 = vld [vmem:[#allocation4 + $0x168] sm:$0xff] }
  0x64   :  { %v174_v35 = vld [vmem:[#allocation4 + $0x2e0] sm:$0xff]  ;;  %2451 = vmatpush2.bf16.msra.mxu0 %v3720_v38 }
  0x65   :  { %v298_v36 = vld [vmem:[#allocation4 + $0x6c0] sm:$0xff]  ;;  %v3713_v40 = vcombine.high %v170_v34, %v174_v35  ;;  %2491 = vmatprep.subr.bf16.mxu1 %v3849_v33  ;;  %v3712_v46 = vcombine.low %v170_v34, %v174_v35  ;;  %v115_v35 = vld [vmem:[#allocation4 + $0x108] sm:$0xff] }
  0x66   :  { %v302_v37 = vld [vmem:[#allocation4 + $0x6e0] sm:$0xff]  ;;  %2492 = vmatpush2.bf16.msra.mxu1 %v3848_v39  ;;  %v3666_v39 = vcombine.low %v123_v27, %v127_v29 }
  0x67   :  { %v3841_v41 = vcombine.high %v298_v36, %v302_v37  ;;  %v162_v42 = vld [vmem:[#allocation4 + $0x280] sm:$0xff]  ;;  %2452 = vmatprep.subr.bf16.mxu0 %v3713_v40  ;;  %v3840_v47 = vcombine.low %v298_v36, %v302_v37  ;;  %v3667_v36 = vcombine.high %v123_v27, %v127_v29  ;;  %v119_v37 = vld [vmem:[#allocation4 + $0x128] sm:$0xff] }
  0x68   :  { %v166_v43 = vld [vmem:[#allocation4 + $0x2a0] sm:$0xff]  ;;  %2453 = vmatpush2.bf16.msra.mxu0 %v3712_v46 }
  0x69   :  { %v290_v44 = vld [vmem:[#allocation4 + $0x680] sm:$0xff]  ;;  %v3705_v48 = vcombine.high %v162_v42, %v166_v43  ;;  %2493 = vmatprep.subr.bf16.mxu1 %v3841_v41  ;;  %v3704_v54 = vcombine.low %v162_v42, %v166_v43  ;;  %v107_v43 = vld [vmem:[#allocation4 + $0xc8] sm:$0xff] }
  0x6a   :  { %v294_v45 = vld [vmem:[#allocation4 + $0x6a0] sm:$0xff]  ;;  %2494 = vmatpush2.bf16.msra.mxu1 %v3840_v47  ;;  %v3658_v47 = vcombine.low %v115_v35, %v119_v37 }
  0x6b   :  { %v3833_v49 = vcombine.high %v290_v44, %v294_v45  ;;  %v154_v50 = vld [vmem:[#allocation4 + $0x240] sm:$0xff]  ;;  %2454 = vmatprep.subr.bf16.mxu0 %v3705_v48  ;;  %v3832_v55 = vcombine.low %v290_v44, %v294_v45  ;;  %v3659_v44 = vcombine.high %v115_v35, %v119_v37  ;;  %v111_v45 = vld [vmem:[#allocation4 + $0xe8] sm:$0xff] }
  0x6c   :  { %v158_v51 = vld [vmem:[#allocation4 + $0x260] sm:$0xff]  ;;  %2455 = vmatpush2.bf16.msra.mxu0 %v3704_v54 }
  0x6d   :  { %v282_v52 = vld [vmem:[#allocation4 + $0x640] sm:$0xff]  ;;  %v3697_v56 = vcombine.high %v154_v50, %v158_v51  ;;  %2495 = vmatprep.subr.bf16.mxu1 %v3833_v49  ;;  %v3696_v0 = vcombine.low %v154_v50, %v158_v51  ;;  %v99_v51 = vld [vmem:[#allocation4 + $0x88] sm:$0xff] }
  0x6e   :  { %v286_v53 = vld [vmem:[#allocation4 + $0x660] sm:$0xff]  ;;  %2496 = vmatpush2.bf16.msra.mxu1 %v3832_v55  ;;  %v3650_v55 = vcombine.low %v107_v43, %v111_v45 }
  0x6f   :  { %v3825_v57 = vcombine.high %v282_v52, %v286_v53  ;;  %v146_v60 = vld [vmem:[#allocation4 + $0x200] sm:$0xff]  ;;  %2456 = vmatprep.subr.bf16.mxu0 %v3697_v56  ;;  %v3824_v1 = vcombine.low %v282_v52, %v286_v53  ;;  %v3651_v52 = vcombine.high %v107_v43, %v111_v45  ;;  %v103_v53 = vld [vmem:[#allocation4 + $0xa8] sm:$0xff] }
  0x70   :  { %v150_v61 = vld [vmem:[#allocation4 + $0x220] sm:$0xff]  ;;  %2457 = vmatpush2.bf16.msra.mxu0 %v3696_v0 }
  0x71   :  { %v274_v62 = vld [vmem:[#allocation4 + $0x600] sm:$0xff]  ;;  %v3689_v2 = vcombine.high %v146_v60, %v150_v61  ;;  %2497 = vmatprep.subr.bf16.mxu1 %v3825_v57  ;;  %v3688_v8 = vcombine.low %v146_v60, %v150_v61  ;;  %v91_v61 = vld [vmem:[#allocation4 + $0x48] sm:$0xff] }
  0x72   :  { %v278_v63 = vld [vmem:[#allocation4 + $0x620] sm:$0xff]  ;;  %2498 = vmatpush2.bf16.msra.mxu1 %v3824_v1  ;;  %v3642_v1 = vcombine.low %v99_v51, %v103_v53 }
  0x73   :  { %v3817_v3 = vcombine.high %v274_v62, %v278_v63  ;;  %v394_v4 = vld [vmem:[#allocation4 + $0x9c0] sm:$0xff]  ;;  %2458 = vmatprep.subr.bf16.mxu0 %v3689_v2  ;;  %v3816_v10 = vcombine.low %v274_v62, %v278_v63  ;;  %v3643_v62 = vcombine.high %v99_v51, %v103_v53  ;;  %v95_v63 = vld [vmem:[#allocation4 + $0x68] sm:$0xff] }
  0x74   :  { %v398_v5 = vld [vmem:[#allocation4 + $0x9e0] sm:$0xff]  ;;  %2459 = vmatpush2.bf16.msra.mxu0 %v3688_v8  ;;  %v3635_v6 = vcombine.high %v91_v61, %v95_v63  ;;  %v3634_v9 = vcombine.low %v91_v61, %v95_v63 }
  0x75   :  { %v72_v11 = vld [vmem:[#allocation2 + $0x10] sm:$0xff]  ;;  %v3937_v12 = vcombine.high %v394_v4, %v398_v5  ;;  %2499 = vmatprep.subr.bf16.mxu1 %v3817_v3  ;;  %v3936_v21 = vcombine.low %v394_v4, %v398_v5  ;;  %v83_v5 = vld [vmem:[#allocation4 + $0x8] sm:$0xff] }
  0x76   :  { %v386_v14 = vld [vmem:[#allocation4 + $0x980] sm:$0xff]  ;;  %v4374_v20 = vpack.c.bf16 %v72_v11, %v72_v11  ;;  %2500 = vmatpush2.bf16.msra.mxu1 %v3816_v10  ;;  %v3626_v18 = vcombine.low %v83_v5, %v87_v7 }
  0x77   :  { %v390_v15 = vld [vmem:[#allocation4 + $0x9a0] sm:$0xff]  ;;  %2510 = vmatprep.subr.bf16.mxu0 %v3937_v12  ;;  %2551 = vmatprep.subr.bf16.mxu1 %v3683_v13  ;;  %v203_v13 = vld [vmem:[#allocation4 + $0x3c8] sm:$0xff] }
  0x78   :  { %v3929_v23 = vcombine.high %v386_v14, %v390_v15  ;;  %v378_v25 = vld [vmem:[#allocation4 + $0x940] sm:$0xff]  ;;  %2461 = vmatmul.mubr.bf16.vlgmr.msra.gmra.mxu0 %v4372_v16  ;;  %v3928_v30 = vcombine.low %v386_v14, %v390_v15  ;;  %v3627_v14 = vcombine.high %v83_v5, %v87_v7  ;;  %v207_v15 = vld [vmem:[#allocation4 + $0x3e8] sm:$0xff] }
  0x79   :  { %v382_v26 = vld [vmem:[#allocation4 + $0x960] sm:$0xff]  ;;  %2502 = vmatmul.mubr.bf16.vlgmr.msra.gmra.mxu1 %v4374_v20  ;;  %2511 = vmatpush1.bf16.msra.mxu0 %v3936_v21  ;;  %v3746_v27 = vcombine.low %v203_v13, %v207_v15 }
  0x7a   :  { %2552 = vmatpush1.bf16.msra.mxu1 %v3682_v22  ;;  %2512 = vmatprep.subr.bf16.mxu0 %v3929_v23  ;;  %v3921_v32 = vcombine.high %v378_v25, %v382_v26  ;;  %v370_v33 = vld [vmem:[#allocation4 + $0x900] sm:$0xff]  ;;  %v3920_v38 = vcombine.low %v378_v25, %v382_v26  ;;  %v195_v23 = vld [vmem:[#allocation4 + $0x388] sm:$0xff] }
  0x7b   :  { %v374_v34 = vld [vmem:[#allocation4 + $0x920] sm:$0xff]  ;;  %2553 = vmatprep.subr.bf16.mxu1 %v3675_v24  ;;  %2542 = vmatprep.mubr.bf16.mxu0 %v4376_v28  ;;  %v3747_v24 = vcombine.high %v203_v13, %v207_v15  ;;  %v199_v25 = vld [vmem:[#allocation4 + $0x3a8] sm:$0xff] }
  0x7c   :  { %2583 = vmatprep.mubr.bf16.mxu1 %v4366_v58  ;;  %v3913_v40 = vcombine.high %v370_v33, %v374_v34  ;;  %v362_v41 = vld [vmem:[#allocation4 + $0x8c0] sm:$0xff]  ;;  %v3912_v46 = vcombine.low %v370_v33, %v374_v34  ;;  %v3739_v33 = vcombine.high %v195_v23, %v199_v25  ;;  %v191_v34 = vld [vmem:[#allocation4 + $0x368] sm:$0xff] }
  0x7d   :  { %2513 = vmatpush1.bf16.msra.mxu0 %v3928_v30  ;;  %v366_v42 = vld [vmem:[#allocation4 + $0x8e0] sm:$0xff] }
  0x7e   :  { %2554 = vmatpush1.bf16.msra.mxu1 %v3674_v31  ;;  %2514 = vmatprep.subr.bf16.mxu0 %v3921_v32  ;;  %v3905_v48 = vcombine.high %v362_v41, %v366_v42  ;;  %v354_v49 = vld [vmem:[#allocation4 + $0x880] sm:$0xff]  ;;  %v3904_v54 = vcombine.low %v362_v41, %v366_v42  ;;  %v187_v32 = vld [vmem:[#allocation4 + $0x348] sm:$0xff] }
  0x7f   :  { %2555 = vmatprep.subr.bf16.mxu1 %v3667_v36  ;;  %v358_v50 = vld [vmem:[#allocation4 + $0x8a0] sm:$0xff]  ;;  %v3738_v36 = vcombine.low %v195_v23, %v199_v25  ;;  %v3731_v41 = vcombine.high %v187_v32, %v191_v34  ;;  %v183_v42 = vld [vmem:[#allocation4 + $0x328] sm:$0xff] }
  0x80   :  { %v3897_v56 = vcombine.high %v354_v49, %v358_v50  ;;  %v346_v57 = vld [vmem:[#allocation4 + $0x840] sm:$0xff]  ;;  %v3896_v0 = vcombine.low %v354_v49, %v358_v50  ;;  %v175_v50 = vld [vmem:[#allocation4 + $0x2e8] sm:$0xff] }
  0x81   :  { %2515 = vmatpush1.bf16.msra.mxu0 %v3920_v38  ;;  %v350_v60 = vld [vmem:[#allocation4 + $0x860] sm:$0xff]  ;;  %v399_v23 = vld [vmem:[#allocation4 + $0x9e8] sm:$0xff] }
  0x82   :  { %2556 = vmatpush1.bf16.msra.mxu1 %v3666_v39  ;;  %2516 = vmatprep.subr.bf16.mxu0 %v3913_v40  ;;  %v3889_v2 = vcombine.high %v346_v57, %v350_v60  ;;  %v338_v3 = vld [vmem:[#allocation4 + $0x800] sm:$0xff]  ;;  %v3888_v8 = vcombine.low %v346_v57, %v350_v60  ;;  %v179_v40 = vld [vmem:[#allocation4 + $0x308] sm:$0xff] }
  0x83   :  { %2557 = vmatprep.subr.bf16.mxu1 %v3659_v44  ;;  %v342_v4 = vld [vmem:[#allocation4 + $0x820] sm:$0xff]  ;;  %v3730_v44 = vcombine.low %v187_v32, %v191_v34  ;;  %v3723_v49 = vcombine.high %v179_v40, %v183_v42  ;;  %v167_v60 = vld [vmem:[#allocation4 + $0x2a8] sm:$0xff] }
  0x84   :  { %v3881_v10 = vcombine.high %v338_v3, %v342_v4  ;;  %v458_v11 = vld [vmem:[#allocation4 + $0xbc0] sm:$0xff]  ;;  %v3880_v17 = vcombine.low %v338_v3, %v342_v4  ;;  %v159_v4 = vld [vmem:[#allocation4 + $0x268] sm:$0xff] }
  0x85   :  { %2517 = vmatpush1.bf16.msra.mxu0 %v3912_v46  ;;  %v462_v12 = vld [vmem:[#allocation4 + $0xbe0] sm:$0xff]  ;;  %v391_v32 = vld [vmem:[#allocation4 + $0x9a8] sm:$0xff] }
  0x86   :  { %2558 = vmatpush1.bf16.msra.mxu1 %v3658_v47  ;;  %2518 = vmatprep.subr.bf16.mxu0 %v3905_v48  ;;  %v4001_v19 = vcombine.high %v458_v11, %v462_v12  ;;  %v450_v21 = vld [vmem:[#allocation4 + $0xb80] sm:$0xff]  ;;  %v4000_v26 = vcombine.low %v458_v11, %v462_v12  ;;  %v171_v48 = vld [vmem:[#allocation4 + $0x2c8] sm:$0xff] }
  0x87   :  { %2559 = vmatprep.subr.bf16.mxu1 %v3651_v52  ;;  %v454_v22 = vld [vmem:[#allocation4 + $0xba0] sm:$0xff]  ;;  %v3722_v52 = vcombine.low %v179_v40, %v183_v42  ;;  %v3715_v57 = vcombine.high %v171_v48, %v175_v50  ;;  %v151_v12 = vld [vmem:[#allocation4 + $0x228] sm:$0xff] }
  0x88   :  { %v3993_v29 = vcombine.high %v450_v21, %v454_v22  ;;  %v442_v30 = vld [vmem:[#allocation4 + $0xb40] sm:$0xff]  ;;  %v3992_v35 = vcombine.low %v450_v21, %v454_v22  ;;  %v74_v22 = vld [vmem:[#allocation2 + $0x20] sm:$0xff]  ;;  %v379_v40 = vld [vmem:[#allocation4 + $0x948] sm:$0xff] }
  0x89   :  { %2519 = vmatpush1.bf16.msra.mxu0 %v3904_v54  ;;  %v446_v31 = vld [vmem:[#allocation4 + $0xb60] sm:$0xff] }
  0x8a   :  { %2560 = vmatpush1.bf16.msra.mxu1 %v3650_v55  ;;  %2520 = vmatprep.subr.bf16.mxu0 %v3897_v56  ;;  %v3985_v37 = vcombine.high %v442_v30, %v446_v31  ;;  %v434_v38 = vld [vmem:[#allocation4 + $0xb00] sm:$0xff]  ;;  %v3984_v43 = vcombine.low %v442_v30, %v446_v31  ;;  %v163_v56 = vld [vmem:[#allocation4 + $0x288] sm:$0xff] }
  0x8b   :  { %2561 = vmatprep.subr.bf16.mxu1 %v3643_v62  ;;  %v438_v39 = vld [vmem:[#allocation4 + $0xb20] sm:$0xff]  ;;  %v3714_v62 = vcombine.low %v171_v48, %v175_v50  ;;  %v3707_v3 = vcombine.high %v163_v56, %v167_v60  ;;  %v387_v30 = vld [vmem:[#allocation4 + $0x988] sm:$0xff] }
  0x8c   :  { %v3977_v45 = vcombine.high %v434_v38, %v438_v39  ;;  %v426_v46 = vld [vmem:[#allocation4 + $0xac0] sm:$0xff]  ;;  %v3976_v51 = vcombine.low %v434_v38, %v438_v39  ;;  %v3931_v38 = vcombine.high %v387_v30, %v391_v32  ;;  %v255_v39 = vld [vmem:[#allocation4 + $0x568] sm:$0xff] }
  0x8d   :  { %2521 = vmatpush1.bf16.msra.mxu0 %v3896_v0  ;;  %v430_v47 = vld [vmem:[#allocation4 + $0xae0] sm:$0xff]  ;;  %v371_v48 = vld [vmem:[#allocation4 + $0x908] sm:$0xff] }
  0x8e   :  { %2562 = vmatpush1.bf16.msra.mxu1 %v3642_v1  ;;  %2522 = vmatprep.subr.bf16.mxu0 %v3889_v2  ;;  %v3969_v53 = vcombine.high %v426_v46, %v430_v47  ;;  %v418_v54 = vld [vmem:[#allocation4 + $0xa80] sm:$0xff]  ;;  %v3968_v61 = vcombine.low %v426_v46, %v430_v47  ;;  %v155_v2 = vld [vmem:[#allocation4 + $0x248] sm:$0xff] }
  0x8f   :  { %2563 = vmatprep.subr.bf16.mxu1 %v3635_v6  ;;  %v422_v55 = vld [vmem:[#allocation4 + $0xaa0] sm:$0xff]  ;;  %v3706_v6 = vcombine.low %v163_v56, %v167_v60  ;;  %v3699_v11 = vcombine.high %v155_v2, %v159_v4  ;;  %v243_v46 = vld [vmem:[#allocation4 + $0x508] sm:$0xff] }
  0x90   :  { %v3961_v63 = vcombine.high %v418_v54, %v422_v55  ;;  %v410_v0 = vld [vmem:[#allocation4 + $0xa40] sm:$0xff]  ;;  %v3960_v5 = vcombine.low %v418_v54, %v422_v55  ;;  %v247_v47 = vld [vmem:[#allocation4 + $0x528] sm:$0xff] }
  0x91   :  { %2523 = vmatpush1.bf16.msra.mxu0 %v3888_v8  ;;  %v414_v1 = vld [vmem:[#allocation4 + $0xa60] sm:$0xff]  ;;  %v235_v54 = vld [vmem:[#allocation4 + $0x4c8] sm:$0xff]  ;;  %v3786_v60 = vcombine.low %v243_v46, %v247_v47 }
  0x92   :  { %2564 = vmatpush1.bf16.msra.mxu1 %v3634_v9  ;;  %2524 = vmatprep.subr.bf16.mxu0 %v3881_v10  ;;  %v3953_v7 = vcombine.high %v410_v0, %v414_v1  ;;  %v402_v8 = vld [vmem:[#allocation4 + $0xa00] sm:$0xff]  ;;  %v147_v10 = vld [vmem:[#allocation4 + $0x208] sm:$0xff]  ;;  %v3952_v13 = vcombine.low %v410_v0, %v414_v1 }
  0x93   :  { %2565 = vmatprep.subr.bf16.mxu1 %v3627_v14  ;;  %v406_v9 = vld [vmem:[#allocation4 + $0xa20] sm:$0xff]  ;;  %v3698_v14 = vcombine.low %v155_v2, %v159_v4  ;;  %v3691_v21 = vcombine.high %v147_v10, %v151_v12  ;;  %v3690_v25 = vcombine.low %v147_v10, %v151_v12  ;;  %v239_v55 = vld [vmem:[#allocation4 + $0x4e8] sm:$0xff] }
  0x94   :  { %v3945_v15 = vcombine.high %v402_v8, %v406_v9  ;;  %v363_v56 = vld [vmem:[#allocation4 + $0x8c8] sm:$0xff]  ;;  %v3778_v4 = vcombine.low %v235_v54, %v239_v55 }
  0x95   :  { %2525 = vmatpush1.bf16.msra.mxu0 %v3880_v17  ;;  %v267_v17 = vld [vmem:[#allocation4 + $0x5c8] sm:$0xff] }
  0x96   :  { %2566 = vmatpush1.bf16.msra.mxu1 %v3626_v18  ;;  %2526 = vmatprep.subr.bf16.mxu0 %v4001_v19  ;;  %v271_v18 = vld [vmem:[#allocation4 + $0x5e8] sm:$0xff] }
  0x97   :  { %2567 = vmatprep.subr.bf16.mxu1 %v3747_v24  ;;  %v395_v19 = vld [vmem:[#allocation4 + $0x9c8] sm:$0xff]  ;;  %v3944_v24 = vcombine.low %v402_v8, %v406_v9  ;;  %v3810_v34 = vcombine.low %v267_v17, %v271_v18 }
  0x98   :  { %v3939_v31 = vcombine.high %v395_v19, %v399_v23  ;;  %v227_v0 = vld [vmem:[#allocation4 + $0x488] sm:$0xff] }
  0x99   :  { %2527 = vmatpush2.bf16.msra.mxu0 %v4000_v26  ;;  %v3811_v26 = vcombine.high %v267_v17, %v271_v18  ;;  %v231_v1 = vld [vmem:[#allocation4 + $0x4a8] sm:$0xff] }
  0x9a   :  { %2568 = vmatpush2.bf16.msra.mxu1 %v3746_v27  ;;  %2528 = vmatprep.subr.bf16.mxu0 %v3993_v29  ;;  %v259_v27 = vld [vmem:[#allocation4 + $0x588] sm:$0xff]  ;;  %v3770_v12 = vcombine.low %v227_v0, %v231_v1 }
  0x9b   :  { %2569 = vmatprep.subr.bf16.mxu1 %v3739_v33  ;;  %v263_v29 = vld [vmem:[#allocation4 + $0x5a8] sm:$0xff]  ;;  %v4382_v33 = vpack.c.bf16 %v74_v22, %v74_v22 }
  0x9c   :  { %v3802_v42 = vcombine.low %v259_v27, %v263_v29  ;;  %v355_v2 = vld [vmem:[#allocation4 + $0x888] sm:$0xff] }
  0x9d   :  { %2529 = vmatpush2.bf16.msra.mxu0 %v3992_v35  ;;  %v3938_v35 = vcombine.low %v395_v19, %v399_v23  ;;  %v219_v8 = vld [vmem:[#allocation4 + $0x448] sm:$0xff] }
  0x9e   :  { %2570 = vmatpush2.bf16.msra.mxu1 %v3738_v36  ;;  %2530 = vmatprep.subr.bf16.mxu0 %v3985_v37  ;;  %v3803_v36 = vcombine.high %v259_v27, %v263_v29  ;;  %v251_v37 = vld [vmem:[#allocation4 + $0x548] sm:$0xff] }
  0x9f   :  { %2571 = vmatprep.subr.bf16.mxu1 %v3731_v41  ;;  %v383_v41 = vld [vmem:[#allocation4 + $0x968] sm:$0xff]  ;;  %v3794_v50 = vcombine.low %v251_v37, %v255_v39 }
  0xa0   :  { %v223_v9 = vld [vmem:[#allocation4 + $0x468] sm:$0xff] }
  0xa1   :  { %2531 = vmatpush2.bf16.msra.mxu0 %v3984_v43  ;;  %v3930_v43 = vcombine.low %v387_v30, %v391_v32  ;;  %v347_v10 = vld [vmem:[#allocation4 + $0x848] sm:$0xff]  ;;  %v3762_v22 = vcombine.low %v219_v8, %v223_v9 }
  0xa2   :  { %2572 = vmatpush2.bf16.msra.mxu1 %v3730_v44  ;;  %2532 = vmatprep.subr.bf16.mxu0 %v3977_v45  ;;  %v3795_v44 = vcombine.high %v251_v37, %v255_v39  ;;  %v3923_v45 = vcombine.high %v379_v40, %v383_v41  ;;  %v211_v17 = vld [vmem:[#allocation4 + $0x408] sm:$0xff] }
  0xa3   :  { %2573 = vmatprep.subr.bf16.mxu1 %v3723_v49  ;;  %v375_v49 = vld [vmem:[#allocation4 + $0x928] sm:$0xff] }
  0xa4   :  { %v215_v18 = vld [vmem:[#allocation4 + $0x428] sm:$0xff] }
  0xa5   :  { %2533 = vmatpush2.bf16.msra.mxu0 %v3976_v51  ;;  %v3922_v51 = vcombine.low %v379_v40, %v383_v41  ;;  %v339_v19 = vld [vmem:[#allocation4 + $0x808] sm:$0xff] }
  0xa6   :  { %2574 = vmatpush2.bf16.msra.mxu1 %v3722_v52  ;;  %2534 = vmatprep.subr.bf16.mxu0 %v3969_v53  ;;  %v3787_v52 = vcombine.high %v243_v46, %v247_v47  ;;  %v3915_v53 = vcombine.high %v371_v48, %v375_v49  ;;  %v335_v27 = vld [vmem:[#allocation4 + $0x7e8] sm:$0xff] }
  0xa7   :  { %2575 = vmatprep.subr.bf16.mxu1 %v3715_v57  ;;  %v367_v57 = vld [vmem:[#allocation4 + $0x8e8] sm:$0xff] }
  0xa8   :  { %v459_v29 = vld [vmem:[#allocation4 + $0xbc8] sm:$0xff] }
  0xa9   :  { %2535 = vmatpush2.bf16.msra.mxu0 %v3968_v61  ;;  %v3914_v61 = vcombine.low %v371_v48, %v375_v49  ;;  %v463_v30 = vld [vmem:[#allocation4 + $0xbe8] sm:$0xff] }
  0xaa   :  { %2576 = vmatpush2.bf16.msra.mxu1 %v3714_v62  ;;  %2536 = vmatprep.subr.bf16.mxu0 %v3961_v63  ;;  %v3779_v62 = vcombine.high %v235_v54, %v239_v55  ;;  %v3907_v63 = vcombine.high %v363_v56, %v367_v57  ;;  %v327_v37 = vld [vmem:[#allocation4 + $0x7a8] sm:$0xff]  ;;  %v4002_v41 = vcombine.low %v459_v29, %v463_v30 }
  0xab   :  { %2577 = vmatprep.subr.bf16.mxu1 %v3707_v3  ;;  %v359_v3 = vld [vmem:[#allocation4 + $0x8a8] sm:$0xff] }
  0xac   :  { %v455_v39 = vld [vmem:[#allocation4 + $0xba8] sm:$0xff] }
  0xad   :  { %2537 = vmatpush2.bf16.msra.mxu0 %v3960_v5  ;;  %v3906_v5 = vcombine.low %v363_v56, %v367_v57  ;;  %v443_v46 = vld [vmem:[#allocation4 + $0xb48] sm:$0xff] }
  0xae   :  { %2578 = vmatpush2.bf16.msra.mxu1 %v3706_v6  ;;  %2538 = vmatprep.subr.bf16.mxu0 %v3953_v7  ;;  %v3771_v6 = vcombine.high %v227_v0, %v231_v1  ;;  %v3899_v7 = vcombine.high %v355_v2, %v359_v3  ;;  %v447_v47 = vld [vmem:[#allocation4 + $0xb68] sm:$0xff] }
  0xaf   :  { %2579 = vmatprep.subr.bf16.mxu1 %v3699_v11  ;;  %v351_v11 = vld [vmem:[#allocation4 + $0x868] sm:$0xff]  ;;  %v3986_v57 = vcombine.low %v443_v46, %v447_v47 }
  0xb0   :  { %v3890_v23 = vcombine.low %v347_v10, %v351_v11  ;;  %v435_v54 = vld [vmem:[#allocation4 + $0xb08] sm:$0xff] }
  0xb1   :  { %2539 = vmatpush2.bf16.msra.mxu0 %v3952_v13  ;;  %v3898_v13 = vcombine.low %v355_v2, %v359_v3  ;;  %v439_v55 = vld [vmem:[#allocation4 + $0xb28] sm:$0xff] }
  0xb2   :  { %2580 = vmatpush2.bf16.msra.mxu1 %v3698_v14  ;;  %2540 = vmatprep.subr.bf16.mxu0 %v3945_v15  ;;  %v3763_v14 = vcombine.high %v219_v8, %v223_v9  ;;  %v3891_v15 = vcombine.high %v347_v10, %v351_v11  ;;  %v427_v0 = vld [vmem:[#allocation4 + $0xac8] sm:$0xff]  ;;  %v3978_v3 = vcombine.low %v435_v54, %v439_v55 }
  0xb3   :  { %2581 = vmatprep.subr.bf16.mxu1 %v3691_v21  ;;  %v343_v21 = vld [vmem:[#allocation4 + $0x828] sm:$0xff] }
  0xb4   :  { %v3882_v32 = vcombine.low %v339_v19, %v343_v21  ;;  %v431_v1 = vld [vmem:[#allocation4 + $0xae8] sm:$0xff] }
  0xb5   :  { %2541 = vmatpush2.bf16.msra.mxu0 %v3944_v24  ;;  %v3755_v24 = vcombine.high %v211_v17, %v215_v18  ;;  %v419_v8 = vld [vmem:[#allocation4 + $0xa88] sm:$0xff]  ;;  %v3970_v11 = vcombine.low %v427_v0, %v431_v1 }
  0xb6   :  { %2582 = vmatpush2.bf16.msra.mxu1 %v3690_v25  ;;  %2592 = vmatprep.subr.bf16.mxu0 %v3811_v26  ;;  %v3883_v25 = vcombine.high %v339_v19, %v343_v21  ;;  %v331_v26 = vld [vmem:[#allocation4 + $0x7c8] sm:$0xff] }
  0xb7   :  { %2633 = vmatprep.subr.bf16.mxu1 %v3939_v31  ;;  %v3754_v31 = vcombine.low %v211_v17, %v215_v18  ;;  %v3874_v40 = vcombine.low %v331_v26, %v335_v27  ;;  %v423_v9 = vld [vmem:[#allocation4 + $0xaa8] sm:$0xff] }
  0xb8   :  { %2543 = vmatmul.mubr.bf16.vlgmr.msra.gmra.mxu0 %v4382_v33  ;;  %v411_v17 = vld [vmem:[#allocation4 + $0xa48] sm:$0xff]  ;;  %v3962_v21 = vcombine.low %v419_v8, %v423_v9 }
  0xb9   :  { %2584 = vmatmul.mubr.bf16.vlgmr.msra.gmra.mxu1 %v4372_v16  ;;  %2593 = vmatpush1.bf16.msra.mxu0 %v3810_v34  ;;  %v3875_v34 = vcombine.high %v331_v26, %v335_v27  ;;  %v415_v18 = vld [vmem:[#allocation4 + $0xa68] sm:$0xff] }
  0xba   :  { %2634 = vmatpush1.bf16.msra.mxu1 %v3938_v35  ;;  %2594 = vmatprep.subr.bf16.mxu0 %v3803_v36  ;;  %v4003_v35 = vcombine.high %v459_v29, %v463_v30  ;;  %v323_v36 = vld [vmem:[#allocation4 + $0x788] sm:$0xff]  ;;  %v3954_v30 = vcombine.low %v411_v17, %v415_v18 }
  0xbb   :  { %2635 = vmatprep.subr.bf16.mxu1 %v3931_v38  ;;  %2624 = vmatprep.mubr.bf16.mxu0 %v4368_v59  ;;  %v451_v38 = vld [vmem:[#allocation4 + $0xb88] sm:$0xff]  ;;  %v3866_v48 = vcombine.low %v323_v36, %v327_v37 }
  0xbc   :  { %2665 = vmatprep.mubr.bf16.mxu1 %v4376_v28  ;;  %v3994_v49 = vcombine.low %v451_v38, %v455_v39  ;;  %v403_v26 = vld [vmem:[#allocation4 + $0xa08] sm:$0xff] }
  0xbd   :  { %2595 = vmatpush1.bf16.msra.mxu0 %v3802_v42  ;;  %v3867_v42 = vcombine.high %v323_v36, %v327_v37  ;;  %v407_v27 = vld [vmem:[#allocation4 + $0xa28] sm:$0xff]  ;;  %v268_v36 = vld [vmem:[#allocation4 + $0x5d0] sm:$0xff] }
  0xbe   :  { %2636 = vmatpush1.bf16.msra.mxu1 %v3930_v43  ;;  %2596 = vmatprep.subr.bf16.mxu0 %v3795_v44  ;;  %v3995_v43 = vcombine.high %v451_v38, %v455_v39  ;;  %v315_v44 = vld [vmem:[#allocation4 + $0x748] sm:$0xff]  ;;  %v272_v37 = vld [vmem:[#allocation4 + $0x5f0] sm:$0xff]  ;;  %v3946_v39 = vcombine.low %v403_v26, %v407_v27 }
  0xbf   :  { %2637 = vmatprep.subr.bf16.mxu1 %v3923_v45  ;;  %v319_v45 = vld [vmem:[#allocation4 + $0x768] sm:$0xff] }
  0xc0   :  { %v3858_v56 = vcombine.low %v315_v44, %v319_v45 }
  0xc1   :  { %2597 = vmatpush1.bf16.msra.mxu0 %v3794_v50  ;;  %v3859_v50 = vcombine.high %v315_v44, %v319_v45  ;;  %v260_v44 = vld [vmem:[#allocation4 + $0x590] sm:$0xff] }
  0xc2   :  { %2638 = vmatpush1.bf16.msra.mxu1 %v3922_v51  ;;  %2598 = vmatprep.subr.bf16.mxu0 %v3787_v52  ;;  %v3987_v51 = vcombine.high %v443_v46, %v447_v47  ;;  %v307_v52 = vld [vmem:[#allocation4 + $0x708] sm:$0xff]  ;;  %v264_v45 = vld [vmem:[#allocation4 + $0x5b0] sm:$0xff]  ;;  %v3812_v47 = vcombine.low %v268_v36, %v272_v37 }
  0xc3   :  { %2639 = vmatprep.subr.bf16.mxu1 %v3915_v53  ;;  %v311_v53 = vld [vmem:[#allocation4 + $0x728] sm:$0xff] }
  0xc4   :  { %v3850_v2 = vcombine.low %v307_v52, %v311_v53 }
  0xc5   :  { %2599 = vmatpush1.bf16.msra.mxu0 %v3786_v60  ;;  %v3851_v60 = vcombine.high %v307_v52, %v311_v53  ;;  %v252_v52 = vld [vmem:[#allocation4 + $0x550] sm:$0xff] }
  0xc6   :  { %2640 = vmatpush1.bf16.msra.mxu1 %v3914_v61  ;;  %2600 = vmatprep.subr.bf16.mxu0 %v3779_v62  ;;  %v3979_v61 = vcombine.high %v435_v54, %v439_v55  ;;  %v299_v62 = vld [vmem:[#allocation4 + $0x6c8] sm:$0xff]  ;;  %v256_v53 = vld [vmem:[#allocation4 + $0x570] sm:$0xff]  ;;  %v3804_v55 = vcombine.low %v260_v44, %v264_v45 }
  0xc7   :  { %2641 = vmatprep.subr.bf16.mxu1 %v3907_v63  ;;  %v303_v63 = vld [vmem:[#allocation4 + $0x6e8] sm:$0xff] }
  0xc8   :  { %v3842_v10 = vcombine.low %v299_v62, %v303_v63 }
  0xc9   :  { %2601 = vmatpush1.bf16.msra.mxu0 %v3778_v4  ;;  %v3843_v4 = vcombine.high %v299_v62, %v303_v63  ;;  %v244_v62 = vld [vmem:[#allocation4 + $0x510] sm:$0xff] }
  0xca   :  { %2642 = vmatpush1.bf16.msra.mxu1 %v3906_v5  ;;  %2602 = vmatprep.subr.bf16.mxu0 %v3771_v6  ;;  %v3971_v5 = vcombine.high %v427_v0, %v431_v1  ;;  %v291_v6 = vld [vmem:[#allocation4 + $0x688] sm:$0xff]  ;;  %v248_v63 = vld [vmem:[#allocation4 + $0x530] sm:$0xff]  ;;  %v3796_v1 = vcombine.low %v252_v52, %v256_v53 }
  0xcb   :  { %2643 = vmatprep.subr.bf16.mxu1 %v3899_v7  ;;  %v295_v7 = vld [vmem:[#allocation4 + $0x6a8] sm:$0xff] }
  0xcc   :  { %v3834_v19 = vcombine.low %v291_v6, %v295_v7 }
  0xcd   :  { %2603 = vmatpush1.bf16.msra.mxu0 %v3770_v12  ;;  %v3835_v12 = vcombine.high %v291_v6, %v295_v7  ;;  %v236_v6 = vld [vmem:[#allocation4 + $0x4d0] sm:$0xff] }
  0xce   :  { %2644 = vmatpush1.bf16.msra.mxu1 %v3898_v13  ;;  %2604 = vmatprep.subr.bf16.mxu0 %v3763_v14  ;;  %v3963_v13 = vcombine.high %v419_v8, %v423_v9  ;;  %v283_v14 = vld [vmem:[#allocation4 + $0x648] sm:$0xff]  ;;  %v240_v7 = vld [vmem:[#allocation4 + $0x4f0] sm:$0xff]  ;;  %v3788_v9 = vcombine.low %v244_v62, %v248_v63 }
  0xcf   :  { %2645 = vmatprep.subr.bf16.mxu1 %v3891_v15  ;;  %v287_v15 = vld [vmem:[#allocation4 + $0x668] sm:$0xff] }
  0xd0   :  { %v3826_v29 = vcombine.low %v283_v14, %v287_v15 }
  0xd1   :  { %2605 = vmatpush1.bf16.msra.mxu0 %v3762_v22  ;;  %v3827_v22 = vcombine.high %v283_v14, %v287_v15  ;;  %v228_v14 = vld [vmem:[#allocation4 + $0x490] sm:$0xff] }
  0xd2   :  { %2646 = vmatpush1.bf16.msra.mxu1 %v3890_v23  ;;  %2606 = vmatprep.subr.bf16.mxu0 %v3755_v24  ;;  %v3955_v23 = vcombine.high %v411_v17, %v415_v18  ;;  %v275_v24 = vld [vmem:[#allocation4 + $0x608] sm:$0xff]  ;;  %v232_v15 = vld [vmem:[#allocation4 + $0x4b0] sm:$0xff]  ;;  %v3780_v18 = vcombine.low %v236_v6, %v240_v7 }
  0xd3   :  { %2647 = vmatprep.subr.bf16.mxu1 %v3883_v25  ;;  %v279_v25 = vld [vmem:[#allocation4 + $0x628] sm:$0xff] }
  0xd4   :  { %v3818_v38 = vcombine.low %v275_v24, %v279_v25 }
  0xd5   :  { %2607 = vmatpush1.bf16.msra.mxu0 %v3754_v31  ;;  %v3819_v31 = vcombine.high %v275_v24, %v279_v25  ;;  %v220_v24 = vld [vmem:[#allocation4 + $0x450] sm:$0xff] }
  0xd6   :  { %2648 = vmatpush1.bf16.msra.mxu1 %v3882_v32  ;;  %2608 = vmatprep.subr.bf16.mxu0 %v3875_v34  ;;  %v3947_v32 = vcombine.high %v403_v26, %v407_v27  ;;  %v140_v34 = vld [vmem:[#allocation4 + $0x1d0] sm:$0xff]  ;;  %v3772_v27 = vcombine.low %v228_v14, %v232_v15 }
  0xd7   :  { %2649 = vmatprep.subr.bf16.mxu1 %v4003_v35  ;;  %v144_v35 = vld [vmem:[#allocation4 + $0x1f0] sm:$0xff] }
  0xd8   :  { %v3684_v46 = vcombine.low %v140_v34, %v144_v35  ;;  %v224_v25 = vld [vmem:[#allocation4 + $0x470] sm:$0xff] }
  0xd9   :  { %2609 = vmatpush2.bf16.msra.mxu0 %v3874_v40  ;;  %v3685_v40 = vcombine.high %v140_v34, %v144_v35  ;;  %v212_v34 = vld [vmem:[#allocation4 + $0x410] sm:$0xff] }
  0xda   :  { %2650 = vmatpush2.bf16.msra.mxu1 %v4002_v41  ;;  %2610 = vmatprep.subr.bf16.mxu0 %v3867_v42  ;;  %v3813_v41 = vcombine.high %v268_v36, %v272_v37  ;;  %v132_v42 = vld [vmem:[#allocation4 + $0x190] sm:$0xff]  ;;  %v3764_v37 = vcombine.low %v220_v24, %v224_v25 }
  0xdb   :  { %2651 = vmatprep.subr.bf16.mxu1 %v3995_v43  ;;  %v136_v43 = vld [vmem:[#allocation4 + $0x1b0] sm:$0xff] }
  0xdc   :  { %v3676_v54 = vcombine.low %v132_v42, %v136_v43  ;;  %v216_v35 = vld [vmem:[#allocation4 + $0x430] sm:$0xff] }
  0xdd   :  { %2611 = vmatpush2.bf16.msra.mxu0 %v3866_v48  ;;  %v3677_v48 = vcombine.high %v132_v42, %v136_v43  ;;  %v332_v42 = vld [vmem:[#allocation4 + $0x7d0] sm:$0xff] }
  0xde   :  { %2652 = vmatpush2.bf16.msra.mxu1 %v3994_v49  ;;  %2612 = vmatprep.subr.bf16.mxu0 %v3859_v50  ;;  %v3805_v49 = vcombine.high %v260_v44, %v264_v45  ;;  %v124_v50 = vld [vmem:[#allocation4 + $0x150] sm:$0xff]  ;;  %v3756_v45 = vcombine.low %v212_v34, %v216_v35 }
  0xdf   :  { %2653 = vmatprep.subr.bf16.mxu1 %v3987_v51  ;;  %v128_v51 = vld [vmem:[#allocation4 + $0x170] sm:$0xff] }
  0xe0   :  { %v3668_v0 = vcombine.low %v124_v50, %v128_v51  ;;  %v336_v43 = vld [vmem:[#allocation4 + $0x7f0] sm:$0xff] }
  0xe1   :  { %2613 = vmatpush2.bf16.msra.mxu0 %v3858_v56  ;;  %v3669_v56 = vcombine.high %v124_v50, %v128_v51  ;;  %v324_v50 = vld [vmem:[#allocation4 + $0x790] sm:$0xff] }
  0xe2   :  { %2654 = vmatpush2.bf16.msra.mxu1 %v3986_v57  ;;  %2614 = vmatprep.subr.bf16.mxu0 %v3851_v60  ;;  %v3797_v57 = vcombine.high %v252_v52, %v256_v53  ;;  %v116_v60 = vld [vmem:[#allocation4 + $0x110] sm:$0xff]  ;;  %v3876_v53 = vcombine.low %v332_v42, %v336_v43 }
  0xe3   :  { %2655 = vmatprep.subr.bf16.mxu1 %v3979_v61  ;;  %v120_v61 = vld [vmem:[#allocation4 + $0x130] sm:$0xff] }
  0xe4   :  { %v3660_v8 = vcombine.low %v116_v60, %v120_v61  ;;  %v328_v51 = vld [vmem:[#allocation4 + $0x7b0] sm:$0xff] }
  0xe5   :  { %2615 = vmatpush2.bf16.msra.mxu0 %v3850_v2  ;;  %v3661_v2 = vcombine.high %v116_v60, %v120_v61  ;;  %v316_v60 = vld [vmem:[#allocation4 + $0x750] sm:$0xff] }
  0xe6   :  { %2656 = vmatpush2.bf16.msra.mxu1 %v3978_v3  ;;  %2616 = vmatprep.subr.bf16.mxu0 %v3843_v4  ;;  %v3789_v3 = vcombine.high %v244_v62, %v248_v63  ;;  %v108_v4 = vld [vmem:[#allocation4 + $0xd0] sm:$0xff]  ;;  %v3868_v63 = vcombine.low %v324_v50, %v328_v51 }
  0xe7   :  { %2657 = vmatprep.subr.bf16.mxu1 %v3971_v5  ;;  %v112_v5 = vld [vmem:[#allocation4 + $0xf0] sm:$0xff] }
  0xe8   :  { %v3652_v17 = vcombine.low %v108_v4, %v112_v5  ;;  %v320_v61 = vld [vmem:[#allocation4 + $0x770] sm:$0xff] }
  0xe9   :  { %2617 = vmatpush2.bf16.msra.mxu0 %v3842_v10  ;;  %v3653_v10 = vcombine.high %v108_v4, %v112_v5  ;;  %v308_v4 = vld [vmem:[#allocation4 + $0x710] sm:$0xff] }
  0xea   :  { %2658 = vmatpush2.bf16.msra.mxu1 %v3970_v11  ;;  %2618 = vmatprep.subr.bf16.mxu0 %v3835_v12  ;;  %v3781_v11 = vcombine.high %v236_v6, %v240_v7  ;;  %v100_v12 = vld [vmem:[#allocation4 + $0x90] sm:$0xff]  ;;  %v3860_v7 = vcombine.low %v316_v60, %v320_v61 }
  0xeb   :  { %2659 = vmatprep.subr.bf16.mxu1 %v3963_v13  ;;  %v104_v13 = vld [vmem:[#allocation4 + $0xb0] sm:$0xff] }
  0xec   :  { %v3644_v26 = vcombine.low %v100_v12, %v104_v13  ;;  %v312_v5 = vld [vmem:[#allocation4 + $0x730] sm:$0xff] }
  0xed   :  { %2619 = vmatpush2.bf16.msra.mxu0 %v3834_v19  ;;  %v3645_v19 = vcombine.high %v100_v12, %v104_v13  ;;  %v300_v12 = vld [vmem:[#allocation4 + $0x6d0] sm:$0xff] }
  0xee   :  { %2660 = vmatpush2.bf16.msra.mxu1 %v3962_v21  ;;  %2620 = vmatprep.subr.bf16.mxu0 %v3827_v22  ;;  %v3773_v21 = vcombine.high %v228_v14, %v232_v15  ;;  %v92_v22 = vld [vmem:[#allocation4 + $0x50] sm:$0xff]  ;;  %v3852_v15 = vcombine.low %v308_v4, %v312_v5 }
  0xef   :  { %2661 = vmatprep.subr.bf16.mxu1 %v3955_v23  ;;  %v96_v23 = vld [vmem:[#allocation4 + $0x70] sm:$0xff] }
  0xf0   :  { %v3636_v36 = vcombine.low %v92_v22, %v96_v23  ;;  %v304_v13 = vld [vmem:[#allocation4 + $0x6f0] sm:$0xff] }
  0xf1   :  { %2621 = vmatpush2.bf16.msra.mxu0 %v3826_v29  ;;  %v3637_v29 = vcombine.high %v92_v22, %v96_v23  ;;  %v292_v22 = vld [vmem:[#allocation4 + $0x690] sm:$0xff] }
  0xf2   :  { %2662 = vmatpush2.bf16.msra.mxu1 %v3954_v30  ;;  %2622 = vmatprep.subr.bf16.mxu0 %v3819_v31  ;;  %v3765_v30 = vcombine.high %v220_v24, %v224_v25  ;;  %v84_v31 = vld [vmem:[#allocation4 + $0x10] sm:$0xff]  ;;  %v3844_v25 = vcombine.low %v300_v12, %v304_v13 }
  0xf3   :  { %2663 = vmatprep.subr.bf16.mxu1 %v3947_v32  ;;  %v88_v32 = vld [vmem:[#allocation4 + $0x30] sm:$0xff] }
  0xf4   :  { %v3628_v44 = vcombine.low %v84_v31, %v88_v32  ;;  %v296_v23 = vld [vmem:[#allocation4 + $0x6b0] sm:$0xff] }
  0xf5   :  { %2623 = vmatpush2.bf16.msra.mxu0 %v3818_v38  ;;  %v3629_v38 = vcombine.high %v84_v31, %v88_v32  ;;  %v284_v31 = vld [vmem:[#allocation4 + $0x650] sm:$0xff] }
  0xf6   :  { %2664 = vmatpush2.bf16.msra.mxu1 %v3946_v39  ;;  %2674 = vmatprep.subr.bf16.mxu0 %v3685_v40  ;;  %v3757_v39 = vcombine.high %v212_v34, %v216_v35  ;;  %v204_v40 = vld [vmem:[#allocation4 + $0x3d0] sm:$0xff]  ;;  %v468_v35 = vlaneseq }
  0xf7   :  { %2715 = vmatprep.subr.bf16.mxu1 %v3813_v41  ;;  %v208_v41 = vld [vmem:[#allocation4 + $0x3f0] sm:$0xff] }
  0xf8   :  { %2625 = vmatmul.mubr.bf16.vlgmr.msra.gmra.mxu0 %v4374_v20  ;;  %v3748_v52 = vcombine.low %v204_v40, %v208_v41  ;;  %v288_v32 = vld [vmem:[#allocation4 + $0x670] sm:$0xff] }
  0xf9   :  { %2666 = vmatmul.mubr.bf16.vlgmr.msra.gmra.mxu1 %v4382_v33  ;;  %2675 = vmatpush1.bf16.msra.mxu0 %v3684_v46  ;;  %v3749_v46 = vcombine.high %v204_v40, %v208_v41  ;;  %v152_v40 = vld [vmem:[#allocation4 + $0x230] sm:$0xff] }
  0xfa   :  { %2716 = vmatpush1.bf16.msra.mxu1 %v3812_v47  ;;  %2676 = vmatprep.subr.bf16.mxu0 %v3677_v48  ;;  %v3877_v47 = vcombine.high %v332_v42, %v336_v43  ;;  %v196_v48 = vld [vmem:[#allocation4 + $0x390] sm:$0xff] }
  0xfb   :  { %2717 = vmatprep.subr.bf16.mxu1 %v3805_v49  ;;  %2706 = vmatprep.mubr.bf16.mxu0 %v4366_v58  ;;  %v200_v49 = vld [vmem:[#allocation4 + $0x3b0] sm:$0xff] }
  0xfc   :  { %2747 = vmatprep.mubr.bf16.mxu1 %v4368_v59  ;;  %v3740_v62 = vcombine.low %v196_v48, %v200_v49  ;;  %v276_v41 = vld [vmem:[#allocation4 + $0x610] sm:$0xff] }
  0xfd   :  { %2677 = vmatpush1.bf16.msra.mxu0 %v3676_v54  ;;  %v3741_v54 = vcombine.high %v196_v48, %v200_v49  ;;  %v280_v42 = vld [vmem:[#allocation4 + $0x630] sm:$0xff] }
  0xfe   :  { %2718 = vmatpush1.bf16.msra.mxu1 %v3804_v55  ;;  %2678 = vmatprep.subr.bf16.mxu0 %v3669_v56  ;;  %v3869_v55 = vcombine.high %v324_v50, %v328_v51  ;;  %v188_v56 = vld [vmem:[#allocation4 + $0x350] sm:$0xff]  ;;  %v141_v50 = vld [vmem:[#allocation4 + $0x1d8] sm:$0xff] }
  0xff   :  { %2719 = vmatprep.subr.bf16.mxu1 %v3797_v57  ;;  %v192_v57 = vld [vmem:[#allocation4 + $0x370] sm:$0xff]  ;;  %v145_v51 = vld [vmem:[#allocation4 + $0x1f8] sm:$0xff] }
 0x100   :  { %v3732_v6 = vcombine.low %v188_v56, %v192_v57  ;;  %v396_v48 = vld [vmem:[#allocation4 + $0x9d0] sm:$0xff] }
 0x101   :  { %2679 = vmatpush1.bf16.msra.mxu0 %v3668_v0  ;;  %v3733_v0 = vcombine.high %v188_v56, %v192_v57  ;;  %v400_v49 = vld [vmem:[#allocation4 + $0x9f0] sm:$0xff]  ;;  %v3687_v57 = vcombine.high %v141_v50, %v145_v51 }
 0x102   :  { %2720 = vmatpush1.bf16.msra.mxu1 %v3796_v1  ;;  %2680 = vmatprep.subr.bf16.mxu0 %v3661_v2  ;;  %v3861_v1 = vcombine.high %v316_v60, %v320_v61  ;;  %v180_v2 = vld [vmem:[#allocation4 + $0x310] sm:$0xff]  ;;  %v3941_v56 = vcombine.high %v396_v48, %v400_v49 }
 0x103   :  { %2721 = vmatprep.subr.bf16.mxu1 %v3789_v3  ;;  %v184_v3 = vld [vmem:[#allocation4 + $0x330] sm:$0xff] }
 0x104   :  { %v3724_v14 = vcombine.low %v180_v2, %v184_v3  ;;  %v388_v61 = vld [vmem:[#allocation4 + $0x990] sm:$0xff] }
 0x105   :  { %2681 = vmatpush1.bf16.msra.mxu0 %v3660_v8  ;;  %v3725_v8 = vcombine.high %v180_v2, %v184_v3  ;;  %v3940_v2 = vcombine.low %v396_v48, %v400_v49  ;;  %v3686_v3 = vcombine.low %v141_v50, %v145_v51  ;;  %v360_v48 = vld [vmem:[#allocation4 + $0x8b0] sm:$0xff]  ;;  %v101_v49 = vld [vmem:[#allocation4 + $0x98] sm:$0xff] }
 0x106   :  { %2722 = vmatpush1.bf16.msra.mxu1 %v3788_v9  ;;  %2682 = vmatprep.subr.bf16.mxu0 %v3653_v10  ;;  %v3853_v9 = vcombine.high %v308_v4, %v312_v5  ;;  %v172_v10 = vld [vmem:[#allocation4 + $0x2d0] sm:$0xff]  ;;  %v105_v50 = vld [vmem:[#allocation4 + $0xb8] sm:$0xff] }
 0x107   :  { %2723 = vmatprep.subr.bf16.mxu1 %v3781_v11  ;;  %v176_v11 = vld [vmem:[#allocation4 + $0x2f0] sm:$0xff] }
 0x108   :  { %v3716_v24 = vcombine.low %v172_v10, %v176_v11 }
 0x109   :  { %2683 = vmatpush1.bf16.msra.mxu0 %v3652_v17  ;;  %v3717_v17 = vcombine.high %v172_v10, %v176_v11  ;;  %v125_v10 = vld [vmem:[#allocation4 + $0x158] sm:$0xff] }
 0x10a   :  { %2724 = vmatpush1.bf16.msra.mxu1 %v3780_v18  ;;  %2684 = vmatprep.subr.bf16.mxu0 %v3645_v19  ;;  %v3845_v18 = vcombine.high %v300_v12, %v304_v13  ;;  %v164_v19 = vld [vmem:[#allocation4 + $0x290] sm:$0xff]  ;;  %v129_v11 = vld [vmem:[#allocation4 + $0x178] sm:$0xff] }
 0x10b   :  { %2725 = vmatprep.subr.bf16.mxu1 %v3773_v21  ;;  %v168_v21 = vld [vmem:[#allocation4 + $0x2b0] sm:$0xff] }
 0x10c   :  { %v3708_v34 = vcombine.low %v164_v19, %v168_v21 }
 0x10d   :  { %2685 = vmatpush1.bf16.msra.mxu0 %v3644_v26  ;;  %v3709_v26 = vcombine.high %v164_v19, %v168_v21 }
 0x10e   :  { %2726 = vmatpush1.bf16.msra.mxu1 %v3772_v27  ;;  %2686 = vmatprep.subr.bf16.mxu0 %v3637_v29  ;;  %v3837_v27 = vcombine.high %v292_v22, %v296_v23  ;;  %v156_v29 = vld [vmem:[#allocation4 + $0x250] sm:$0xff] }
 0x10f   :  { %2727 = vmatprep.subr.bf16.mxu1 %v3765_v30  ;;  %v160_v30 = vld [vmem:[#allocation4 + $0x270] sm:$0xff] }
 0x110   :  { %v3700_v43 = vcombine.low %v156_v29, %v160_v30 }
 0x111   :  { %2687 = vmatpush1.bf16.msra.mxu0 %v3636_v36  ;;  %v3836_v36 = vcombine.low %v292_v22, %v296_v23  ;;  %v3671_v23 = vcombine.high %v125_v10, %v129_v11 }
 0x112   :  { %2728 = vmatpush1.bf16.msra.mxu1 %v3764_v37  ;;  %2688 = vmatprep.subr.bf16.mxu0 %v3629_v38  ;;  %v3701_v37 = vcombine.high %v156_v29, %v160_v30  ;;  %v3829_v38 = vcombine.high %v284_v31, %v288_v32  ;;  %v121_v29 = vld [vmem:[#allocation4 + $0x138] sm:$0xff] }
 0x113   :  { %2729 = vmatprep.subr.bf16.mxu1 %v3757_v39  ;;  %v148_v39 = vld [vmem:[#allocation4 + $0x210] sm:$0xff] }
 0x115   :  { %2689 = vmatpush1.bf16.msra.mxu0 %v3628_v44  ;;  %v4392_v44 = vshrl.u32 %v468_v35, 7  ;;  %v3670_v35 = vcombine.low %v125_v10, %v129_v11  ;;  %v460_v10 = vld [vmem:[#allocation4 + $0xbd0] sm:$0xff] }
 0x116   :  { %2730 = vmatpush1.bf16.msra.mxu1 %v3756_v45  ;;  %2690 = vmatprep.subr.bf16.mxu0 %v3749_v46  ;;  %v3828_v45 = vcombine.low %v284_v31, %v288_v32  ;;  %v3693_v46 = vcombine.high %v148_v39, %v152_v40  ;;  %v464_v11 = vld [vmem:[#allocation4 + $0xbf0] sm:$0xff] }
 0x117   :  { %2731 = vmatprep.subr.bf16.mxu1 %v3877_v47  ;;  %v3821_v47 = vcombine.high %v276_v41, %v280_v42  ;;  %v474_v60 = vsub.s32 1, %v4392_v44 }
 0x119   :  { %2691 = vmatpush2.bf16.msra.mxu0 %v3748_v52  ;;  %v3692_v52 = vcombine.low %v148_v39, %v152_v40  ;;  %v364_v39 = vld [vmem:[#allocation4 + $0x8d0] sm:$0xff] }
 0x11a   :  { %2732 = vmatpush2.bf16.msra.mxu1 %v3876_v53  ;;  %2692 = vmatprep.subr.bf16.mxu0 %v3741_v54  ;;  %v470_v53 = vsub.s32 0, %v4392_v44  ;;  %v3820_v54 = vcombine.low %v276_v41, %v280_v42  ;;  %v368_v40 = vld [vmem:[#allocation4 + $0x8f0] sm:$0xff]  ;;  %v109_v41 = vld [vmem:[#allocation4 + $0xd8] sm:$0xff] }
 0x11b   :  { %2733 = vmatprep.subr.bf16.mxu1 %v3869_v55  ;;  %v4395_v55 = vld [vmem:[#allocation6] sm:$0xff]  ;;  %v113_v42 = vld [vmem:[#allocation4 + $0xf8] sm:$0xff]  ;;  %v3908_v51 = vcombine.low %v364_v39, %v368_v40 }
 0x11c   :  { %v475_v5 = vrot.slane %v4395_v55, %v474_v60  ;;  %v93_v60 = vld [vmem:[#allocation4 + $0x58] sm:$0xff] }
 0x11d   :  { %2693 = vmatpush2.bf16.msra.mxu0 %v3740_v62  ;;  %v392_v62 = vld [vmem:[#allocation4 + $0x9b0] sm:$0xff] }
 0x11e   :  { %2734 = vmatpush2.bf16.msra.mxu1 %v3868_v63  ;;  %2694 = vmatprep.subr.bf16.mxu0 %v3733_v0  ;;  %v133_v63 = vld [vmem:[#allocation4 + $0x198] sm:$0xff]  ;;  %v3933_v4 = vcombine.high %v388_v61, %v392_v62 }
 0x11f   :  { %2735 = vmatprep.subr.bf16.mxu1 %v3861_v1  ;;  %v137_v0 = vld [vmem:[#allocation4 + $0x1b8] sm:$0xff]  ;;  %v471_v1 = vrot.slane %v4395_v55, %v470_v53 }
 0x121   :  { %2695 = vmatpush2.bf16.msra.mxu0 %v3732_v6  ;;  %v3679_v6 = vcombine.high %v133_v63, %v137_v0 }
 0x122   :  { %2736 = vmatpush2.bf16.msra.mxu1 %v3860_v7  ;;  %2696 = vmatprep.subr.bf16.mxu0 %v3725_v8  ;;  %v380_v7 = vld [vmem:[#allocation4 + $0x950] sm:$0xff] }
 0x123   :  { %2737 = vmatprep.subr.bf16.mxu1 %v3853_v9  ;;  %v384_v8 = vld [vmem:[#allocation4 + $0x970] sm:$0xff] }
 0x124   :  { %v3924_v32 = vcombine.low %v380_v7, %v384_v8 }
 0x125   :  { %2697 = vmatpush2.bf16.msra.mxu0 %v3724_v14  ;;  %v3932_v14 = vcombine.low %v388_v61, %v392_v62  ;;  %v97_v61 = vld [vmem:[#allocation4 + $0x78] sm:$0xff] }
 0x126   :  { %2738 = vmatpush2.bf16.msra.mxu1 %v3852_v15  ;;  %2698 = vmatprep.subr.bf16.mxu0 %v3717_v17  ;;  %v3678_v17 = vcombine.low %v133_v63, %v137_v0  ;;  %v3646_v63 = vcombine.low %v101_v49, %v105_v50 }
 0x127   :  { %2739 = vmatprep.subr.bf16.mxu1 %v3845_v18  ;;  %v3925_v18 = vcombine.high %v380_v7, %v384_v8  ;;  %v3638_v7 = vcombine.low %v93_v60, %v97_v61 }
 0x129   :  { %2699 = vmatpush2.bf16.msra.mxu0 %v3716_v24  ;;  %v372_v24 = vld [vmem:[#allocation4 + $0x910] sm:$0xff] }
 0x12a   :  { %2740 = vmatpush2.bf16.msra.mxu1 %v3844_v25  ;;  %2700 = vmatprep.subr.bf16.mxu0 %v3709_v26  ;;  %v376_v25 = vld [vmem:[#allocation4 + $0x930] sm:$0xff] }
 0x12b   :  { %2741 = vmatprep.subr.bf16.mxu1 %v3837_v27  ;;  %v117_v27 = vld [vmem:[#allocation4 + $0x118] sm:$0xff] }
 0x12d   :  { %2701 = vmatpush2.bf16.msra.mxu0 %v3708_v34 }
 0x12e   :  { %2742 = vmatpush2.bf16.msra.mxu1 %v3836_v36  ;;  %2702 = vmatprep.subr.bf16.mxu0 %v3701_v37  ;;  %v3917_v36 = vcombine.high %v372_v24, %v376_v25 }
 0x12f   :  { %2743 = vmatprep.subr.bf16.mxu1 %v3829_v38  ;;  %v3663_v38 = vcombine.high %v117_v27, %v121_v29 }
 0x131   :  { %2703 = vmatpush2.bf16.msra.mxu0 %v3700_v43  ;;  %v3916_v43 = vcombine.low %v372_v24, %v376_v25  ;;  %v201_v24 = vld [vmem:[#allocation4 + $0x3b8] sm:$0xff]  ;;  %v4004_v25 = vcombine.low %v460_v10, %v464_v11 }
 0x132   :  { %2744 = vmatpush2.bf16.msra.mxu1 %v3828_v45  ;;  %2704 = vmatprep.subr.bf16.mxu0 %v3693_v46  ;;  %v3909_v45 = vcombine.high %v364_v39, %v368_v40  ;;  %v3655_v46 = vcombine.high %v109_v41, %v113_v42  ;;  %v436_v40 = vld [vmem:[#allocation4 + $0xb10] sm:$0xff] }
 0x133   :  { %2745 = vmatprep.subr.bf16.mxu1 %v3821_v47  ;;  %v356_v47 = vld [vmem:[#allocation4 + $0x890] sm:$0xff] }
 0x134   :  { %v3901_v53 = vcombine.high %v356_v47, %v360_v48  ;;  %v3900_v62 = vcombine.low %v356_v47, %v360_v48  ;;  %v428_v48 = vld [vmem:[#allocation4 + $0xad0] sm:$0xff] }
 0x135   :  { %2705 = vmatpush2.bf16.msra.mxu0 %v3692_v52  ;;  %v3654_v52 = vcombine.low %v109_v41, %v113_v42  ;;  %v440_v41 = vld [vmem:[#allocation4 + $0xb30] sm:$0xff]  ;;  %v181_v42 = vld [vmem:[#allocation4 + $0x318] sm:$0xff] }
 0x136   :  { %2746 = vmatpush2.bf16.msra.mxu1 %v3820_v54  ;;  %2756 = vmatprep.subr.bf16.mxu0 %v3941_v56  ;;  %v3647_v54 = vcombine.high %v101_v49, %v105_v50  ;;  %v348_v56 = vld [vmem:[#allocation4 + $0x850] sm:$0xff]  ;;  %v173_v50 = vld [vmem:[#allocation4 + $0x2d8] sm:$0xff] }
 0x137   :  { %2797 = vmatprep.subr.bf16.mxu1 %v3687_v57  ;;  %v352_v57 = vld [vmem:[#allocation4 + $0x870] sm:$0xff] }
 0x138   :  { %v2462_v9 = vpop.f32.mrf.mxu0  ;;  %2707 = vmatmul.mubr.bf16.vlgmr.msra.gmra.mxu0 %v4372_v16  ;;  %v3893_v0 = vcombine.high %v348_v56, %v352_v57  ;;  %v432_v49 = vld [vmem:[#allocation4 + $0xaf0] sm:$0xff] }
 0x139   :  { %v2463_v12 = vadd.f32 %v2462_v9, %v471_v1  ;;  %v2503_v13 = vpop.f32.mrf.mxu1  ;;  %2748 = vmatmul.mubr.bf16.vlgmr.msra.gmra.mxu1 %v4374_v20  ;;  %2757 = vmatpush1.bf16.msra.mxu0 %v3940_v2  ;;  %v3639_v1 = vcombine.high %v93_v60, %v97_v61  ;;  %v340_v2 = vld [vmem:[#allocation4 + $0x810] sm:$0xff]  ;;  %v165_v61 = vld [vmem:[#allocation4 + $0x298] sm:$0xff] }
 0x13a   :  { %2798 = vmatpush1.bf16.msra.mxu1 %v3686_v3  ;;  %v2464_v15 = vpop.f32.mrf.mxu0  ;;  %2758 = vmatprep.subr.bf16.mxu0 %v3933_v4  ;;  %v344_v3 = vld [vmem:[#allocation4 + $0x830] sm:$0xff]  ;;  %v85_v4 = vld [vmem:[#allocation4 + $0x18] sm:$0xff] }
 0x13b   :  { %v4402_v19 = vadd.f32 %v2503_v13, %v2463_v12  ;;  %v2465_v21 = vadd.f32 %v2464_v15, %v475_v5  ;;  %v2505_v22 = vpop.f32.mrf.mxu1  ;;  %2799 = vmatprep.subr.bf16.mxu1 %v3679_v6  ;;  %2788 = vmatprep.mubr.bf16.mxu0 %v4376_v28  ;;  %v89_v5 = vld [vmem:[#allocation4 + $0x38] sm:$0xff]  ;;  %v3892_v6 = vcombine.low %v348_v56, %v352_v57  ;;  %v420_v57 = vld [vmem:[#allocation4 + $0xa90] sm:$0xff] }
 0x13c   :  { %v2466_v26 = vpop.f32.mrf.mxu0  ;;  %2829 = vmatprep.mubr.bf16.mxu1 %v4366_v58  ;;  %v3662_v58 = vcombine.low %v117_v27, %v121_v29  ;;  %v3885_v8 = vcombine.high %v340_v2, %v344_v3  ;;  %v3631_v9 = vcombine.high %v85_v4, %v89_v5  ;;  %v205_v12 = vld [vmem:[#allocation4 + $0x3d8] sm:$0xff]  ;;  %v3630_v15 = vcombine.low %v85_v4, %v89_v5  ;;  %v424_v60 = vld [vmem:[#allocation4 + $0xab0] sm:$0xff] }
 0x13d   :  { %v4406_v30 = vadd.f32 %v2505_v22, %v2465_v21  ;;  %v2507_v31 = vpop.f32.mrf.mxu1  ;;  %2759 = vmatpush1.bf16.msra.mxu0 %v3932_v14  ;;  %v209_v13 = vld [vmem:[#allocation4 + $0x3f8] sm:$0xff]  ;;  %v3884_v14 = vcombine.low %v340_v2, %v344_v3  ;;  %v452_v21 = vld [vmem:[#allocation4 + $0xb90] sm:$0xff] }
 0x13e   :  { %2800 = vmatpush1.bf16.msra.mxu1 %v3678_v17  ;;  %v2467_v34 = vpop.f32.mrf.mxu0  ;;  %2760 = vmatprep.subr.bf16.mxu0 %v3925_v18  ;;  %v4005_v17 = vcombine.high %v460_v10, %v464_v11  ;;  %v3751_v18 = vcombine.high %v205_v12, %v209_v13  ;;  %v456_v22 = vld [vmem:[#allocation4 + $0xbb0] sm:$0xff]  ;;  %v3750_v26 = vcombine.low %v205_v12, %v209_v13  ;;  %v157_v5 = vld [vmem:[#allocation4 + $0x258] sm:$0xff] }
 0x13f   :  { %v2508_v37 = vpop.f32.mrf.mxu1  ;;  %2801 = vmatprep.subr.bf16.mxu1 %v3671_v23  ;;  %v197_v23 = vld [vmem:[#allocation4 + $0x398] sm:$0xff]  ;;  %v3997_v27 = vcombine.high %v452_v21, %v456_v22  ;;  %v444_v31 = vld [vmem:[#allocation4 + $0xb50] sm:$0xff] }
 0x140   :  { %v3743_v29 = vcombine.high %v197_v23, %v201_v24  ;;  %v189_v34 = vld [vmem:[#allocation4 + $0x358] sm:$0xff]  ;;  %v3742_v37 = vcombine.low %v197_v23, %v201_v24  ;;  %v412_v3 = vld [vmem:[#allocation4 + $0xa50] sm:$0xff] }
 0x141   :  { %2761 = vmatpush1.bf16.msra.mxu0 %v3924_v32  ;;  %v448_v32 = vld [vmem:[#allocation4 + $0xb70] sm:$0xff]  ;;  %v149_v13 = vld [vmem:[#allocation4 + $0x218] sm:$0xff] }
 0x142   :  { %2802 = vmatpush1.bf16.msra.mxu1 %v3670_v35  ;;  %2762 = vmatprep.subr.bf16.mxu0 %v3917_v36  ;;  %v193_v35 = vld [vmem:[#allocation4 + $0x378] sm:$0xff]  ;;  %v3996_v36 = vcombine.low %v452_v21, %v456_v22  ;;  %v416_v4 = vld [vmem:[#allocation4 + $0xa70] sm:$0xff] }
 0x143   :  { %2803 = vmatprep.subr.bf16.mxu1 %v3663_v38  ;;  %v3989_v38 = vcombine.high %v444_v31, %v448_v32  ;;  %v3735_v39 = vcombine.high %v189_v34, %v193_v35  ;;  %v404_v11 = vld [vmem:[#allocation4 + $0xa10] sm:$0xff]  ;;  %v269_v22 = vld [vmem:[#allocation4 + $0x5d8] sm:$0xff] }
 0x144   :  { %v408_v12 = vld [vmem:[#allocation4 + $0xa30] sm:$0xff]  ;;  %v273_v23 = vld [vmem:[#allocation4 + $0x5f8] sm:$0xff] }
 0x145   :  { %2763 = vmatpush1.bf16.msra.mxu0 %v3916_v43  ;;  %v185_v43 = vld [vmem:[#allocation4 + $0x338] sm:$0xff] }
 0x146   :  { %2804 = vmatpush1.bf16.msra.mxu1 %v3662_v58  ;;  %2764 = vmatprep.subr.bf16.mxu0 %v3909_v45  ;;  %v3988_v58 = vcombine.low %v444_v31, %v448_v32  ;;  %v3734_v45 = vcombine.low %v189_v34, %v193_v35  ;;  %v3727_v47 = vcombine.high %v181_v42, %v185_v43  ;;  %v397_v24 = vld [vmem:[#allocation4 + $0x9d8] sm:$0xff] }
 0x147   :  { %2805 = vmatprep.subr.bf16.mxu1 %v3655_v46  ;;  %v3981_v46 = vcombine.high %v436_v40, %v440_v41  ;;  %v261_v32 = vld [vmem:[#allocation4 + $0x598] sm:$0xff] }
 0x148   :  { %v265_v34 = vld [vmem:[#allocation4 + $0x5b8] sm:$0xff] }
 0x149   :  { %2765 = vmatpush1.bf16.msra.mxu0 %v3908_v51  ;;  %v177_v51 = vld [vmem:[#allocation4 + $0x2f8] sm:$0xff] }
 0x14a   :  { %2806 = vmatpush1.bf16.msra.mxu1 %v3654_v52  ;;  %2766 = vmatprep.subr.bf16.mxu0 %v3901_v53  ;;  %v3980_v52 = vcombine.low %v436_v40, %v440_v41  ;;  %v3726_v53 = vcombine.low %v181_v42, %v185_v43  ;;  %v3719_v56 = vcombine.high %v173_v50, %v177_v51  ;;  %v389_v35 = vld [vmem:[#allocation4 + $0x998] sm:$0xff] }
 0x14b   :  { %2807 = vmatprep.subr.bf16.mxu1 %v3647_v54  ;;  %v3973_v54 = vcombine.high %v428_v48, %v432_v49  ;;  %v253_v41 = vld [vmem:[#allocation4 + $0x558] sm:$0xff] }
 0x14c   :  { %v257_v42 = vld [vmem:[#allocation4 + $0x578] sm:$0xff] }
 0x14d   :  { %2767 = vmatpush1.bf16.msra.mxu0 %v3900_v62  ;;  %v169_v62 = vld [vmem:[#allocation4 + $0x2b8] sm:$0xff] }
 0x14e   :  { %2808 = vmatpush1.bf16.msra.mxu1 %v3646_v63  ;;  %2768 = vmatprep.subr.bf16.mxu0 %v3893_v0  ;;  %v3972_v63 = vcombine.low %v428_v48, %v432_v49  ;;  %v3718_v0 = vcombine.low %v173_v50, %v177_v51  ;;  %v3711_v2 = vcombine.high %v165_v61, %v169_v62 }
 0x14f   :  { %2809 = vmatprep.subr.bf16.mxu1 %v3639_v1  ;;  %v3965_v1 = vcombine.high %v420_v57, %v424_v60  ;;  %v3806_v48 = vcombine.low %v261_v32, %v265_v34  ;;  %v3799_v51 = vcombine.high %v253_v41, %v257_v42 }
 0x151   :  { %2769 = vmatpush1.bf16.msra.mxu0 %v3892_v6  ;;  %v161_v6 = vld [vmem:[#allocation4 + $0x278] sm:$0xff] }
 0x152   :  { %2810 = vmatpush1.bf16.msra.mxu1 %v3638_v7  ;;  %2770 = vmatprep.subr.bf16.mxu0 %v3885_v8  ;;  %v3964_v7 = vcombine.low %v420_v57, %v424_v60  ;;  %v3710_v8 = vcombine.low %v165_v61, %v169_v62  ;;  %v3703_v10 = vcombine.high %v157_v5, %v161_v6  ;;  %v373_v57 = vld [vmem:[#allocation4 + $0x918] sm:$0xff] }
 0x153   :  { %2811 = vmatprep.subr.bf16.mxu1 %v3631_v9  ;;  %v3957_v9 = vcombine.high %v412_v3, %v416_v4  ;;  %v377_v60 = vld [vmem:[#allocation4 + $0x938] sm:$0xff]  ;;  %v3798_v61 = vcombine.low %v253_v41, %v257_v42 }
 0x154   :  { %v461_v41 = vld [vmem:[#allocation4 + $0xbd8] sm:$0xff] }
 0x155   :  { %2771 = vmatpush1.bf16.msra.mxu0 %v3884_v14  ;;  %v153_v14 = vld [vmem:[#allocation4 + $0x238] sm:$0xff] }
 0x156   :  { %2812 = vmatpush1.bf16.msra.mxu1 %v3630_v15  ;;  %2772 = vmatprep.subr.bf16.mxu0 %v4005_v17  ;;  %v3956_v15 = vcombine.low %v412_v3, %v416_v4  ;;  %v3702_v17 = vcombine.low %v157_v5, %v161_v6  ;;  %v3695_v21 = vcombine.high %v149_v13, %v153_v14  ;;  %v237_v3 = vld [vmem:[#allocation4 + $0x4d8] sm:$0xff] }
 0x157   :  { %2813 = vmatprep.subr.bf16.mxu1 %v3751_v18  ;;  %v3949_v18 = vcombine.high %v404_v11, %v408_v12  ;;  %v241_v4 = vld [vmem:[#allocation4 + $0x4f8] sm:$0xff] }
 0x158   :  { %v365_v5 = vld [vmem:[#allocation4 + $0x8d8] sm:$0xff] }
 0x159   :  { %2773 = vmatpush2.bf16.msra.mxu0 %v4004_v25  ;;  %v401_v25 = vld [vmem:[#allocation4 + $0x9f8] sm:$0xff] }
 0x15a   :  { %2814 = vmatpush2.bf16.msra.mxu1 %v3750_v26  ;;  %2774 = vmatprep.subr.bf16.mxu0 %v3997_v27  ;;  %v3948_v26 = vcombine.low %v404_v11, %v408_v12  ;;  %v3694_v27 = vcombine.low %v149_v13, %v153_v14  ;;  %v3943_v31 = vcombine.high %v397_v24, %v401_v25  ;;  %v357_v11 = vld [vmem:[#allocation4 + $0x898] sm:$0xff] }
 0x15b   :  { %2815 = vmatprep.subr.bf16.mxu1 %v3743_v29  ;;  %v3815_v29 = vcombine.high %v269_v22, %v273_v23  ;;  %v361_v12 = vld [vmem:[#allocation4 + $0x8b8] sm:$0xff]  ;;  %v3782_v13 = vcombine.low %v237_v3, %v241_v4 }
 0x15c   :  { %v465_v42 = vld [vmem:[#allocation4 + $0xbf8] sm:$0xff] }
 0x15d   :  { %2775 = vmatpush2.bf16.msra.mxu0 %v3996_v36  ;;  %v393_v36 = vld [vmem:[#allocation4 + $0x9b8] sm:$0xff] }
 0x15e   :  { %2816 = vmatpush2.bf16.msra.mxu1 %v3742_v37  ;;  %2776 = vmatprep.subr.bf16.mxu0 %v3989_v38  ;;  %v3814_v37 = vcombine.low %v269_v22, %v273_v23  ;;  %v3942_v38 = vcombine.low %v397_v24, %v401_v25  ;;  %v3935_v40 = vcombine.high %v389_v35, %v393_v36  ;;  %v349_v22 = vld [vmem:[#allocation4 + $0x858] sm:$0xff] }
 0x15f   :  { %2817 = vmatprep.subr.bf16.mxu1 %v3735_v39  ;;  %v3807_v39 = vcombine.high %v261_v32, %v265_v34  ;;  %v3934_v50 = vcombine.low %v389_v35, %v393_v36  ;;  %v353_v23 = vld [vmem:[#allocation4 + $0x878] sm:$0xff]  ;;  %v3902_v25 = vcombine.low %v357_v11, %v361_v12 }
 0x160   :  { %v341_v32 = vld [vmem:[#allocation4 + $0x818] sm:$0xff]  ;;  %v3894_v36 = vcombine.low %v349_v22, %v353_v23 }
 0x161   :  { %2777 = vmatpush2.bf16.msra.mxu0 %v3988_v58  ;;  %v381_v58 = vld [vmem:[#allocation4 + $0x958] sm:$0xff] }
 0x162   :  { %2818 = vmatpush2.bf16.msra.mxu1 %v3734_v45  ;;  %2778 = vmatprep.subr.bf16.mxu0 %v3981_v46  ;;  %v385_v45 = vld [vmem:[#allocation4 + $0x978] sm:$0xff] }
 0x163   :  { %2819 = vmatprep.subr.bf16.mxu1 %v3727_v47  ;;  %v345_v34 = vld [vmem:[#allocation4 + $0x838] sm:$0xff] }
 0x165   :  { %2779 = vmatpush2.bf16.msra.mxu0 %v3980_v52 }
 0x166   :  { %2820 = vmatpush2.bf16.msra.mxu1 %v3726_v53  ;;  %2780 = vmatprep.subr.bf16.mxu0 %v3973_v54  ;;  %v3927_v53 = vcombine.high %v381_v58, %v385_v45  ;;  %v245_v54 = vld [vmem:[#allocation4 + $0x518] sm:$0xff] }
 0x167   :  { %2821 = vmatprep.subr.bf16.mxu1 %v3719_v56  ;;  %v249_v56 = vld [vmem:[#allocation4 + $0x538] sm:$0xff] }
 0x168   :  { %v3790_v6 = vcombine.low %v245_v54, %v249_v56 }
 0x169   :  { %2781 = vmatpush2.bf16.msra.mxu0 %v3972_v63  ;;  %v3926_v63 = vcombine.low %v381_v58, %v385_v45  ;;  %v3886_v58 = vcombine.low %v341_v32, %v345_v34 }
 0x16a   :  { %2822 = vmatpush2.bf16.msra.mxu1 %v3718_v0  ;;  %2782 = vmatprep.subr.bf16.mxu0 %v3965_v1  ;;  %v3791_v0 = vcombine.high %v245_v54, %v249_v56  ;;  %v457_v54 = vld [vmem:[#allocation4 + $0xbb8] sm:$0xff] }
 0x16b   :  { %2823 = vmatprep.subr.bf16.mxu1 %v3711_v2  ;;  %v3919_v2 = vcombine.high %v373_v57, %v377_v60 }
 0x16d   :  { %2783 = vmatpush2.bf16.msra.mxu0 %v3964_v7  ;;  %v3783_v7 = vcombine.high %v237_v3, %v241_v4  ;;  %v309_v4 = vld [vmem:[#allocation4 + $0x718] sm:$0xff] }
 0x16e   :  { %2824 = vmatpush2.bf16.msra.mxu1 %v3710_v8  ;;  %2784 = vmatprep.subr.bf16.mxu0 %v3957_v9  ;;  %v229_v9 = vld [vmem:[#allocation4 + $0x498] sm:$0xff] }
 0x16f   :  { %2825 = vmatprep.subr.bf16.mxu1 %v3703_v10  ;;  %v233_v10 = vld [vmem:[#allocation4 + $0x4b8] sm:$0xff] }
 0x170   :  { %v3774_v24 = vcombine.low %v229_v9, %v233_v10 }
 0x171   :  { %2785 = vmatpush2.bf16.msra.mxu0 %v3956_v15  ;;  %v3775_v15 = vcombine.high %v229_v9, %v233_v10  ;;  %v301_v10 = vld [vmem:[#allocation4 + $0x6d8] sm:$0xff] }
 0x172   :  { %2826 = vmatpush2.bf16.msra.mxu1 %v3702_v17  ;;  %2786 = vmatprep.subr.bf16.mxu0 %v3949_v18  ;;  %v3903_v17 = vcombine.high %v357_v11, %v361_v12  ;;  %v221_v18 = vld [vmem:[#allocation4 + $0x458] sm:$0xff] }
 0x173   :  { %2827 = vmatprep.subr.bf16.mxu1 %v3695_v21  ;;  %v225_v21 = vld [vmem:[#allocation4 + $0x478] sm:$0xff] }
 0x174   :  { %v3766_v35 = vcombine.low %v221_v18, %v225_v21  ;;  %v305_v11 = vld [vmem:[#allocation4 + $0x6f8] sm:$0xff] }
 0x175   :  { %2787 = vmatpush2.bf16.msra.mxu0 %v3948_v26  ;;  %v3767_v26 = vcombine.high %v221_v18, %v225_v21  ;;  %v429_v12 = vld [vmem:[#allocation4 + $0xad8] sm:$0xff] }
 0x176   :  { %2828 = vmatpush2.bf16.msra.mxu1 %v3694_v27  ;;  %2838 = vmatprep.subr.bf16.mxu0 %v3815_v29  ;;  %v3895_v27 = vcombine.high %v349_v22, %v353_v23  ;;  %v213_v29 = vld [vmem:[#allocation4 + $0x418] sm:$0xff] }
 0x177   :  { %2879 = vmatprep.subr.bf16.mxu1 %v3943_v31  ;;  %v217_v31 = vld [vmem:[#allocation4 + $0x438] sm:$0xff] }
 0x178   :  { %v2544_v43 = vpop.f32.mrf.mxu0  ;;  %2789 = vmatmul.mubr.bf16.vlgmr.msra.gmra.mxu0 %v4382_v33  ;;  %v293_v21 = vld [vmem:[#allocation4 + $0x698] sm:$0xff] }
 0x179   :  { %v4410_v46 = vadd.f32 %v2544_v43, %v4402_v19  ;;  %v4412_v47 = vpop.f32.mrf.mxu1  ;;  %2830 = vmatmul.mubr.bf16.vlgmr.msra.gmra.mxu1 %v4372_v16  ;;  %2839 = vmatpush1.bf16.msra.mxu0 %v3814_v37  ;;  %v3759_v37 = vcombine.high %v213_v29, %v217_v31  ;;  %v3758_v43 = vcombine.low %v213_v29, %v217_v31  ;;  %v297_v22 = vld [vmem:[#allocation4 + $0x6b8] sm:$0xff] }
 0x17a   :  { %2880 = vmatpush1.bf16.msra.mxu1 %v3942_v38  ;;  %v4415_v49 = vpop.f32.mrf.mxu0  ;;  %2840 = vmatprep.subr.bf16.mxu0 %v3807_v39  ;;  %v3887_v38 = vcombine.high %v341_v32, %v345_v34  ;;  %v333_v39 = vld [vmem:[#allocation4 + $0x7d8] sm:$0xff] }
 0x17b   :  { %v4417_v52 = vpop.f32.mrf.mxu1  ;;  %2881 = vmatprep.subr.bf16.mxu1 %v3935_v40  ;;  %2870 = vmatprep.mubr.bf16.mxu0 %v4368_v59  ;;  %v369_v59 = vld [vmem:[#allocation4 + $0x8f8] sm:$0xff] }
 0x17c   :  { %v2548_v19 = vpop.f32.mrf.mxu0  ;;  %2911 = vmatprep.mubr.bf16.mxu1 %v4376_v28  ;;  %v3918_v28 = vcombine.low %v373_v57, %v377_v60  ;;  %v3911_v8 = vcombine.high %v365_v5, %v369_v59  ;;  %v3910_v14 = vcombine.low %v365_v5, %v369_v59  ;;  %v337_v40 = vld [vmem:[#allocation4 + $0x7f8] sm:$0xff] }
 0x17d   :  { %v2589_v16 = vpop.f32.mrf.mxu1  ;;  %2841 = vmatpush1.bf16.msra.mxu0 %v3806_v48  ;;  %v3879_v45 = vcombine.high %v333_v39, %v337_v40  ;;  %v4007_v48 = vcombine.high %v461_v41, %v465_v42  ;;  %v3878_v56 = vcombine.low %v333_v39, %v337_v40  ;;  %v4006_v19 = vcombine.low %v461_v41, %v465_v42  ;;  %v313_v5 = vld [vmem:[#allocation4 + $0x738] sm:$0xff] }
 0x17e   :  { %2882 = vmatpush1.bf16.msra.mxu1 %v3934_v50  ;;  %v2549_v62 = vpop.f32.mrf.mxu0  ;;  %2842 = vmatprep.subr.bf16.mxu0 %v3799_v51  ;;  %v325_v50 = vld [vmem:[#allocation4 + $0x798] sm:$0xff] }
 0x17f   :  { %v2590_v1 = vpop.f32.mrf.mxu1  ;;  %2883 = vmatprep.subr.bf16.mxu1 %v3927_v53  ;;  %v329_v51 = vld [vmem:[#allocation4 + $0x7b8] sm:$0xff] }
 0x180   :  { %v453_v53 = vld [vmem:[#allocation4 + $0xb98] sm:$0xff]  ;;  %v3871_v57 = vcombine.high %v325_v50, %v329_v51 }
 0x181   :  { %2843 = vmatpush1.bf16.msra.mxu0 %v3798_v61  ;;  %v3999_v60 = vcombine.high %v453_v53, %v457_v54  ;;  %v317_v16 = vld [vmem:[#allocation4 + $0x758] sm:$0xff]  ;;  %v3998_v1 = vcombine.low %v453_v53, %v457_v54  ;;  %v482_v53 = vsub.s32 3, %v4392_v44 }
 0x182   :  { %2884 = vmatpush1.bf16.msra.mxu1 %v3926_v63  ;;  %2844 = vmatprep.subr.bf16.mxu0 %v3791_v0  ;;  %v321_v61 = vld [vmem:[#allocation4 + $0x778] sm:$0xff]  ;;  %v3870_v0 = vcombine.low %v325_v50, %v329_v51  ;;  %v2547_v51 = vadd.f32 %v4415_v49, %v4406_v30  ;;  %v4169_v30 = vld [vmem:[%s4637_s3 + $0x38] sm:$0xff]  }
 0x183   :  { %2885 = vmatprep.subr.bf16.mxu1 %v3919_v2  ;;  %v445_v62 = vld [vmem:[#allocation4 + $0xb58] sm:$0xff]  ;;  %v3863_v2 = vcombine.high %v317_v16, %v321_v61  ;;  %v4170_v49 = vld [vmem:[%s4637_s3 + $0xb8] sm:$0xff]  }
 0x184   :  { %v449_v63 = vld [vmem:[#allocation4 + $0xb78] sm:$0xff] }
 0x185   :  { %2845 = vmatpush1.bf16.msra.mxu0 %v3790_v6  ;;  %v3991_v3 = vcombine.high %v445_v62, %v449_v63  ;;  %v437_v59 = vld [vmem:[#allocation4 + $0xb18] sm:$0xff] }
 0x186   :  { %2886 = vmatpush1.bf16.msra.mxu1 %v3918_v28  ;;  %2846 = vmatprep.subr.bf16.mxu0 %v3783_v7  ;;  %v441_v6 = vld [vmem:[#allocation4 + $0xb38] sm:$0xff]  ;;  %v3862_v28 = vcombine.low %v317_v16, %v321_v61  ;;  %v3990_v7 = vcombine.low %v445_v62, %v449_v63  ;;  %v483_v16 = vrot.slane %v4395_v55, %v482_v53  ;;  %v4171_v61 = vld [vmem:[%s4637_s3 + $0x70] sm:$0xff]   ;;  %v4216_v53 = vld [vmem:[%s4637_s3 + $0x1b8] sm:$0xff]  }
 0x187   :  { %2887 = vmatprep.subr.bf16.mxu1 %v3911_v8  ;;  %v3855_v8 = vcombine.high %v309_v4, %v313_v5  ;;  %v3983_v9 = vcombine.high %v437_v59, %v441_v6  ;;  %v421_v23 = vld [vmem:[#allocation4 + $0xa98] sm:$0xff]  ;;  %v4172_v62 = vld [vmem:[%s4637_s3 + $0xf0] sm:$0xff]  }
 0x188   :  { %v285_v31 = vld [vmem:[#allocation4 + $0x658] sm:$0xff] }
 0x189   :  { %2847 = vmatpush1.bf16.msra.mxu0 %v3782_v13  ;;  %v433_v13 = vld [vmem:[#allocation4 + $0xaf8] sm:$0xff] }
 0x18a   :  { %2888 = vmatpush1.bf16.msra.mxu1 %v3910_v14  ;;  %2848 = vmatprep.subr.bf16.mxu0 %v3775_v15  ;;  %v3854_v14 = vcombine.low %v309_v4, %v313_v5  ;;  %v3982_v15 = vcombine.low %v437_v59, %v441_v6  ;;  %v3975_v18 = vcombine.high %v429_v12, %v433_v13  ;;  %v289_v32 = vld [vmem:[#allocation4 + $0x678] sm:$0xff]  ;;  %v4174_v5 = vld [vmem:[%s4637_s3 + $0xb0] sm:$0xff]  }
 0x18b   :  { %2889 = vmatprep.subr.bf16.mxu1 %v3903_v17  ;;  %v3847_v17 = vcombine.high %v301_v10, %v305_v11  ;;  %v413_v34 = vld [vmem:[#allocation4 + $0xa58] sm:$0xff] }
 0x18c   :  { %v277_v40 = vld [vmem:[#allocation4 + $0x618] sm:$0xff] }
 0x18d   :  { %2849 = vmatpush1.bf16.msra.mxu0 %v3774_v24  ;;  %v425_v24 = vld [vmem:[#allocation4 + $0xab8] sm:$0xff] }
 0x18e   :  { %2890 = vmatpush1.bf16.msra.mxu1 %v3902_v25  ;;  %2850 = vmatprep.subr.bf16.mxu0 %v3767_v26  ;;  %v3846_v25 = vcombine.low %v301_v10, %v305_v11  ;;  %v3974_v26 = vcombine.low %v429_v12, %v433_v13  ;;  %v3967_v29 = vcombine.high %v421_v23, %v425_v24  ;;  %v281_v41 = vld [vmem:[#allocation4 + $0x638] sm:$0xff]  ;;  %v4179_v11 = vld [vmem:[%s4637_s3 + $0x60] sm:$0xff]  }
 0x18f   :  { %2891 = vmatprep.subr.bf16.mxu1 %v3895_v27  ;;  %v3839_v27 = vcombine.high %v293_v21, %v297_v22  ;;  %v405_v42 = vld [vmem:[#allocation4 + $0xa18] sm:$0xff]  ;;  %v3822_v54 = vcombine.low %v277_v40, %v281_v41 }
 0x190   :  { %v4178_v10 = vld [vmem:[%s4637_s3 + $0xa8] sm:$0xff]  }
 0x191   :  { %2851 = vmatpush1.bf16.msra.mxu0 %v3766_v35  ;;  %v417_v35 = vld [vmem:[#allocation4 + $0xa78] sm:$0xff] }
 0x192   :  { %2892 = vmatpush1.bf16.msra.mxu1 %v3894_v36  ;;  %2852 = vmatprep.subr.bf16.mxu0 %v3759_v37  ;;  %v3838_v36 = vcombine.low %v293_v21, %v297_v22  ;;  %v3966_v37 = vcombine.low %v421_v23, %v425_v24  ;;  %v3959_v39 = vcombine.high %v413_v34, %v417_v35  ;;  %v4182_v21 = vld [vmem:[%s4637_s3 + $0xa0] sm:$0xff]   ;;  %v4183_v22 = vld [vmem:[%s4637_s3 + $0x58] sm:$0xff]  }
 0x193   :  { %2893 = vmatprep.subr.bf16.mxu1 %v3887_v38  ;;  %v3831_v38 = vcombine.high %v285_v31, %v289_v32  ;;  %v4184_v23 = vld [vmem:[%s4637_s3 + $0xd8] sm:$0xff]  }
 0x195   :  { %2853 = vmatpush1.bf16.msra.mxu0 %v3758_v43  ;;  %v409_v43 = vld [vmem:[#allocation4 + $0xa38] sm:$0xff] }
 0x196   :  { %2894 = vmatpush1.bf16.msra.mxu1 %v3886_v58  ;;  %2854 = vmatprep.subr.bf16.mxu0 %v3879_v45  ;;  %v3830_v58 = vcombine.low %v285_v31, %v289_v32  ;;  %v3958_v45 = vcombine.low %v413_v34, %v417_v35  ;;  %v3951_v50 = vcombine.high %v405_v42, %v409_v43  ;;  %v4189_v31 = vld [vmem:[%s4637_s3 + $0x10] sm:$0xff]   ;;  %v4191_v34 = vld [vmem:[%s4637_s3 + $0x48] sm:$0xff]  }
 0x197   :  { %2895 = vmatprep.subr.bf16.mxu1 %v4007_v48  ;;  %v3823_v48 = vcombine.high %v277_v40, %v281_v41  ;;  %v4190_v32 = vld [vmem:[%s4637_s3 + $0x90] sm:$0xff]   ;;  %v4196_v40 = vld [vmem:[%s4637_s3 + $0xc0] sm:$0xff]  }
 0x198   :  { %v4197_v41 = vld [vmem:[%s4637_s3] sm:$0xff]  }
 0x199   :  { %2855 = vmatpush2.bf16.msra.mxu0 %v3878_v56  ;;  %v3950_v56 = vcombine.low %v405_v42, %v409_v43  ;;  %v2920_v42 = vmax.f32 %v4410_v46, 0.0  ;;  %v4198_v43 = vld [vmem:[%s4637_s3 + $0x80] sm:$0xff]   ;;  %v4200_v46 = vld [vmem:[%s4637_s3 + $0x138] sm:$0xff]  }
 0x19a   :  { %2896 = vmatpush2.bf16.msra.mxu1 %v4006_v19  ;;  %2856 = vmatprep.subr.bf16.mxu0 %v3871_v57  ;;  %v4167_v19 = vld [vmem:[%s4637_s3 + $0x78] sm:$0xff]  }
 0x19b   :  { %2897 = vmatprep.subr.bf16.mxu1 %v3999_v60  ;;  %v4168_v57 = vld [vmem:[%s4637_s3 + $0xf8] sm:$0xff]   ;;  %v2921_v60 = vmax.f32 %v2547_v51, 0.0  ;;  %v4201_v51 = vld [vmem:[%s4637_s3 + $0x170] sm:$0xff]  }
 0x19d   :  { %2857 = vmatpush2.bf16.msra.mxu0 %v3870_v0  ;;  %v2929_v63 = vpack.c.bf16 %v2921_v60, %v2921_v60  ;;  %v4218_v60 = vld [vmem:[%s4637_s3 + $0x1b0] sm:$0xff]  }
 0x19e   :  { %2898 = vmatpush2.bf16.msra.mxu1 %v3998_v1  ;;  %2858 = vmatprep.subr.bf16.mxu0 %v3863_v2  ;;  %v2588_v1 = vadd.f32 %v4417_v52, %v483_v16  ;;  %v4219_v16 = vld [vmem:[%s4637_s3 + $0x1e8] sm:$0xff]  }
 0x19f   :  { %2899 = vmatprep.subr.bf16.mxu1 %v3991_v3  ;;  %v4173_v3 = vld [vmem:[%s4637_s3 + $0x30] sm:$0xff]  }
 0x1a1   :  { %2859 = vmatpush2.bf16.msra.mxu0 %v3862_v28 }
 0x1a2   :  { %2900 = vmatpush2.bf16.msra.mxu1 %v3990_v7  ;;  %2860 = vmatprep.subr.bf16.mxu0 %v3855_v8  ;;  %v4177_v8 = vld [vmem:[%s4637_s3 + $0x28] sm:$0xff]  }
 0x1a3   :  { %2901 = vmatprep.subr.bf16.mxu1 %v3983_v9 }
 0x1a5   :  { %2861 = vmatpush2.bf16.msra.mxu0 %v3854_v14  ;;  %v4180_v14 = vld [vmem:[%s4637_s3 + $0xe0] sm:$0xff]  }
 0x1a6   :  { %2902 = vmatpush2.bf16.msra.mxu1 %v3982_v15  ;;  %2862 = vmatprep.subr.bf16.mxu0 %v3847_v17  ;;  %v478_v15 = vsub.s32 2, %v4392_v44 }
 0x1a7   :  { %2903 = vmatprep.subr.bf16.mxu1 %v3975_v18  ;;  %v4181_v18 = vld [vmem:[%s4637_s3 + $0x20] sm:$0xff]  }
 0x1a8   :  { %v479_v24 = vrot.slane %v4395_v55, %v478_v15  ;;  %v4188_v55 = vld [vmem:[%s4637_s3 + $0xd0] sm:$0xff]  }
 0x1a9   :  { %2863 = vmatpush2.bf16.msra.mxu0 %v3846_v25  ;;  %v4185_v25 = vld [vmem:[%s4637_s3 + $0x18] sm:$0xff]  }
 0x1aa   :  { %2904 = vmatpush2.bf16.msra.mxu1 %v3974_v26  ;;  %2864 = vmatprep.subr.bf16.mxu0 %v3839_v27  ;;  %v4186_v26 = vld [vmem:[%s4637_s3 + $0x98] sm:$0xff]   ;;  %v4187_v27 = vld [vmem:[%s4637_s3 + $0x50] sm:$0xff]  }
 0x1ab   :  { %2905 = vmatprep.subr.bf16.mxu1 %v3967_v29  ;;  %v2586_v29 = vadd.f32 %v4412_v47, %v479_v24  ;;  %v4192_v47 = vld [vmem:[%s4637_s3 + $0xc8] sm:$0xff]   ;;  %v490_v24 = vsub.s32 5, %v4392_v44 }
 0x1ad   :  { %2865 = vmatpush2.bf16.msra.mxu0 %v3838_v36  ;;  %v4193_v36 = vld [vmem:[%s4637_s3 + $0x8] sm:$0xff]  }
 0x1ae   :  { %2906 = vmatpush2.bf16.msra.mxu1 %v3966_v37  ;;  %2866 = vmatprep.subr.bf16.mxu0 %v3831_v38  ;;  %v4194_v37 = vld [vmem:[%s4637_s3 + $0x88] sm:$0xff]   ;;  %v4195_v38 = vld [vmem:[%s4637_s3 + $0x40] sm:$0xff]  }
 0x1af   :  { %2907 = vmatprep.subr.bf16.mxu1 %v3959_v39 }
 0x1b1   :  { %2867 = vmatpush2.bf16.msra.mxu0 %v3830_v58  ;;  %v4199_v58 = vld [vmem:[%s4637_s3 + $0x178] sm:$0xff]  }
 0x1b2   :  { %2908 = vmatpush2.bf16.msra.mxu1 %v3958_v45  ;;  %2868 = vmatprep.subr.bf16.mxu0 %v3823_v48  ;;  %v4215_v48 = vld [vmem:[%s4637_s3 + $0x1f8] sm:$0xff]  }
 0x1b3   :  { %2909 = vmatprep.subr.bf16.mxu1 %v3951_v50  ;;  %v2928_v50 = vpack.c.bf16 %v2920_v42, %v2920_v42 }
 0x1b5   :  { %2869 = vmatpush2.bf16.msra.mxu0 %v3822_v54 }
 0x1b6   :  { %2910 = vmatpush2.bf16.msra.mxu1 %v3950_v56  ;;  %4073 = vmatprep.subr.bf16.mxu0 %v4167_v19  ;;  %v4217_v56 = vld [vmem:[%s4637_s3 + $0x1f0] sm:$0xff]  }
 0x1b7   :  { %4095 = vmatprep.subr.bf16.mxu1 %v4168_v57  ;;  %v4202_v19 = vld [vmem:[%s4637_s3 + $0x130] sm:$0xff]   ;;  %v4203_v57 = vld [vmem:[%s4637_s3 + $0x168] sm:$0xff]  }
 0x1b8   :  { %v2626_v0 = vpop.f32.mrf.mxu0  ;;  %2871 = vmatmul.mubr.bf16.vlgmr.msra.gmra.mxu0 %v4374_v20  ;;  %v4175_v20 = vld [vmem:[%s4637_s3 + $0x68] sm:$0xff]  }
 0x1b9   :  { %v4445_v2 = vpop.f32.mrf.mxu1  ;;  %2912 = vmatmul.mubr.bf16.vlgmr.msra.gmra.mxu1 %v4382_v33  ;;  %4074 = vmatpush3.bf16.msra.mxu0 %v4169_v30  ;;  %v4176_v33 = vld [vmem:[%s4637_s3 + $0xe8] sm:$0xff]   ;;  %v2627_v35 = vadd.f32 %v2626_v0, %v2586_v29  ;;  %v4207_v0 = vld [vmem:[%s4637_s3 + $0x158] sm:$0xff]  }
 0x1ba   :  { %3487 = vmatprep.mubr.bf16.mxu0 %v2929_v63  ;;  %4096 = vmatpush3.bf16.msra.mxu1 %v4170_v49  ;;  %v2628_v4 = vpop.f32.mrf.mxu0  ;;  %v4204_v30 = vld [vmem:[%s4637_s3 + $0x128] sm:$0xff]   ;;  %v4205_v49 = vld [vmem:[%s4637_s3 + $0x160] sm:$0xff]  }
 0x1bb   :  { %v2629_v52 = vadd.f32 %v2628_v4, %v2588_v1  ;;  %v2669_v59 = vpop.f32.mrf.mxu1  ;;  %4075 = vmatprep.subr.bf16.mxu0 %v4171_v61  ;;  %4097 = vmatprep.subr.bf16.mxu1 %v4172_v62  ;;  %v2668_v39 = vadd.f32 %v4445_v2, %v2627_v35  ;;  %v4220_v61 = vld [vmem:[%s4637_s3 + $0x1a8] sm:$0xff]   ;;  %v4221_v62 = vld [vmem:[%s4637_s3 + $0x1e0] sm:$0xff]   ;;  %v4223_v2 = vld [vmem:[%s4637_s3 + $0x1d8] sm:$0xff]  }
 0x1bc   :  { %v2630_v6 = vpop.f32.mrf.mxu0  ;;  %v4206_v63 = vld [vmem:[%s4637_s3 + $0x120] sm:$0xff]   ;;  %v4209_v4 = vld [vmem:[%s4637_s3 + $0x150] sm:$0xff]  }
 0x1bd   :  { %v2670_v28 = vadd.f32 %v2669_v59, %v2629_v52  ;;  %v2671_v7 = vpop.f32.mrf.mxu1  ;;  %4076 = vmatpush3.bf16.msra.mxu0 %v4173_v3  ;;  %v2922_v45 = vmax.f32 %v2668_v39, 0.0  ;;  %v4222_v1 = vld [vmem:[%s4637_s3 + $0x1a0] sm:$0xff]   ;;  %v4208_v3 = vld [vmem:[%s4637_s3 + $0x118] sm:$0xff]   ;;  %v4211_v52 = vld [vmem:[%s4637_s3 + $0x148] sm:$0xff]  }
 0x1be   :  { %4098 = vmatpush3.bf16.msra.mxu1 %v4174_v5  ;;  %v2631_v9 = vpop.f32.mrf.mxu0  ;;  %4077 = vmatprep.subr.bf16.mxu0 %v4175_v20  ;;  %v4224_v5 = vld [vmem:[%s4637_s3 + $0x198] sm:$0xff]   ;;  %v4210_v20 = vld [vmem:[%s4637_s3 + $0x110] sm:$0xff]   ;;  %v4212_v59 = vld [vmem:[%s4637_s3 + $0x108] sm:$0xff]  }
 0x1bf   :  { %v2923_v12 = vmax.f32 %v2670_v28, 0.0  ;;  %v2672_v13 = vpop.f32.mrf.mxu1  ;;  %4099 = vmatprep.subr.bf16.mxu1 %v4176_v33  ;;  %v2930_v54 = vpack.c.bf16 %v2922_v45, %v2922_v45  ;;  %v4213_v33 = vld [vmem:[%s4637_s3 + $0x140] sm:$0xff]   ;;  %v4225_v28 = vld [vmem:[%s4637_s3 + $0x1d0] sm:$0xff]  }
 0x1c0   :  { %v4214_v6 = vld [vmem:[%s4637_s3 + $0x100] sm:$0xff]  }
 0x1c1   :  { %v2931_v17 = vpack.c.bf16 %v2923_v12, %v2923_v12  ;;  %4078 = vmatpush3.bf16.msra.mxu0 %v4177_v8  ;;  %v4226_v8 = vld [vmem:[%s4637_s3 + $0x190] sm:$0xff]   ;;  %v4227_v12 = vld [vmem:[%s4637_s3 + $0x1c8] sm:$0xff]  }
 0x1c2   :  { %4100 = vmatpush3.bf16.msra.mxu1 %v4178_v10  ;;  %4079 = vmatprep.subr.bf16.mxu0 %v4179_v11 }
 0x1c3   :  { %3527 = vmatprep.mubr.bf16.mxu1 %v2931_v17  ;;  %4101 = vmatprep.subr.bf16.mxu1 %v4180_v14  ;;  %v4228_v14 = vld [vmem:[%s4637_s3 + $0x188] sm:$0xff]  }
 0x1c5   :  { %4080 = vmatpush3.bf16.msra.mxu0 %v4181_v18 }
 0x1c6   :  { %4102 = vmatpush3.bf16.msra.mxu1 %v4182_v21  ;;  %4081 = vmatprep.subr.bf16.mxu0 %v4183_v22  ;;  %v4229_v21 = vld [vmem:[%s4637_s3 + $0x1c0] sm:$0xff]  }
 0x1c7   :  { %4103 = vmatprep.subr.bf16.mxu1 %v4184_v23  ;;  %v4230_v22 = vld [vmem:[%s4637_s3 + $0x180] sm:$0xff]   ;;  %v486_v23 = vsub.s32 4, %v4392_v44 }
 0x1c9   :  { %4082 = vmatpush3.bf16.msra.mxu0 %v4185_v25  ;;  %v4231_v25 = vld [vmem:[#allocation6] sm:$0xff] }
 0x1ca   :  { %4104 = vmatpush3.bf16.msra.mxu1 %v4186_v26  ;;  %4083 = vmatprep.subr.bf16.mxu0 %v4187_v27  ;;  %v487_v26 = vrot.slane %v4231_v25, %v486_v23  ;;  %v491_v27 = vrot.slane %v4231_v25, %v490_v24 }
 0x1cb   :  { %4105 = vmatprep.subr.bf16.mxu1 %v4188_v55 }
 0x1cd   :  { %4084 = vmatpush3.bf16.msra.mxu0 %v4189_v31 }
 0x1ce   :  { %4106 = vmatpush3.bf16.msra.mxu1 %v4190_v32  ;;  %4085 = vmatprep.subr.bf16.mxu0 %v4191_v34 }
 0x1cf   :  { %4107 = vmatprep.subr.bf16.mxu1 %v4192_v47 }
 0x1d1   :  { %4086 = vmatpush3.bf16.msra.mxu0 %v4193_v36 }
 0x1d2   :  { %4108 = vmatpush3.bf16.msra.mxu1 %v4194_v37  ;;  %4087 = vmatprep.subr.bf16.mxu0 %v4195_v38 }
 0x1d3   :  { %4109 = vmatprep.subr.bf16.mxu1 %v4196_v40 }
 0x1d5   :  { %4088 = vmatpush3.bf16.msra.mxu0 %v4197_v41 }
 0x1d6   :  { %4110 = vmatpush3.bf16.msra.mxu1 %v4198_v43  ;;  %4117 = vmatprep.subr.bf16.mxu0 %v4199_v58 }
 0x1d7   :  { %4139 = vmatprep.subr.bf16.mxu1 %v4215_v48 }
 0x1d8   :  { %3488 = vmatmul.mubr.bf16.vlgmr.msra.gmra.mxu0 %v2928_v50  ;;  %v498_v50 = vsub.s32 7, %v4392_v44 }
 0x1d9   :  { %3528 = vmatmul.mubr.bf16.vlgmr.msra.gmra.mxu1 %v2930_v54  ;;  %4118 = vmatpush3.bf16.msra.mxu0 %v4200_v46  ;;  %v494_v46 = vsub.s32 6, %v4392_v44 }
 0x1da   :  { %4119 = vmatprep.subr.bf16.mxu0 %v4201_v51  ;;  %4140 = vmatpush3.bf16.msra.mxu1 %v4216_v53  ;;  %v499_v53 = vrot.slane %v4231_v25, %v498_v50 }
 0x1db   :  { %4141 = vmatprep.subr.bf16.mxu1 %v4217_v56  ;;  %v495_v51 = vrot.slane %v4231_v25, %v494_v46 }
 0x1dd   :  { %4120 = vmatpush3.bf16.msra.mxu0 %v4202_v19 }
 0x1de   :  { %4121 = vmatprep.subr.bf16.mxu0 %v4203_v57  ;;  %4142 = vmatpush3.bf16.msra.mxu1 %v4218_v60 }
 0x1df   :  { %4143 = vmatprep.subr.bf16.mxu1 %v4219_v16 }
 0x1e1   :  { %4122 = vmatpush3.bf16.msra.mxu0 %v4204_v30 }
 0x1e2   :  { %4123 = vmatprep.subr.bf16.mxu0 %v4205_v49  ;;  %4144 = vmatpush3.bf16.msra.mxu1 %v4220_v61 }
 0x1e3   :  { %4145 = vmatprep.subr.bf16.mxu1 %v4221_v62 }
 0x1e5   :  { %4124 = vmatpush3.bf16.msra.mxu0 %v4206_v63 }
 0x1e6   :  { %4125 = vmatprep.subr.bf16.mxu0 %v4207_v0  ;;  %4146 = vmatpush3.bf16.msra.mxu1 %v4222_v1 }
 0x1e7   :  { %4147 = vmatprep.subr.bf16.mxu1 %v4223_v2 }
 0x1e9   :  { %4126 = vmatpush3.bf16.msra.mxu0 %v4208_v3 }
 0x1ea   :  { %4127 = vmatprep.subr.bf16.mxu0 %v4209_v4  ;;  %4148 = vmatpush3.bf16.msra.mxu1 %v4224_v5 }
 0x1eb   :  { %4149 = vmatprep.subr.bf16.mxu1 %v4225_v28 }
 0x1ed   :  { %4128 = vmatpush3.bf16.msra.mxu0 %v4210_v20 }
 0x1ee   :  { %4129 = vmatprep.subr.bf16.mxu0 %v4211_v52  ;;  %4150 = vmatpush3.bf16.msra.mxu1 %v4226_v8 }
 0x1ef   :  { %4151 = vmatprep.subr.bf16.mxu1 %v4227_v12 }
 0x1f1   :  { %4130 = vmatpush3.bf16.msra.mxu0 %v4212_v59  ;;  %v4008_v59 = vld [vmem:[#allocation7] ss:$0 sm:$0xff] }
 0x1f2   :  { %4131 = vmatprep.subr.bf16.mxu0 %v4213_v33  ;;  %4152 = vmatpush3.bf16.msra.mxu1 %v4228_v14 }
 0x1f3   :  { %4153 = vmatprep.subr.bf16.mxu1 %v4229_v21 }
 0x1f5   :  { %4132 = vmatpush3.bf16.msra.mxu0 %v4214_v6 }
 0x1f6   :  { %4154 = vmatpush3.bf16.msra.mxu1 %v4230_v22 }
 0x1f8   :  { %v2708_v7 = vpop.f32.mrf.mxu0 }
 0x1f9   :  { %v2749_v9 = vpop.f32.mrf.mxu1  ;;  %v2709_v55 = vadd.f32 %v2708_v7, %v487_v26 }
 0x1fa   :  { %v2710_v10 = vpop.f32.mrf.mxu0 }
 0x1fb   :  { %v2751_v11 = vpop.f32.mrf.mxu1  ;;  %v2711_v29 = vadd.f32 %v2710_v10, %v491_v27  ;;  %v2750_v31 = vadd.f32 %v2749_v9, %v2709_v55 }
 0x1fc   :  { %v2712_v13 = vpop.f32.mrf.mxu0 }
 0x1fd   :  { %v2753_v15 = vpop.f32.mrf.mxu1  ;;  %v2752_v34 = vadd.f32 %v2751_v11, %v2711_v29 }
 0x1fe   :  { %v2713_v17 = vpop.f32.mrf.mxu0 }
 0x1ff   :  { %v2754_v18 = vpop.f32.mrf.mxu1 }
 0x238   :  { %v2790_v32 = vpop.f32.mrf.mxu0 }
 0x239   :  { %v2791_v35 = vadd.f32 %v2790_v32, %v2750_v31  ;;  %v2831_v47 = vpop.f32.mrf.mxu1 }
 0x23a   :  { %v2792_v36 = vpop.f32.mrf.mxu0  ;;  %v2832_v54 = vadd.f32 %v2831_v47, %v495_v51 }
 0x23b   :  { %v2793_v37 = vadd.f32 %v2792_v36, %v2752_v34  ;;  %v2833_v38 = vpop.f32.mrf.mxu1  ;;  %v2924_v39 = vmax.f32 %v2791_v35, 0.0 }
 0x23c   :  { %v2794_v40 = vpop.f32.mrf.mxu0  ;;  %v2834_v19 = vadd.f32 %v2833_v38, %v499_v53 }
 0x23d   :  { %v2925_v41 = vmax.f32 %v2793_v37, 0.0  ;;  %v2835_v42 = vpop.f32.mrf.mxu1  ;;  %v2932_v48 = vpack.c.bf16 %v2924_v39, %v2924_v39 }
 0x23e   :  { %v2795_v43 = vpop.f32.mrf.mxu0 }
 0x23f   :  { %v2933_v58 = vpack.c.bf16 %v2925_v41, %v2925_v41  ;;  %v2836_v45 = vpop.f32.mrf.mxu1 }
 0x241   :  { %3567 = vmatprep.mubr.bf16.mxu0 %v2933_v58 }
 0x242   :  { %3568 = vmatmul.mubr.bf16.vlgmr.msra.gmra.mxu0 %v2932_v48 }
 0x278   :  { %v2872_v56 = vpop.f32.mrf.mxu0 }
 0x279   :  { %v2873_v57 = vadd.f32 %v2872_v56, %v2832_v54  ;;  %v2913_v60 = vpop.f32.mrf.mxu1 }
 0x27a   :  { %v2874_v16 = vpop.f32.mrf.mxu0 }
 0x27b   :  { %v2914_v30 = vadd.f32 %v2913_v60, %v2873_v57  ;;  %v2875_v49 = vadd.f32 %v2874_v16, %v2834_v19  ;;  %v2915_v61 = vpop.f32.mrf.mxu1 }
 0x27c   :  { %v2876_v62 = vpop.f32.mrf.mxu0 }
 0x27d   :  { %v2916_v63 = vadd.f32 %v2915_v61, %v2875_v49  ;;  %v2917_v0 = vpop.f32.mrf.mxu1  ;;  %v2926_v1 = vmax.f32 %v2914_v30, 0.0 }
 0x27e   :  { %v2877_v2 = vpop.f32.mrf.mxu0 }
 0x27f   :  { %v2927_v3 = vmax.f32 %v2916_v63, 0.0  ;;  %v2918_v4 = vpop.f32.mrf.mxu1  ;;  %v2934_v44 = vpack.c.bf16 %v2926_v1, %v2926_v1 }
 0x281   :  { %v2935_v5 = vpack.c.bf16 %v2927_v3, %v2927_v3 }
 0x283   :  { %3607 = vmatprep.mubr.bf16.mxu1 %v2935_v5 }
 0x284   :  { %3608 = vmatmul.mubr.bf16.vlgmr.msra.gmra.mxu1 %v2934_v44 }
 0x298   :  { %v4089_v20 = vpop.f32.mrf.mxu0 }
 0x299   :  { %v4111_v52 = vpop.f32.mrf.mxu1 }
 0x29a   :  { %v4090_v33 = vpop.f32.mrf.mxu0 }
 0x29b   :  { %v4091_v6 = vadd.f32 %v4090_v33, %v4089_v20  ;;  %v4112_v28 = vpop.f32.mrf.mxu1 }
 0x29c   :  { %v4113_v7 = vadd.f32 %v4112_v28, %v4111_v52  ;;  %v4092_v8 = vpop.f32.mrf.mxu0 }
 0x29d   :  { %v3490_v9 = vadd.f32 %v4091_v6, %v4008_v59  ;;  %v4114_v10 = vpop.f32.mrf.mxu1 }
 0x29e   :  { %v4093_v11 = vpop.f32.mrf.mxu0 }
 0x29f   :  { %v3530_v12 = vadd.f32 %v4113_v7, %v3490_v9  ;;  %v4115_v13 = vpop.f32.mrf.mxu1 }
 0x302   :  { %v4133_v14 = vpop.f32.mrf.mxu0 }
 0x304   :  { %v4134_v15 = vpop.f32.mrf.mxu0 }
 0x305   :  { %v4135_v17 = vadd.f32 %v4134_v15, %v4133_v14 }
 0x306   :  { %v4136_v18 = vpop.f32.mrf.mxu0 }
 0x307   :  { %v3570_v21 = vadd.f32 %v4135_v17, %v3530_v12 }
 0x308   :  { %v4137_v22 = vpop.f32.mrf.mxu0 }
 0x344   :  { %v4155_v23 = vpop.f32.mrf.mxu1 }
 0x346   :  { %v4156_v24 = vpop.f32.mrf.mxu1 }
 0x347   :  { %v4157_v25 = vadd.f32 %v4156_v24, %v4155_v23 }
 0x348   :  { %v4158_v26 = vpop.f32.mrf.mxu1 }
 0x349   :  { %v3610_v27 = vadd.f32 %v4157_v25, %v3570_v21 }
 0x34a   :  { %v4159_v55 = vpop.f32.mrf.mxu1 }
 0x34b   :  { %3616 = vst.msk [vmem:[%s4639_s5] sm:$0xff] %vm3615_vm0, %v3610_v27 }
 0x34c   :  { %3621 = vsyncpa [#allocation3], 1 }
 0x34d   :  { %3622 = vsyncpa [#allocation5], 1 }
 0x34e   :  { %3623 = vsyncpa [#allocation8], 1 }

// kernel: tpu_custom_call.1
= control target key start
LH: loop header
LB: loop body
LE: loop exit
PB: predicated region body
PF: predicated region fallthrough
CT: control target
= control target key end

     0   :  { %10 = vsyncpa [#allocation3], 0  ;;  %s4634_s0 = inlined_call_operand.hbm [shape: f32[8,768], index: 0, kind: input, shape index: {}]   ;;  %s4635_s1 = inlined_call_operand.hbm [shape: bf16[768,1024], index: 1, kind: input, shape index: {}]   ;;  %s4636_s2 = inlined_call_operand.hbm [shape: f32[1,1024], index: 2, kind: input, shape index: {}]   ;;  %s4637_s3 = inlined_call_operand.vmem [shape: bf16[1024,4], index: 3, kind: input, shape index: {}]   ;;  %s4638_s4 = inlined_call_operand.hbm [shape: f32[1,4], index: 4, kind: input, shape index: {}]   ;;  %s4639_s5 = inlined_call_operand.vmem [shape: f32[8,4], index: 5, kind: output, shape index: {}]  }
   0x1   :  { %11 = vsyncpa [#allocation5], 0 }
   0x2   :  { %12 = vsyncpa [#allocation8], 0  ;;  %s4318_s18 = smov [#allocation4]  }
   0x3   :  { %s28_s19 = sshll.u32 %s4318_s18, 4  ;;  %s29_s19 = int_to_ptr.vmem [resolvable:$true] %s28_s19 }
   0x4   :  { %s4240_s20 = scalar_lea.vmem %s29_s19, 49152  ;;  %p4245_p1 = scmp.lt.s32.totalorder %s29_s19, %s29_s19 }
   0x5   :  { %p4241_p0 = scmp.ne.s32.totalorder %s29_s19, %s4240_s20  ;;  %p4246_p2 = scmp.lt.s32.totalorder %s4240_s20, %s4240_s20 }
   0x7   :  { %p4247_p3 = por %p4246_p2, %p4245_p1 }
   0x9   :  { %p4248_p4 = pnand %p4247_p3, %p4241_p0 }
   0xb   :  { %4251 = shalt.err (!%p4248_p4)
}
   0xc   :  { %s4319_s21 = smov 512   ;;  %s4320_s22 = smov 32  }
   0xd   :  { %34 = dma.hbm_to_vmem [thread:$0]  %s4635_s1, 49152, %s29_s19, [#allocation5], %s4319_s21, %s4319_s21, %s4320_s22  }
   0xe   :  { %s4321_s25 = smov [#allocation2]   ;;  %s4322_s27 = smov [#allocation6]  }
   0xf   :  { %s19_s26 = sshll.u32 %s4321_s25, 4  ;;  %s41_s28 = sshll.u32 %s4322_s27, 4  ;;  %s20_s26 = int_to_ptr.vmem [resolvable:$true] %s19_s26  ;;  %s42_s28 = int_to_ptr.vmem [resolvable:$true] %s41_s28 }
  0x10   :  { %s4260_s29 = scalar_lea.vmem %s20_s26, 768  ;;  %p4265_p6 = scmp.lt.s32.totalorder %s20_s26, %s20_s26 }
  0x11   :  { %p4261_p5 = scmp.ne.s32.totalorder %s20_s26, %s4260_s29  ;;  %p4266_p7 = scmp.lt.s32.totalorder %s4260_s29, %s4260_s29 }
  0x13   :  { %p4267_p8 = por %p4266_p7, %p4265_p6 }
  0x15   :  { %p4268_p9 = pnand %p4267_p8, %p4261_p5 }
  0x17   :  { %4271 = shalt.err (!%p4268_p9)
}
  0x18   :  { %22 = dma.hbm_to_vmem [thread:$0]  %s4634_s0, 768, %s20_s26, [#allocation3]  }
  0x19   :  { %s4280_s7 = scalar_lea.vmem %s42_s28, 128  ;;  %p4285_p11 = scmp.lt.s32.totalorder %s42_s28, %s42_s28 }
  0x1a   :  { %p4281_p10 = scmp.ne.s32.totalorder %s42_s28, %s4280_s7  ;;  %p4286_p12 = scmp.lt.s32.totalorder %s4280_s7, %s4280_s7 }
  0x1c   :  { %p4287_p13 = por %p4286_p12, %p4285_p11 }
  0x1e   :  { %p4288_p0 = pnand %p4287_p13, %p4281_p10 }
  0x20   :  { %4291 = shalt.err (!%p4288_p0)
}
  0x21   :  { %44 = dma.hbm_to_vmem [thread:$0]  %s4636_s2, 128, %s42_s28, [#allocation5]  }
  0x22   :  { %s4323_s9 = smov [#allocation7]  }
  0x23   :  { %s53_s10 = sshll.u32 %s4323_s9, 4  ;;  %s54_s10 = int_to_ptr.vmem [resolvable:$true] %s53_s10 }
  0x24   :  { %s4300_s11 = scalar_lea.vmem %s54_s10, 16  ;;  %s4304_s12 = scalar_lea.vmem %s54_s10, 32 }
  0x25   :  { %p4301_p1 = scmp.ne.s32.totalorder %s54_s10, %s4300_s11  ;;  %p4305_p2 = scmp.lt.s32.totalorder %s54_s10, %s54_s10 }
  0x26   :  { %p4306_p3 = scmp.lt.s32.totalorder %s4304_s12, %s4300_s11 }
  0x28   :  { %p4307_p4 = por %p4306_p3, %p4305_p2 }
  0x2a   :  { %p4308_p5 = pnand %p4307_p4, %p4301_p1 }
  0x2c   :  { %4311 = shalt.err (!%p4308_p5)
}
  0x2d   :  { %56 = dma.hbm_to_vmem [thread:$0]  %s4638_s4, 16, %s54_s10, [#allocation8]  }
  0x2e   :  { %4312 = dma.done.wait [#allocation3], 768  }
  0x2f   :  { %4313 = vsyncadd [#allocation3], 4294966528 }
  0x30   :  { %4314 = dma.done.wait [#allocation5], 49280  }
  0x31   :  { %4315 = vsyncadd [#allocation5], 4294918016 }
  0x32   :  { %4316 = dma.done.wait [#allocation8], 16  }
  0x33   :  { %4317 = vsyncadd [#allocation8], 4294967280  ;;  %v138_v0 = vld [vmem:[#allocation4 + $0x1c0] sm:$0xff]  ;;  %v71_v53 = vld [vmem:[#allocation2 + $0x8] sm:$0xff]  ;;  %vm3615_vm0 = vcmask 31744  }
  0x34   :  { %v142_v1 = vld [vmem:[#allocation4 + $0x1e0] sm:$0xff]  ;;  %v73_v54 = vld [vmem:[#allocation2 + $0x18] sm:$0xff]  ;;  %v4366_v58 = vpack.c.bf16 %v71_v53, %v71_v53 }
  0x35   :  { %v266_v2 = vld [vmem:[#allocation4 + $0x5c0] sm:$0xff]  ;;  %v3681_v3 = vcombine.high %v138_v0, %v142_v1  ;;  %v3680_v5 = vcombine.low %v138_v0, %v142_v1  ;;  %v4368_v59 = vpack.c.bf16 %v73_v54, %v73_v54 }
  0x36   :  { %v270_v4 = vld [vmem:[#allocation4 + $0x5e0] sm:$0xff]  ;;  %2460 = vmatprep.mubr.bf16.mxu0 %v4366_v58 }
  0x37   :  { %v130_v6 = vld [vmem:[#allocation4 + $0x180] sm:$0xff]  ;;  %v3809_v8 = vcombine.high %v266_v2, %v270_v4  ;;  %v3808_v9 = vcombine.low %v266_v2, %v270_v4  ;;  %2428 = vmatprep.subr.bf16.mxu0 %v3681_v3  ;;  %2501 = vmatprep.mubr.bf16.mxu1 %v4368_v59 }
  0x38   :  { %v134_v7 = vld [vmem:[#allocation4 + $0x1a0] sm:$0xff]  ;;  %2429 = vmatpush1.bf16.msra.mxu0 %v3680_v5 }
  0x39   :  { %v3673_v10 = vcombine.high %v130_v6, %v134_v7  ;;  %v258_v11 = vld [vmem:[#allocation4 + $0x580] sm:$0xff]  ;;  %2469 = vmatprep.subr.bf16.mxu1 %v3809_v8  ;;  %v3672_v18 = vcombine.low %v130_v6, %v134_v7 }
  0x3a   :  { %v262_v12 = vld [vmem:[#allocation4 + $0x5a0] sm:$0xff]  ;;  %2470 = vmatpush1.bf16.msra.mxu1 %v3808_v9 }
  0x3b   :  { %v122_v13 = vld [vmem:[#allocation4 + $0x140] sm:$0xff]  ;;  %v3801_v14 = vcombine.high %v258_v11, %v262_v12  ;;  %2430 = vmatprep.subr.bf16.mxu0 %v3673_v10  ;;  %v3800_v19 = vcombine.low %v258_v11, %v262_v12 }
  0x3c   :  { %v126_v15 = vld [vmem:[#allocation4 + $0x160] sm:$0xff]  ;;  %2431 = vmatpush1.bf16.msra.mxu0 %v3672_v18 }
  0x3d   :  { %v250_v16 = vld [vmem:[#allocation4 + $0x540] sm:$0xff]  ;;  %v3665_v20 = vcombine.high %v122_v13, %v126_v15  ;;  %2471 = vmatprep.subr.bf16.mxu1 %v3801_v14  ;;  %v3664_v26 = vcombine.low %v122_v13, %v126_v15 }
  0x3e   :  { %v254_v17 = vld [vmem:[#allocation4 + $0x560] sm:$0xff]  ;;  %2472 = vmatpush1.bf16.msra.mxu1 %v3800_v19 }
  0x3f   :  { %v3793_v21 = vcombine.high %v250_v16, %v254_v17  ;;  %v114_v22 = vld [vmem:[#allocation4 + $0x100] sm:$0xff]  ;;  %2432 = vmatprep.subr.bf16.mxu0 %v3665_v20  ;;  %v3792_v27 = vcombine.low %v250_v16, %v254_v17 }
  0x40   :  { %v118_v23 = vld [vmem:[#allocation4 + $0x120] sm:$0xff]  ;;  %2433 = vmatpush1.bf16.msra.mxu0 %v3664_v26 }
  0x41   :  { %v242_v24 = vld [vmem:[#allocation4 + $0x500] sm:$0xff]  ;;  %v3657_v28 = vcombine.high %v114_v22, %v118_v23  ;;  %2473 = vmatprep.subr.bf16.mxu1 %v3793_v21  ;;  %v3656_v34 = vcombine.low %v114_v22, %v118_v23 }
  0x42   :  { %v246_v25 = vld [vmem:[#allocation4 + $0x520] sm:$0xff]  ;;  %2474 = vmatpush1.bf16.msra.mxu1 %v3792_v27 }
  0x43   :  { %v3785_v29 = vcombine.high %v242_v24, %v246_v25  ;;  %v106_v30 = vld [vmem:[#allocation4 + $0xc0] sm:$0xff]  ;;  %2434 = vmatprep.subr.bf16.mxu0 %v3657_v28  ;;  %v3784_v35 = vcombine.low %v242_v24, %v246_v25 }
  0x44   :  { %v110_v31 = vld [vmem:[#allocation4 + $0xe0] sm:$0xff]  ;;  %2435 = vmatpush1.bf16.msra.mxu0 %v3656_v34 }
  0x45   :  { %v234_v32 = vld [vmem:[#allocation4 + $0x4c0] sm:$0xff]  ;;  %v3649_v36 = vcombine.high %v106_v30, %v110_v31  ;;  %2475 = vmatprep.subr.bf16.mxu1 %v3785_v29  ;;  %v3648_v42 = vcombine.low %v106_v30, %v110_v31 }
  0x46   :  { %v238_v33 = vld [vmem:[#allocation4 + $0x4e0] sm:$0xff]  ;;  %2476 = vmatpush1.bf16.msra.mxu1 %v3784_v35 }
  0x47   :  { %v3777_v37 = vcombine.high %v234_v32, %v238_v33  ;;  %v98_v38 = vld [vmem:[#allocation4 + $0x80] sm:$0xff]  ;;  %2436 = vmatprep.subr.bf16.mxu0 %v3649_v36  ;;  %v3776_v43 = vcombine.low %v234_v32, %v238_v33 }
  0x48   :  { %v102_v39 = vld [vmem:[#allocation4 + $0xa0] sm:$0xff]  ;;  %2437 = vmatpush1.bf16.msra.mxu0 %v3648_v42 }
  0x49   :  { %v226_v40 = vld [vmem:[#allocation4 + $0x480] sm:$0xff]  ;;  %v3641_v44 = vcombine.high %v98_v38, %v102_v39  ;;  %2477 = vmatprep.subr.bf16.mxu1 %v3777_v37  ;;  %v3640_v50 = vcombine.low %v98_v38, %v102_v39 }
  0x4a   :  { %v230_v41 = vld [vmem:[#allocation4 + $0x4a0] sm:$0xff]  ;;  %2478 = vmatpush1.bf16.msra.mxu1 %v3776_v43 }
  0x4b   :  { %v3769_v45 = vcombine.high %v226_v40, %v230_v41  ;;  %v90_v46 = vld [vmem:[#allocation4 + $0x40] sm:$0xff]  ;;  %2438 = vmatprep.subr.bf16.mxu0 %v3641_v44  ;;  %v3768_v51 = vcombine.low %v226_v40, %v230_v41 }
  0x4c   :  { %v94_v47 = vld [vmem:[#allocation4 + $0x60] sm:$0xff]  ;;  %2439 = vmatpush1.bf16.msra.mxu0 %v3640_v50 }
  0x4d   :  { %v218_v48 = vld [vmem:[#allocation4 + $0x440] sm:$0xff]  ;;  %v3633_v52 = vcombine.high %v90_v46, %v94_v47  ;;  %2479 = vmatprep.subr.bf16.mxu1 %v3769_v45  ;;  %v3632_v62 = vcombine.low %v90_v46, %v94_v47 }
  0x4e   :  { %v222_v49 = vld [vmem:[#allocation4 + $0x460] sm:$0xff]  ;;  %2480 = vmatpush1.bf16.msra.mxu1 %v3768_v51 }
  0x4f   :  { %v3761_v55 = vcombine.high %v218_v48, %v222_v49  ;;  %v82_v56 = vld [vmem:[#allocation4] sm:$0xff]  ;;  %2440 = vmatprep.subr.bf16.mxu0 %v3633_v52  ;;  %v3760_v63 = vcombine.low %v218_v48, %v222_v49 }
  0x50   :  { %v86_v57 = vld [vmem:[#allocation4 + $0x20] sm:$0xff]  ;;  %2441 = vmatpush1.bf16.msra.mxu0 %v3632_v62 }
  0x51   :  { %v210_v60 = vld [vmem:[#allocation4 + $0x400] sm:$0xff]  ;;  %v3625_v0 = vcombine.high %v82_v56, %v86_v57  ;;  %2481 = vmatprep.subr.bf16.mxu1 %v3761_v55  ;;  %v3624_v6 = vcombine.low %v82_v56, %v86_v57 }
  0x52   :  { %v214_v61 = vld [vmem:[#allocation4 + $0x420] sm:$0xff]  ;;  %2482 = vmatpush1.bf16.msra.mxu1 %v3760_v63 }
  0x53   :  { %v3753_v1 = vcombine.high %v210_v60, %v214_v61  ;;  %v202_v2 = vld [vmem:[#allocation4 + $0x3c0] sm:$0xff]  ;;  %2442 = vmatprep.subr.bf16.mxu0 %v3625_v0  ;;  %v3752_v7 = vcombine.low %v210_v60, %v214_v61 }
  0x54   :  { %v206_v3 = vld [vmem:[#allocation4 + $0x3e0] sm:$0xff]  ;;  %2443 = vmatpush1.bf16.msra.mxu0 %v3624_v6  ;;  %v139_v6 = vld [vmem:[#allocation4 + $0x1c8] sm:$0xff] }
  0x55   :  { %v330_v4 = vld [vmem:[#allocation4 + $0x7c0] sm:$0xff]  ;;  %v3745_v8 = vcombine.high %v202_v2, %v206_v3  ;;  %2483 = vmatprep.subr.bf16.mxu1 %v3753_v1  ;;  %v3744_v14 = vcombine.low %v202_v2, %v206_v3 }
  0x56   :  { %v334_v5 = vld [vmem:[#allocation4 + $0x7e0] sm:$0xff]  ;;  %2484 = vmatpush1.bf16.msra.mxu1 %v3752_v7  ;;  %v143_v7 = vld [vmem:[#allocation4 + $0x1e8] sm:$0xff] }
  0x57   :  { %v3873_v9 = vcombine.high %v330_v4, %v334_v5  ;;  %v194_v10 = vld [vmem:[#allocation4 + $0x380] sm:$0xff]  ;;  %2444 = vmatprep.subr.bf16.mxu0 %v3745_v8  ;;  %v3872_v15 = vcombine.low %v330_v4, %v334_v5 }
  0x58   :  { %v198_v11 = vld [vmem:[#allocation4 + $0x3a0] sm:$0xff]  ;;  %2445 = vmatpush2.bf16.msra.mxu0 %v3744_v14 }
  0x59   :  { %v322_v12 = vld [vmem:[#allocation4 + $0x780] sm:$0xff]  ;;  %v3737_v16 = vcombine.high %v194_v10, %v198_v11  ;;  %2485 = vmatprep.subr.bf16.mxu1 %v3873_v9  ;;  %v3736_v22 = vcombine.low %v194_v10, %v198_v11  ;;  %v70_v9 = vld [vmem:[#allocation2] sm:$0xff] }
  0x5a   :  { %v326_v13 = vld [vmem:[#allocation4 + $0x7a0] sm:$0xff]  ;;  %2486 = vmatpush2.bf16.msra.mxu1 %v3872_v15 }
  0x5b   :  { %v3865_v17 = vcombine.high %v322_v12, %v326_v13  ;;  %v186_v18 = vld [vmem:[#allocation4 + $0x340] sm:$0xff]  ;;  %2446 = vmatprep.subr.bf16.mxu0 %v3737_v16  ;;  %v3864_v23 = vcombine.low %v322_v12, %v326_v13  ;;  %v3683_v13 = vcombine.high %v139_v6, %v143_v7  ;;  %v4372_v16 = vpack.c.bf16 %v70_v9, %v70_v9 }
  0x5c   :  { %v190_v19 = vld [vmem:[#allocation4 + $0x360] sm:$0xff]  ;;  %2447 = vmatpush2.bf16.msra.mxu0 %v3736_v22  ;;  %v3682_v22 = vcombine.low %v139_v6, %v143_v7  ;;  %v87_v7 = vld [vmem:[#allocation4 + $0x28] sm:$0xff] }
  0x5d   :  { %v314_v20 = vld [vmem:[#allocation4 + $0x740] sm:$0xff]  ;;  %v3729_v24 = vcombine.high %v186_v18, %v190_v19  ;;  %2487 = vmatprep.subr.bf16.mxu1 %v3865_v17  ;;  %v3728_v30 = vcombine.low %v186_v18, %v190_v19  ;;  %v131_v17 = vld [vmem:[#allocation4 + $0x188] sm:$0xff]  ;;  %v75_v19 = vld [vmem:[#allocation2 + $0x28] sm:$0xff] }
  0x5e   :  { %v318_v21 = vld [vmem:[#allocation4 + $0x760] sm:$0xff]  ;;  %2488 = vmatpush2.bf16.msra.mxu1 %v3864_v23  ;;  %v135_v18 = vld [vmem:[#allocation4 + $0x1a8] sm:$0xff] }
  0x5f   :  { %v3857_v25 = vcombine.high %v314_v20, %v318_v21  ;;  %v178_v26 = vld [vmem:[#allocation4 + $0x300] sm:$0xff]  ;;  %2448 = vmatprep.subr.bf16.mxu0 %v3729_v24  ;;  %v3856_v31 = vcombine.low %v314_v20, %v318_v21  ;;  %v3675_v24 = vcombine.high %v131_v17, %v135_v18 }
  0x60   :  { %v182_v27 = vld [vmem:[#allocation4 + $0x320] sm:$0xff]  ;;  %2449 = vmatpush2.bf16.msra.mxu0 %v3728_v30 }
  0x61   :  { %v306_v28 = vld [vmem:[#allocation4 + $0x700] sm:$0xff]  ;;  %v3721_v32 = vcombine.high %v178_v26, %v182_v27  ;;  %2489 = vmatprep.subr.bf16.mxu1 %v3857_v25  ;;  %v3720_v38 = vcombine.low %v178_v26, %v182_v27  ;;  %v123_v27 = vld [vmem:[#allocation4 + $0x148] sm:$0xff] }
  0x62   :  { %v310_v29 = vld [vmem:[#allocation4 + $0x720] sm:$0xff]  ;;  %2490 = vmatpush2.bf16.msra.mxu1 %v3856_v31  ;;  %v3674_v31 = vcombine.low %v131_v17, %v135_v18 }
  0x63   :  { %v3849_v33 = vcombine.high %v306_v28, %v310_v29  ;;  %v170_v34 = vld [vmem:[#allocation4 + $0x2c0] sm:$0xff]  ;;  %2450 = vmatprep.subr.bf16.mxu0 %v3721_v32  ;;  %v3848_v39 = vcombine.low %v306_v28, %v310_v29  ;;  %v4376_v28 = vpack.c.bf16 %v75_v19, %v75_v19  ;;  %v127_v29 = vld [vmem:[#allocation4 + $0x168] sm:$0xff] }
  0x64   :  { %v174_v35 = vld [vmem:[#allocation4 + $0x2e0] sm:$0xff]  ;;  %2451 = vmatpush2.bf16.msra.mxu0 %v3720_v38 }
  0x65   :  { %v298_v36 = vld [vmem:[#allocation4 + $0x6c0] sm:$0xff]  ;;  %v3713_v40 = vcombine.high %v170_v34, %v174_v35  ;;  %2491 = vmatprep.subr.bf16.mxu1 %v3849_v33  ;;  %v3712_v46 = vcombine.low %v170_v34, %v174_v35  ;;  %v115_v35 = vld [vmem:[#allocation4 + $0x108] sm:$0xff] }
  0x66   :  { %v302_v37 = vld [vmem:[#allocation4 + $0x6e0] sm:$0xff]  ;;  %2492 = vmatpush2.bf16.msra.mxu1 %v3848_v39  ;;  %v3666_v39 = vcombine.low %v123_v27, %v127_v29 }
  0x67   :  { %v3841_v41 = vcombine.high %v298_v36, %v302_v37  ;;  %v162_v42 = vld [vmem:[#allocation4 + $0x280] sm:$0xff]  ;;  %2452 = vmatprep.subr.bf16.mxu0 %v3713_v40  ;;  %v3840_v47 = vcombine.low %v298_v36, %v302_v37  ;;  %v3667_v36 = vcombine.high %v123_v27, %v127_v29  ;;  %v119_v37 = vld [vmem:[#allocation4 + $0x128] sm:$0xff] }
  0x68   :  { %v166_v43 = vld [vmem:[#allocation4 + $0x2a0] sm:$0xff]  ;;  %2453 = vmatpush2.bf16.msra.mxu0 %v3712_v46 }
  0x69   :  { %v290_v44 = vld [vmem:[#allocation4 + $0x680] sm:$0xff]  ;;  %v3705_v48 = vcombine.high %v162_v42, %v166_v43  ;;  %2493 = vmatprep.subr.bf16.mxu1 %v3841_v41  ;;  %v3704_v54 = vcombine.low %v162_v42, %v166_v43  ;;  %v107_v43 = vld [vmem:[#allocation4 + $0xc8] sm:$0xff] }
  0x6a   :  { %v294_v45 = vld [vmem:[#allocation4 + $0x6a0] sm:$0xff]  ;;  %2494 = vmatpush2.bf16.msra.mxu1 %v3840_v47  ;;  %v3658_v47 = vcombine.low %v115_v35, %v119_v37 }
  0x6b   :  { %v3833_v49 = vcombine.high %v290_v44, %v294_v45  ;;  %v154_v50 = vld [vmem:[#allocation4 + $0x240] sm:$0xff]  ;;  %2454 = vmatprep.subr.bf16.mxu0 %v3705_v48  ;;  %v3832_v55 = vcombine.low %v290_v44, %v294_v45  ;;  %v3659_v44 = vcombine.high %v115_v35, %v119_v37  ;;  %v111_v45 = vld [vmem:[#allocation4 + $0xe8] sm:$0xff] }
  0x6c   :  { %v158_v51 = vld [vmem:[#allocation4 + $0x260] sm:$0xff]  ;;  %2455 = vmatpush2.bf16.msra.mxu0 %v3704_v54 }
  0x6d   :  { %v282_v52 = vld [vmem:[#allocation4 + $0x640] sm:$0xff]  ;;  %v3697_v56 = vcombine.high %v154_v50, %v158_v51  ;;  %2495 = vmatprep.subr.bf16.mxu1 %v3833_v49  ;;  %v3696_v0 = vcombine.low %v154_v50, %v158_v51  ;;  %v99_v51 = vld [vmem:[#allocation4 + $0x88] sm:$0xff] }
  0x6e   :  { %v286_v53 = vld [vmem:[#allocation4 + $0x660] sm:$0xff]  ;;  %2496 = vmatpush2.bf16.msra.mxu1 %v3832_v55  ;;  %v3650_v55 = vcombine.low %v107_v43, %v111_v45 }
  0x6f   :  { %v3825_v57 = vcombine.high %v282_v52, %v286_v53  ;;  %v146_v60 = vld [vmem:[#allocation4 + $0x200] sm:$0xff]  ;;  %2456 = vmatprep.subr.bf16.mxu0 %v3697_v56  ;;  %v3824_v1 = vcombine.low %v282_v52, %v286_v53  ;;  %v3651_v52 = vcombine.high %v107_v43, %v111_v45  ;;  %v103_v53 = vld [vmem:[#allocation4 + $0xa8] sm:$0xff] }
  0x70   :  { %v150_v61 = vld [vmem:[#allocation4 + $0x220] sm:$0xff]  ;;  %2457 = vmatpush2.bf16.msra.mxu0 %v3696_v0 }
  0x71   :  { %v274_v62 = vld [vmem:[#allocation4 + $0x600] sm:$0xff]  ;;  %v3689_v2 = vcombine.high %v146_v60, %v150_v61  ;;  %2497 = vmatprep.subr.bf16.mxu1 %v3825_v57  ;;  %v3688_v8 = vcombine.low %v146_v60, %v150_v61  ;;  %v91_v61 = vld [vmem:[#allocation4 + $0x48] sm:$0xff] }
  0x72   :  { %v278_v63 = vld [vmem:[#allocation4 + $0x620] sm:$0xff]  ;;  %2498 = vmatpush2.bf16.msra.mxu1 %v3824_v1  ;;  %v3642_v1 = vcombine.low %v99_v51, %v103_v53 }
  0x73   :  { %v3817_v3 = vcombine.high %v274_v62, %v278_v63  ;;  %v394_v4 = vld [vmem:[#allocation4 + $0x9c0] sm:$0xff]  ;;  %2458 = vmatprep.subr.bf16.mxu0 %v3689_v2  ;;  %v3816_v10 = vcombine.low %v274_v62, %v278_v63  ;;  %v3643_v62 = vcombine.high %v99_v51, %v103_v53  ;;  %v95_v63 = vld [vmem:[#allocation4 + $0x68] sm:$0xff] }
  0x74   :  { %v398_v5 = vld [vmem:[#allocation4 + $0x9e0] sm:$0xff]  ;;  %2459 = vmatpush2.bf16.msra.mxu0 %v3688_v8  ;;  %v3635_v6 = vcombine.high %v91_v61, %v95_v63  ;;  %v3634_v9 = vcombine.low %v91_v61, %v95_v63 }
  0x75   :  { %v72_v11 = vld [vmem:[#allocation2 + $0x10] sm:$0xff]  ;;  %v3937_v12 = vcombine.high %v394_v4, %v398_v5  ;;  %2499 = vmatprep.subr.bf16.mxu1 %v3817_v3  ;;  %v3936_v21 = vcombine.low %v394_v4, %v398_v5  ;;  %v83_v5 = vld [vmem:[#allocation4 + $0x8] sm:$0xff] }
  0x76   :  { %v386_v14 = vld [vmem:[#allocation4 + $0x980] sm:$0xff]  ;;  %v4374_v20 = vpack.c.bf16 %v72_v11, %v72_v11  ;;  %2500 = vmatpush2.bf16.msra.mxu1 %v3816_v10  ;;  %v3626_v18 = vcombine.low %v83_v5, %v87_v7 }
  0x77   :  { %v390_v15 = vld [vmem:[#allocation4 + $0x9a0] sm:$0xff]  ;;  %2510 = vmatprep.subr.bf16.mxu0 %v3937_v12  ;;  %2551 = vmatprep.subr.bf16.mxu1 %v3683_v13  ;;  %v203_v13 = vld [vmem:[#allocation4 + $0x3c8] sm:$0xff] }
  0x78   :  { %v3929_v23 = vcombine.high %v386_v14, %v390_v15  ;;  %v378_v25 = vld [vmem:[#allocation4 + $0x940] sm:$0xff]  ;;  %2461 = vmatmul.mubr.bf16.vlgmr.msra.gmra.mxu0 %v4372_v16  ;;  %v3928_v30 = vcombine.low %v386_v14, %v390_v15  ;;  %v3627_v14 = vcombine.high %v83_v5, %v87_v7  ;;  %v207_v15 = vld [vmem:[#allocation4 + $0x3e8] sm:$0xff] }
  0x79   :  { %v382_v26 = vld [vmem:[#allocation4 + $0x960] sm:$0xff]  ;;  %2502 = vmatmul.mubr.bf16.vlgmr.msra.gmra.mxu1 %v4374_v20  ;;  %2511 = vmatpush1.bf16.msra.mxu0 %v3936_v21  ;;  %v3746_v27 = vcombine.low %v203_v13, %v207_v15 }
  0x7a   :  { %2552 = vmatpush1.bf16.msra.mxu1 %v3682_v22  ;;  %2512 = vmatprep.subr.bf16.mxu0 %v3929_v23  ;;  %v3921_v32 = vcombine.high %v378_v25, %v382_v26  ;;  %v370_v33 = vld [vmem:[#allocation4 + $0x900] sm:$0xff]  ;;  %v3920_v38 = vcombine.low %v378_v25, %v382_v26  ;;  %v195_v23 = vld [vmem:[#allocation4 + $0x388] sm:$0xff] }
  0x7b   :  { %v374_v34 = vld [vmem:[#allocation4 + $0x920] sm:$0xff]  ;;  %2553 = vmatprep.subr.bf16.mxu1 %v3675_v24  ;;  %2542 = vmatprep.mubr.bf16.mxu0 %v4376_v28  ;;  %v3747_v24 = vcombine.high %v203_v13, %v207_v15  ;;  %v199_v25 = vld [vmem:[#allocation4 + $0x3a8] sm:$0xff] }
  0x7c   :  { %2583 = vmatprep.mubr.bf16.mxu1 %v4366_v58  ;;  %v3913_v40 = vcombine.high %v370_v33, %v374_v34  ;;  %v362_v41 = vld [vmem:[#allocation4 + $0x8c0] sm:$0xff]  ;;  %v3912_v46 = vcombine.low %v370_v33, %v374_v34  ;;  %v3739_v33 = vcombine.high %v195_v23, %v199_v25  ;;  %v191_v34 = vld [vmem:[#allocation4 + $0x368] sm:$0xff] }
  0x7d   :  { %2513 = vmatpush1.bf16.msra.mxu0 %v3928_v30  ;;  %v366_v42 = vld [vmem:[#allocation4 + $0x8e0] sm:$0xff] }
  0x7e   :  { %2554 = vmatpush1.bf16.msra.mxu1 %v3674_v31  ;;  %2514 = vmatprep.subr.bf16.mxu0 %v3921_v32  ;;  %v3905_v48 = vcombine.high %v362_v41, %v366_v42  ;;  %v354_v49 = vld [vmem:[#allocation4 + $0x880] sm:$0xff]  ;;  %v3904_v54 = vcombine.low %v362_v41, %v366_v42  ;;  %v187_v32 = vld [vmem:[#allocation4 + $0x348] sm:$0xff] }
  0x7f   :  { %2555 = vmatprep.subr.bf16.mxu1 %v3667_v36  ;;  %v358_v50 = vld [vmem:[#allocation4 + $0x8a0] sm:$0xff]  ;;  %v3738_v36 = vcombine.low %v195_v23, %v199_v25  ;;  %v3731_v41 = vcombine.high %v187_v32, %v191_v34  ;;  %v183_v42 = vld [vmem:[#allocation4 + $0x328] sm:$0xff] }
  0x80   :  { %v3897_v56 = vcombine.high %v354_v49, %v358_v50  ;;  %v346_v57 = vld [vmem:[#allocation4 + $0x840] sm:$0xff]  ;;  %v3896_v0 = vcombine.low %v354_v49, %v358_v50  ;;  %v175_v50 = vld [vmem:[#allocation4 + $0x2e8] sm:$0xff] }
  0x81   :  { %2515 = vmatpush1.bf16.msra.mxu0 %v3920_v38  ;;  %v350_v60 = vld [vmem:[#allocation4 + $0x860] sm:$0xff]  ;;  %v399_v23 = vld [vmem:[#allocation4 + $0x9e8] sm:$0xff] }
  0x82   :  { %2556 = vmatpush1.bf16.msra.mxu1 %v3666_v39  ;;  %2516 = vmatprep.subr.bf16.mxu0 %v3913_v40  ;;  %v3889_v2 = vcombine.high %v346_v57, %v350_v60  ;;  %v338_v3 = vld [vmem:[#allocation4 + $0x800] sm:$0xff]  ;;  %v3888_v8 = vcombine.low %v346_v57, %v350_v60  ;;  %v179_v40 = vld [vmem:[#allocation4 + $0x308] sm:$0xff] }
  0x83   :  { %2557 = vmatprep.subr.bf16.mxu1 %v3659_v44  ;;  %v342_v4 = vld [vmem:[#allocation4 + $0x820] sm:$0xff]  ;;  %v3730_v44 = vcombine.low %v187_v32, %v191_v34  ;;  %v3723_v49 = vcombine.high %v179_v40, %v183_v42  ;;  %v167_v60 = vld [vmem:[#allocation4 + $0x2a8] sm:$0xff] }
  0x84   :  { %v3881_v10 = vcombine.high %v338_v3, %v342_v4  ;;  %v458_v11 = vld [vmem:[#allocation4 + $0xbc0] sm:$0xff]  ;;  %v3880_v17 = vcombine.low %v338_v3, %v342_v4  ;;  %v159_v4 = vld [vmem:[#allocation4 + $0x268] sm:$0xff] }
  0x85   :  { %2517 = vmatpush1.bf16.msra.mxu0 %v3912_v46  ;;  %v462_v12 = vld [vmem:[#allocation4 + $0xbe0] sm:$0xff]  ;;  %v391_v32 = vld [vmem:[#allocation4 + $0x9a8] sm:$0xff] }
  0x86   :  { %2558 = vmatpush1.bf16.msra.mxu1 %v3658_v47  ;;  %2518 = vmatprep.subr.bf16.mxu0 %v3905_v48  ;;  %v4001_v19 = vcombine.high %v458_v11, %v462_v12  ;;  %v450_v21 = vld [vmem:[#allocation4 + $0xb80] sm:$0xff]  ;;  %v4000_v26 = vcombine.low %v458_v11, %v462_v12  ;;  %v171_v48 = vld [vmem:[#allocation4 + $0x2c8] sm:$0xff] }
  0x87   :  { %2559 = vmatprep.subr.bf16.mxu1 %v3651_v52  ;;  %v454_v22 = vld [vmem:[#allocation4 + $0xba0] sm:$0xff]  ;;  %v3722_v52 = vcombine.low %v179_v40, %v183_v42  ;;  %v3715_v57 = vcombine.high %v171_v48, %v175_v50  ;;  %v151_v12 = vld [vmem:[#allocation4 + $0x228] sm:$0xff] }
  0x88   :  { %v3993_v29 = vcombine.high %v450_v21, %v454_v22  ;;  %v442_v30 = vld [vmem:[#allocation4 + $0xb40] sm:$0xff]  ;;  %v3992_v35 = vcombine.low %v450_v21, %v454_v22  ;;  %v74_v22 = vld [vmem:[#allocation2 + $0x20] sm:$0xff]  ;;  %v379_v40 = vld [vmem:[#allocation4 + $0x948] sm:$0xff] }
  0x89   :  { %2519 = vmatpush1.bf16.msra.mxu0 %v3904_v54  ;;  %v446_v31 = vld [vmem:[#allocation4 + $0xb60] sm:$0xff] }
  0x8a   :  { %2560 = vmatpush1.bf16.msra.mxu1 %v3650_v55  ;;  %2520 = vmatprep.subr.bf16.mxu0 %v3897_v56  ;;  %v3985_v37 = vcombine.high %v442_v30, %v446_v31  ;;  %v434_v38 = vld [vmem:[#allocation4 + $0xb00] sm:$0xff]  ;;  %v3984_v43 = vcombine.low %v442_v30, %v446_v31  ;;  %v163_v56 = vld [vmem:[#allocation4 + $0x288] sm:$0xff] }
  0x8b   :  { %2561 = vmatprep.subr.bf16.mxu1 %v3643_v62  ;;  %v438_v39 = vld [vmem:[#allocation4 + $0xb20] sm:$0xff]  ;;  %v3714_v62 = vcombine.low %v171_v48, %v175_v50  ;;  %v3707_v3 = vcombine.high %v163_v56, %v167_v60  ;;  %v387_v30 = vld [vmem:[#allocation4 + $0x988] sm:$0xff] }
  0x8c   :  { %v3977_v45 = vcombine.high %v434_v38, %v438_v39  ;;  %v426_v46 = vld [vmem:[#allocation4 + $0xac0] sm:$0xff]  ;;  %v3976_v51 = vcombine.low %v434_v38, %v438_v39  ;;  %v3931_v38 = vcombine.high %v387_v30, %v391_v32  ;;  %v255_v39 = vld [vmem:[#allocation4 + $0x568] sm:$0xff] }
  0x8d   :  { %2521 = vmatpush1.bf16.msra.mxu0 %v3896_v0  ;;  %v430_v47 = vld [vmem:[#allocation4 + $0xae0] sm:$0xff]  ;;  %v371_v48 = vld [vmem:[#allocation4 + $0x908] sm:$0xff] }
  0x8e   :  { %2562 = vmatpush1.bf16.msra.mxu1 %v3642_v1  ;;  %2522 = vmatprep.subr.bf16.mxu0 %v3889_v2  ;;  %v3969_v53 = vcombine.high %v426_v46, %v430_v47  ;;  %v418_v54 = vld [vmem:[#allocation4 + $0xa80] sm:$0xff]  ;;  %v3968_v61 = vcombine.low %v426_v46, %v430_v47  ;;  %v155_v2 = vld [vmem:[#allocation4 + $0x248] sm:$0xff] }
  0x8f   :  { %2563 = vmatprep.subr.bf16.mxu1 %v3635_v6  ;;  %v422_v55 = vld [vmem:[#allocation4 + $0xaa0] sm:$0xff]  ;;  %v3706_v6 = vcombine.low %v163_v56, %v167_v60  ;;  %v3699_v11 = vcombine.high %v155_v2, %v159_v4  ;;  %v243_v46 = vld [vmem:[#allocation4 + $0x508] sm:$0xff] }
  0x90   :  { %v3961_v63 = vcombine.high %v418_v54, %v422_v55  ;;  %v410_v0 = vld [vmem:[#allocation4 + $0xa40] sm:$0xff]  ;;  %v3960_v5 = vcombine.low %v418_v54, %v422_v55  ;;  %v247_v47 = vld [vmem:[#allocation4 + $0x528] sm:$0xff] }
  0x91   :  { %2523 = vmatpush1.bf16.msra.mxu0 %v3888_v8  ;;  %v414_v1 = vld [vmem:[#allocation4 + $0xa60] sm:$0xff]  ;;  %v235_v54 = vld [vmem:[#allocation4 + $0x4c8] sm:$0xff]  ;;  %v3786_v60 = vcombine.low %v243_v46, %v247_v47 }
  0x92   :  { %2564 = vmatpush1.bf16.msra.mxu1 %v3634_v9  ;;  %2524 = vmatprep.subr.bf16.mxu0 %v3881_v10  ;;  %v3953_v7 = vcombine.high %v410_v0, %v414_v1  ;;  %v402_v8 = vld [vmem:[#allocation4 + $0xa00] sm:$0xff]  ;;  %v147_v10 = vld [vmem:[#allocation4 + $0x208] sm:$0xff]  ;;  %v3952_v13 = vcombine.low %v410_v0, %v414_v1 }
  0x93   :  { %2565 = vmatprep.subr.bf16.mxu1 %v3627_v14  ;;  %v406_v9 = vld [vmem:[#allocation4 + $0xa20] sm:$0xff]  ;;  %v3698_v14 = vcombine.low %v155_v2, %v159_v4  ;;  %v3691_v21 = vcombine.high %v147_v10, %v151_v12  ;;  %v3690_v25 = vcombine.low %v147_v10, %v151_v12  ;;  %v239_v55 = vld [vmem:[#allocation4 + $0x4e8] sm:$0xff] }
  0x94   :  { %v3945_v15 = vcombine.high %v402_v8, %v406_v9  ;;  %v363_v56 = vld [vmem:[#allocation4 + $0x8c8] sm:$0xff]  ;;  %v3778_v4 = vcombine.low %v235_v54, %v239_v55 }
  0x95   :  { %2525 = vmatpush1.bf16.msra.mxu0 %v3880_v17  ;;  %v267_v17 = vld [vmem:[#allocation4 + $0x5c8] sm:$0xff] }
  0x96   :  { %2566 = vmatpush1.bf16.msra.mxu1 %v3626_v18  ;;  %2526 = vmatprep.subr.bf16.mxu0 %v4001_v19  ;;  %v271_v18 = vld [vmem:[#allocation4 + $0x5e8] sm:$0xff] }
  0x97   :  { %2567 = vmatprep.subr.bf16.mxu1 %v3747_v24  ;;  %v395_v19 = vld [vmem:[#allocation4 + $0x9c8] sm:$0xff]  ;;  %v3944_v24 = vcombine.low %v402_v8, %v406_v9  ;;  %v3810_v34 = vcombine.low %v267_v17, %v271_v18 }
  0x98   :  { %v3939_v31 = vcombine.high %v395_v19, %v399_v23  ;;  %v227_v0 = vld [vmem:[#allocation4 + $0x488] sm:$0xff] }
  0x99   :  { %2527 = vmatpush2.bf16.msra.mxu0 %v4000_v26  ;;  %v3811_v26 = vcombine.high %v267_v17, %v271_v18  ;;  %v231_v1 = vld [vmem:[#allocation4 + $0x4a8] sm:$0xff] }
  0x9a   :  { %2568 = vmatpush2.bf16.msra.mxu1 %v3746_v27  ;;  %2528 = vmatprep.subr.bf16.mxu0 %v3993_v29  ;;  %v259_v27 = vld [vmem:[#allocation4 + $0x588] sm:$0xff]  ;;  %v3770_v12 = vcombine.low %v227_v0, %v231_v1 }
  0x9b   :  { %2569 = vmatprep.subr.bf16.mxu1 %v3739_v33  ;;  %v263_v29 = vld [vmem:[#allocation4 + $0x5a8] sm:$0xff]  ;;  %v4382_v33 = vpack.c.bf16 %v74_v22, %v74_v22 }
  0x9c   :  { %v3802_v42 = vcombine.low %v259_v27, %v263_v29  ;;  %v355_v2 = vld [vmem:[#allocation4 + $0x888] sm:$0xff] }
  0x9d   :  { %2529 = vmatpush2.bf16.msra.mxu0 %v3992_v35  ;;  %v3938_v35 = vcombine.low %v395_v19, %v399_v23  ;;  %v219_v8 = vld [vmem:[#allocation4 + $0x448] sm:$0xff] }
  0x9e   :  { %2570 = vmatpush2.bf16.msra.mxu1 %v3738_v36  ;;  %2530 = vmatprep.subr.bf16.mxu0 %v3985_v37  ;;  %v3803_v36 = vcombine.high %v259_v27, %v263_v29  ;;  %v251_v37 = vld [vmem:[#allocation4 + $0x548] sm:$0xff] }
  0x9f   :  { %2571 = vmatprep.subr.bf16.mxu1 %v3731_v41  ;;  %v383_v41 = vld [vmem:[#allocation4 + $0x968] sm:$0xff]  ;;  %v3794_v50 = vcombine.low %v251_v37, %v255_v39 }
  0xa0   :  { %v223_v9 = vld [vmem:[#allocation4 + $0x468] sm:$0xff] }
  0xa1   :  { %2531 = vmatpush2.bf16.msra.mxu0 %v3984_v43  ;;  %v3930_v43 = vcombine.low %v387_v30, %v391_v32  ;;  %v347_v10 = vld [vmem:[#allocation4 + $0x848] sm:$0xff]  ;;  %v3762_v22 = vcombine.low %v219_v8, %v223_v9 }
  0xa2   :  { %2572 = vmatpush2.bf16.msra.mxu1 %v3730_v44  ;;  %2532 = vmatprep.subr.bf16.mxu0 %v3977_v45  ;;  %v3795_v44 = vcombine.high %v251_v37, %v255_v39  ;;  %v3923_v45 = vcombine.high %v379_v40, %v383_v41  ;;  %v211_v17 = vld [vmem:[#allocation4 + $0x408] sm:$0xff] }
  0xa3   :  { %2573 = vmatprep.subr.bf16.mxu1 %v3723_v49  ;;  %v375_v49 = vld [vmem:[#allocation4 + $0x928] sm:$0xff] }
  0xa4   :  { %v215_v18 = vld [vmem:[#allocation4 + $0x428] sm:$0xff] }
  0xa5   :  { %2533 = vmatpush2.bf16.msra.mxu0 %v3976_v51  ;;  %v3922_v51 = vcombine.low %v379_v40, %v383_v41  ;;  %v339_v19 = vld [vmem:[#allocation4 + $0x808] sm:$0xff] }
  0xa6   :  { %2574 = vmatpush2.bf16.msra.mxu1 %v3722_v52  ;;  %2534 = vmatprep.subr.bf16.mxu0 %v3969_v53  ;;  %v3787_v52 = vcombine.high %v243_v46, %v247_v47  ;;  %v3915_v53 = vcombine.high %v371_v48, %v375_v49  ;;  %v335_v27 = vld [vmem:[#allocation4 + $0x7e8] sm:$0xff] }
  0xa7   :  { %2575 = vmatprep.subr.bf16.mxu1 %v3715_v57  ;;  %v367_v57 = vld [vmem:[#allocation4 + $0x8e8] sm:$0xff] }
  0xa8   :  { %v459_v29 = vld [vmem:[#allocation4 + $0xbc8] sm:$0xff] }
  0xa9   :  { %2535 = vmatpush2.bf16.msra.mxu0 %v3968_v61  ;;  %v3914_v61 = vcombine.low %v371_v48, %v375_v49  ;;  %v463_v30 = vld [vmem:[#allocation4 + $0xbe8] sm:$0xff] }
  0xaa   :  { %2576 = vmatpush2.bf16.msra.mxu1 %v3714_v62  ;;  %2536 = vmatprep.subr.bf16.mxu0 %v3961_v63  ;;  %v3779_v62 = vcombine.high %v235_v54, %v239_v55  ;;  %v3907_v63 = vcombine.high %v363_v56, %v367_v57  ;;  %v327_v37 = vld [vmem:[#allocation4 + $0x7a8] sm:$0xff]  ;;  %v4002_v41 = vcombine.low %v459_v29, %v463_v30 }
  0xab   :  { %2577 = vmatprep.subr.bf16.mxu1 %v3707_v3  ;;  %v359_v3 = vld [vmem:[#allocation4 + $0x8a8] sm:$0xff] }
  0xac   :  { %v455_v39 = vld [vmem:[#allocation4 + $0xba8] sm:$0xff] }
  0xad   :  { %2537 = vmatpush2.bf16.msra.mxu0 %v3960_v5  ;;  %v3906_v5 = vcombine.low %v363_v56, %v367_v57  ;;  %v443_v46 = vld [vmem:[#allocation4 + $0xb48] sm:$0xff] }
  0xae   :  { %2578 = vmatpush2.bf16.msra.mxu1 %v3706_v6  ;;  %2538 = vmatprep.subr.bf16.mxu0 %v3953_v7  ;;  %v3771_v6 = vcombine.high %v227_v0, %v231_v1  ;;  %v3899_v7 = vcombine.high %v355_v2, %v359_v3  ;;  %v447_v47 = vld [vmem:[#allocation4 + $0xb68] sm:$0xff] }
  0xaf   :  { %2579 = vmatprep.subr.bf16.mxu1 %v3699_v11  ;;  %v351_v11 = vld [vmem:[#allocation4 + $0x868] sm:$0xff]  ;;  %v3986_v57 = vcombine.low %v443_v46, %v447_v47 }
  0xb0   :  { %v3890_v23 = vcombine.low %v347_v10, %v351_v11  ;;  %v435_v54 = vld [vmem:[#allocation4 + $0xb08] sm:$0xff] }
  0xb1   :  { %2539 = vmatpush2.bf16.msra.mxu0 %v3952_v13  ;;  %v3898_v13 = vcombine.low %v355_v2, %v359_v3  ;;  %v439_v55 = vld [vmem:[#allocation4 + $0xb28] sm:$0xff] }
  0xb2   :  { %2580 = vmatpush2.bf16.msra.mxu1 %v3698_v14  ;;  %2540 = vmatprep.subr.bf16.mxu0 %v3945_v15  ;;  %v3763_v14 = vcombine.high %v219_v8, %v223_v9  ;;  %v3891_v15 = vcombine.high %v347_v10, %v351_v11  ;;  %v427_v0 = vld [vmem:[#allocation4 + $0xac8] sm:$0xff]  ;;  %v3978_v3 = vcombine.low %v435_v54, %v439_v55 }
  0xb3   :  { %2581 = vmatprep.subr.bf16.mxu1 %v3691_v21  ;;  %v343_v21 = vld [vmem:[#allocation4 + $0x828] sm:$0xff] }
  0xb4   :  { %v3882_v32 = vcombine.low %v339_v19, %v343_v21  ;;  %v431_v1 = vld [vmem:[#allocation4 + $0xae8] sm:$0xff] }
  0xb5   :  { %2541 = vmatpush2.bf16.msra.mxu0 %v3944_v24  ;;  %v3755_v24 = vcombine.high %v211_v17, %v215_v18  ;;  %v419_v8 = vld [vmem:[#allocation4 + $0xa88] sm:$0xff]  ;;  %v3970_v11 = vcombine.low %v427_v0, %v431_v1 }
  0xb6   :  { %2582 = vmatpush2.bf16.msra.mxu1 %v3690_v25  ;;  %2592 = vmatprep.subr.bf16.mxu0 %v3811_v26  ;;  %v3883_v25 = vcombine.high %v339_v19, %v343_v21  ;;  %v331_v26 = vld [vmem:[#allocation4 + $0x7c8] sm:$0xff] }
  0xb7   :  { %2633 = vmatprep.subr.bf16.mxu1 %v3939_v31  ;;  %v3754_v31 = vcombine.low %v211_v17, %v215_v18  ;;  %v3874_v40 = vcombine.low %v331_v26, %v335_v27  ;;  %v423_v9 = vld [vmem:[#allocation4 + $0xaa8] sm:$0xff] }
  0xb8   :  { %2543 = vmatmul.mubr.bf16.vlgmr.msra.gmra.mxu0 %v4382_v33  ;;  %v411_v17 = vld [vmem:[#allocation4 + $0xa48] sm:$0xff]  ;;  %v3962_v21 = vcombine.low %v419_v8, %v423_v9 }
  0xb9   :  { %2584 = vmatmul.mubr.bf16.vlgmr.msra.gmra.mxu1 %v4372_v16  ;;  %2593 = vmatpush1.bf16.msra.mxu0 %v3810_v34  ;;  %v3875_v34 = vcombine.high %v331_v26, %v335_v27  ;;  %v415_v18 = vld [vmem:[#allocation4 + $0xa68] sm:$0xff] }
  0xba   :  { %2634 = vmatpush1.bf16.msra.mxu1 %v3938_v35  ;;  %2594 = vmatprep.subr.bf16.mxu0 %v3803_v36  ;;  %v4003_v35 = vcombine.high %v459_v29, %v463_v30  ;;  %v323_v36 = vld [vmem:[#allocation4 + $0x788] sm:$0xff]  ;;  %v3954_v30 = vcombine.low %v411_v17, %v415_v18 }
  0xbb   :  { %2635 = vmatprep.subr.bf16.mxu1 %v3931_v38  ;;  %2624 = vmatprep.mubr.bf16.mxu0 %v4368_v59  ;;  %v451_v38 = vld [vmem:[#allocation4 + $0xb88] sm:$0xff]  ;;  %v3866_v48 = vcombine.low %v323_v36, %v327_v37 }
  0xbc   :  { %2665 = vmatprep.mubr.bf16.mxu1 %v4376_v28  ;;  %v3994_v49 = vcombine.low %v451_v38, %v455_v39  ;;  %v403_v26 = vld [vmem:[#allocation4 + $0xa08] sm:$0xff] }
  0xbd   :  { %2595 = vmatpush1.bf16.msra.mxu0 %v3802_v42  ;;  %v3867_v42 = vcombine.high %v323_v36, %v327_v37  ;;  %v407_v27 = vld [vmem:[#allocation4 + $0xa28] sm:$0xff]  ;;  %v268_v36 = vld [vmem:[#allocation4 + $0x5d0] sm:$0xff] }
  0xbe   :  { %2636 = vmatpush1.bf16.msra.mxu1 %v3930_v43  ;;  %2596 = vmatprep.subr.bf16.mxu0 %v3795_v44  ;;  %v3995_v43 = vcombine.high %v451_v38, %v455_v39  ;;  %v315_v44 = vld [vmem:[#allocation4 + $0x748] sm:$0xff]  ;;  %v272_v37 = vld [vmem:[#allocation4 + $0x5f0] sm:$0xff]  ;;  %v3946_v39 = vcombine.low %v403_v26, %v407_v27 }
  0xbf   :  { %2637 = vmatprep.subr.bf16.mxu1 %v3923_v45  ;;  %v319_v45 = vld [vmem:[#allocation4 + $0x768] sm:$0xff] }
  0xc0   :  { %v3858_v56 = vcombine.low %v315_v44, %v319_v45 }
  0xc1   :  { %2597 = vmatpush1.bf16.msra.mxu0 %v3794_v50  ;;  %v3859_v50 = vcombine.high %v315_v44, %v319_v45  ;;  %v260_v44 = vld [vmem:[#allocation4 + $0x590] sm:$0xff] }
  0xc2   :  { %2638 = vmatpush1.bf16.msra.mxu1 %v3922_v51  ;;  %2598 = vmatprep.subr.bf16.mxu0 %v3787_v52  ;;  %v3987_v51 = vcombine.high %v443_v46, %v447_v47  ;;  %v307_v52 = vld [vmem:[#allocation4 + $0x708] sm:$0xff]  ;;  %v264_v45 = vld [vmem:[#allocation4 + $0x5b0] sm:$0xff]  ;;  %v3812_v47 = vcombine.low %v268_v36, %v272_v37 }
  0xc3   :  { %2639 = vmatprep.subr.bf16.mxu1 %v3915_v53  ;;  %v311_v53 = vld [vmem:[#allocation4 + $0x728] sm:$0xff] }
  0xc4   :  { %v3850_v2 = vcombine.low %v307_v52, %v311_v53 }
  0xc5   :  { %2599 = vmatpush1.bf16.msra.mxu0 %v3786_v60  ;;  %v3851_v60 = vcombine.high %v307_v52, %v311_v53  ;;  %v252_v52 = vld [vmem:[#allocation4 + $0x550] sm:$0xff] }
  0xc6   :  { %2640 = vmatpush1.bf16.msra.mxu1 %v3914_v61  ;;  %2600 = vmatprep.subr.bf16.mxu0 %v3779_v62  ;;  %v3979_v61 = vcombine.high %v435_v54, %v439_v55  ;;  %v299_v62 = vld [vmem:[#allocation4 + $0x6c8] sm:$0xff]  ;;  %v256_v53 = vld [vmem:[#allocation4 + $0x570] sm:$0xff]  ;;  %v3804_v55 = vcombine.low %v260_v44, %v264_v45 }
  0xc7   :  { %2641 = vmatprep.subr.bf16.mxu1 %v3907_v63  ;;  %v303_v63 = vld [vmem:[#allocation4 + $0x6e8] sm:$0xff] }
  0xc8   :  { %v3842_v10 = vcombine.low %v299_v62, %v303_v63 }
  0xc9   :  { %2601 = vmatpush1.bf16.msra.mxu0 %v3778_v4  ;;  %v3843_v4 = vcombine.high %v299_v62, %v303_v63  ;;  %v244_v62 = vld [vmem:[#allocation4 + $0x510] sm:$0xff] }
  0xca   :  { %2642 = vmatpush1.bf16.msra.mxu1 %v3906_v5  ;;  %2602 = vmatprep.subr.bf16.mxu0 %v3771_v6  ;;  %v3971_v5 = vcombine.high %v427_v0, %v431_v1  ;;  %v291_v6 = vld [vmem:[#allocation4 + $0x688] sm:$0xff]  ;;  %v248_v63 = vld [vmem:[#allocation4 + $0x530] sm:$0xff]  ;;  %v3796_v1 = vcombine.low %v252_v52, %v256_v53 }
  0xcb   :  { %2643 = vmatprep.subr.bf16.mxu1 %v3899_v7  ;;  %v295_v7 = vld [vmem:[#allocation4 + $0x6a8] sm:$0xff] }
  0xcc   :  { %v3834_v19 = vcombine.low %v291_v6, %v295_v7 }
  0xcd   :  { %2603 = vmatpush1.bf16.msra.mxu0 %v3770_v12  ;;  %v3835_v12 = vcombine.high %v291_v6, %v295_v7  ;;  %v236_v6 = vld [vmem:[#allocation4 + $0x4d0] sm:$0xff] }
  0xce   :  { %2644 = vmatpush1.bf16.msra.mxu1 %v3898_v13  ;;  %2604 = vmatprep.subr.bf16.mxu0 %v3763_v14  ;;  %v3963_v13 = vcombine.high %v419_v8, %v423_v9  ;;  %v283_v14 = vld [vmem:[#allocation4 + $0x648] sm:$0xff]  ;;  %v240_v7 = vld [vmem:[#allocation4 + $0x4f0] sm:$0xff]  ;;  %v3788_v9 = vcombine.low %v244_v62, %v248_v63 }
  0xcf   :  { %2645 = vmatprep.subr.bf16.mxu1 %v3891_v15  ;;  %v287_v15 = vld [vmem:[#allocation4 + $0x668] sm:$0xff] }
  0xd0   :  { %v3826_v29 = vcombine.low %v283_v14, %v287_v15 }
  0xd1   :  { %2605 = vmatpush1.bf16.msra.mxu0 %v3762_v22  ;;  %v3827_v22 = vcombine.high %v283_v14, %v287_v15  ;;  %v228_v14 = vld [vmem:[#allocation4 + $0x490] sm:$0xff] }
  0xd2   :  { %2646 = vmatpush1.bf16.msra.mxu1 %v3890_v23  ;;  %2606 = vmatprep.subr.bf16.mxu0 %v3755_v24  ;;  %v3955_v23 = vcombine.high %v411_v17, %v415_v18  ;;  %v275_v24 = vld [vmem:[#allocation4 + $0x608] sm:$0xff]  ;;  %v232_v15 = vld [vmem:[#allocation4 + $0x4b0] sm:$0xff]  ;;  %v3780_v18 = vcombine.low %v236_v6, %v240_v7 }
  0xd3   :  { %2647 = vmatprep.subr.bf16.mxu1 %v3883_v25  ;;  %v279_v25 = vld [vmem:[#allocation4 + $0x628] sm:$0xff] }
  0xd4   :  { %v3818_v38 = vcombine.low %v275_v24, %v279_v25 }
  0xd5   :  { %2607 = vmatpush1.bf16.msra.mxu0 %v3754_v31  ;;  %v3819_v31 = vcombine.high %v275_v24, %v279_v25  ;;  %v220_v24 = vld [vmem:[#allocation4 + $0x450] sm:$0xff] }
  0xd6   :  { %2648 = vmatpush1.bf16.msra.mxu1 %v3882_v32  ;;  %2608 = vmatprep.subr.bf16.mxu0 %v3875_v34  ;;  %v3947_v32 = vcombine.high %v403_v26, %v407_v27  ;;  %v140_v34 = vld [vmem:[#allocation4 + $0x1d0] sm:$0xff]  ;;  %v3772_v27 = vcombine.low %v228_v14, %v232_v15 }
  0xd7   :  { %2649 = vmatprep.subr.bf16.mxu1 %v4003_v35  ;;  %v144_v35 = vld [vmem:[#allocation4 + $0x1f0] sm:$0xff] }
  0xd8   :  { %v3684_v46 = vcombine.low %v140_v34, %v144_v35  ;;  %v224_v25 = vld [vmem:[#allocation4 + $0x470] sm:$0xff] }
  0xd9   :  { %2609 = vmatpush2.bf16.msra.mxu0 %v3874_v40  ;;  %v3685_v40 = vcombine.high %v140_v34, %v144_v35  ;;  %v212_v34 = vld [vmem:[#allocation4 + $0x410] sm:$0xff] }
  0xda   :  { %2650 = vmatpush2.bf16.msra.mxu1 %v4002_v41  ;;  %2610 = vmatprep.subr.bf16.mxu0 %v3867_v42  ;;  %v3813_v41 = vcombine.high %v268_v36, %v272_v37  ;;  %v132_v42 = vld [vmem:[#allocation4 + $0x190] sm:$0xff]  ;;  %v3764_v37 = vcombine.low %v220_v24, %v224_v25 }
  0xdb   :  { %2651 = vmatprep.subr.bf16.mxu1 %v3995_v43  ;;  %v136_v43 = vld [vmem:[#allocation4 + $0x1b0] sm:$0xff] }
  0xdc   :  { %v3676_v54 = vcombine.low %v132_v42, %v136_v43  ;;  %v216_v35 = vld [vmem:[#allocation4 + $0x430] sm:$0xff] }
  0xdd   :  { %2611 = vmatpush2.bf16.msra.mxu0 %v3866_v48  ;;  %v3677_v48 = vcombine.high %v132_v42, %v136_v43  ;;  %v332_v42 = vld [vmem:[#allocation4 + $0x7d0] sm:$0xff] }
  0xde   :  { %2652 = vmatpush2.bf16.msra.mxu1 %v3994_v49  ;;  %2612 = vmatprep.subr.bf16.mxu0 %v3859_v50  ;;  %v3805_v49 = vcombine.high %v260_v44, %v264_v45  ;;  %v124_v50 = vld [vmem:[#allocation4 + $0x150] sm:$0xff]  ;;  %v3756_v45 = vcombine.low %v212_v34, %v216_v35 }
  0xdf   :  { %2653 = vmatprep.subr.bf16.mxu1 %v3987_v51  ;;  %v128_v51 = vld [vmem:[#allocation4 + $0x170] sm:$0xff] }
  0xe0   :  { %v3668_v0 = vcombine.low %v124_v50, %v128_v51  ;;  %v336_v43 = vld [vmem:[#allocation4 + $0x7f0] sm:$0xff] }
  0xe1   :  { %2613 = vmatpush2.bf16.msra.mxu0 %v3858_v56  ;;  %v3669_v56 = vcombine.high %v124_v50, %v128_v51  ;;  %v324_v50 = vld [vmem:[#allocation4 + $0x790] sm:$0xff] }
  0xe2   :  { %2654 = vmatpush2.bf16.msra.mxu1 %v3986_v57  ;;  %2614 = vmatprep.subr.bf16.mxu0 %v3851_v60  ;;  %v3797_v57 = vcombine.high %v252_v52, %v256_v53  ;;  %v116_v60 = vld [vmem:[#allocation4 + $0x110] sm:$0xff]  ;;  %v3876_v53 = vcombine.low %v332_v42, %v336_v43 }
  0xe3   :  { %2655 = vmatprep.subr.bf16.mxu1 %v3979_v61  ;;  %v120_v61 = vld [vmem:[#allocation4 + $0x130] sm:$0xff] }
  0xe4   :  { %v3660_v8 = vcombine.low %v116_v60, %v120_v61  ;;  %v328_v51 = vld [vmem:[#allocation4 + $0x7b0] sm:$0xff] }
  0xe5   :  { %2615 = vmatpush2.bf16.msra.mxu0 %v3850_v2  ;;  %v3661_v2 = vcombine.high %v116_v60, %v120_v61  ;;  %v316_v60 = vld [vmem:[#allocation4 + $0x750] sm:$0xff] }
  0xe6   :  { %2656 = vmatpush2.bf16.msra.mxu1 %v3978_v3  ;;  %2616 = vmatprep.subr.bf16.mxu0 %v3843_v4  ;;  %v3789_v3 = vcombine.high %v244_v62, %v248_v63  ;;  %v108_v4 = vld [vmem:[#allocation4 + $0xd0] sm:$0xff]  ;;  %v3868_v63 = vcombine.low %v324_v50, %v328_v51 }
  0xe7   :  { %2657 = vmatprep.subr.bf16.mxu1 %v3971_v5  ;;  %v112_v5 = vld [vmem:[#allocation4 + $0xf0] sm:$0xff] }
  0xe8   :  { %v3652_v17 = vcombine.low %v108_v4, %v112_v5  ;;  %v320_v61 = vld [vmem:[#allocation4 + $0x770] sm:$0xff] }
  0xe9   :  { %2617 = vmatpush2.bf16.msra.mxu0 %v3842_v10  ;;  %v3653_v10 = vcombine.high %v108_v4, %v112_v5  ;;  %v308_v4 = vld [vmem:[#allocation4 + $0x710] sm:$0xff] }
  0xea   :  { %2658 = vmatpush2.bf16.msra.mxu1 %v3970_v11  ;;  %2618 = vmatprep.subr.bf16.mxu0 %v3835_v12  ;;  %v3781_v11 = vcombine.high %v236_v6, %v240_v7  ;;  %v100_v12 = vld [vmem:[#allocation4 + $0x90] sm:$0xff]  ;;  %v3860_v7 = vcombine.low %v316_v60, %v320_v61 }
  0xeb   :  { %2659 = vmatprep.subr.bf16.mxu1 %v3963_v13  ;;  %v104_v13 = vld [vmem:[#allocation4 + $0xb0] sm:$0xff] }
  0xec   :  { %v3644_v26 = vcombine.low %v100_v12, %v104_v13  ;;  %v312_v5 = vld [vmem:[#allocation4 + $0x730] sm:$0xff] }
  0xed   :  { %2619 = vmatpush2.bf16.msra.mxu0 %v3834_v19  ;;  %v3645_v19 = vcombine.high %v100_v12, %v104_v13  ;;  %v300_v12 = vld [vmem:[#allocation4 + $0x6d0] sm:$0xff] }
  0xee   :  { %2660 = vmatpush2.bf16.msra.mxu1 %v3962_v21  ;;  %2620 = vmatprep.subr.bf16.mxu0 %v3827_v22  ;;  %v3773_v21 = vcombine.high %v228_v14, %v232_v15  ;;  %v92_v22 = vld [vmem:[#allocation4 + $0x50] sm:$0xff]  ;;  %v3852_v15 = vcombine.low %v308_v4, %v312_v5 }
  0xef   :  { %2661 = vmatprep.subr.bf16.mxu1 %v3955_v23  ;;  %v96_v23 = vld [vmem:[#allocation4 + $0x70] sm:$0xff] }
  0xf0   :  { %v3636_v36 = vcombine.low %v92_v22, %v96_v23  ;;  %v304_v13 = vld [vmem:[#allocation4 + $0x6f0] sm:$0xff] }
  0xf1   :  { %2621 = vmatpush2.bf16.msra.mxu0 %v3826_v29  ;;  %v3637_v29 = vcombine.high %v92_v22, %v96_v23  ;;  %v292_v22 = vld [vmem:[#allocation4 + $0x690] sm:$0xff] }
  0xf2   :  { %2662 = vmatpush2.bf16.msra.mxu1 %v3954_v30  ;;  %2622 = vmatprep.subr.bf16.mxu0 %v3819_v31  ;;  %v3765_v30 = vcombine.high %v220_v24, %v224_v25  ;;  %v84_v31 = vld [vmem:[#allocation4 + $0x10] sm:$0xff]  ;;  %v3844_v25 = vcombine.low %v300_v12, %v304_v13 }
  0xf3   :  { %2663 = vmatprep.subr.bf16.mxu1 %v3947_v32  ;;  %v88_v32 = vld [vmem:[#allocation4 + $0x30] sm:$0xff] }
  0xf4   :  { %v3628_v44 = vcombine.low %v84_v31, %v88_v32  ;;  %v296_v23 = vld [vmem:[#allocation4 + $0x6b0] sm:$0xff] }
  0xf5   :  { %2623 = vmatpush2.bf16.msra.mxu0 %v3818_v38  ;;  %v3629_v38 = vcombine.high %v84_v31, %v88_v32  ;;  %v284_v31 = vld [vmem:[#allocation4 + $0x650] sm:$0xff] }
  0xf6   :  { %2664 = vmatpush2.bf16.msra.mxu1 %v3946_v39  ;;  %2674 = vmatprep.subr.bf16.mxu0 %v3685_v40  ;;  %v3757_v39 = vcombine.high %v212_v34, %v216_v35  ;;  %v204_v40 = vld [vmem:[#allocation4 + $0x3d0] sm:$0xff]  ;;  %v468_v35 = vlaneseq }
  0xf7   :  { %2715 = vmatprep.subr.bf16.mxu1 %v3813_v41  ;;  %v208_v41 = vld [vmem:[#allocation4 + $0x3f0] sm:$0xff] }
  0xf8   :  { %2625 = vmatmul.mubr.bf16.vlgmr.msra.gmra.mxu0 %v4374_v20  ;;  %v3748_v52 = vcombine.low %v204_v40, %v208_v41  ;;  %v288_v32 = vld [vmem:[#allocation4 + $0x670] sm:$0xff] }
  0xf9   :  { %2666 = vmatmul.mubr.bf16.vlgmr.msra.gmra.mxu1 %v4382_v33  ;;  %2675 = vmatpush1.bf16.msra.mxu0 %v3684_v46  ;;  %v3749_v46 = vcombine.high %v204_v40, %v208_v41  ;;  %v152_v40 = vld [vmem:[#allocation4 + $0x230] sm:$0xff] }
  0xfa   :  { %2716 = vmatpush1.bf16.msra.mxu1 %v3812_v47  ;;  %2676 = vmatprep.subr.bf16.mxu0 %v3677_v48  ;;  %v3877_v47 = vcombine.high %v332_v42, %v336_v43  ;;  %v196_v48 = vld [vmem:[#allocation4 + $0x390] sm:$0xff] }
  0xfb   :  { %2717 = vmatprep.subr.bf16.mxu1 %v3805_v49  ;;  %2706 = vmatprep.mubr.bf16.mxu0 %v4366_v58  ;;  %v200_v49 = vld [vmem:[#allocation4 + $0x3b0] sm:$0xff] }
  0xfc   :  { %2747 = vmatprep.mubr.bf16.mxu1 %v4368_v59  ;;  %v3740_v62 = vcombine.low %v196_v48, %v200_v49  ;;  %v276_v41 = vld [vmem:[#allocation4 + $0x610] sm:$0xff] }
  0xfd   :  { %2677 = vmatpush1.bf16.msra.mxu0 %v3676_v54  ;;  %v3741_v54 = vcombine.high %v196_v48, %v200_v49  ;;  %v280_v42 = vld [vmem:[#allocation4 + $0x630] sm:$0xff] }
  0xfe   :  { %2718 = vmatpush1.bf16.msra.mxu1 %v3804_v55  ;;  %2678 = vmatprep.subr.bf16.mxu0 %v3669_v56  ;;  %v3869_v55 = vcombine.high %v324_v50, %v328_v51  ;;  %v188_v56 = vld [vmem:[#allocation4 + $0x350] sm:$0xff]  ;;  %v141_v50 = vld [vmem:[#allocation4 + $0x1d8] sm:$0xff] }
  0xff   :  { %2719 = vmatprep.subr.bf16.mxu1 %v3797_v57  ;;  %v192_v57 = vld [vmem:[#allocation4 + $0x370] sm:$0xff]  ;;  %v145_v51 = vld [vmem:[#allocation4 + $0x1f8] sm:$0xff] }
 0x100   :  { %v3732_v6 = vcombine.low %v188_v56, %v192_v57  ;;  %v396_v48 = vld [vmem:[#allocation4 + $0x9d0] sm:$0xff] }
 0x101   :  { %2679 = vmatpush1.bf16.msra.mxu0 %v3668_v0  ;;  %v3733_v0 = vcombine.high %v188_v56, %v192_v57  ;;  %v400_v49 = vld [vmem:[#allocation4 + $0x9f0] sm:$0xff]  ;;  %v3687_v57 = vcombine.high %v141_v50, %v145_v51 }
 0x102   :  { %2720 = vmatpush1.bf16.msra.mxu1 %v3796_v1  ;;  %2680 = vmatprep.subr.bf16.mxu0 %v3661_v2  ;;  %v3861_v1 = vcombine.high %v316_v60, %v320_v61  ;;  %v180_v2 = vld [vmem:[#allocation4 + $0x310] sm:$0xff]  ;;  %v3941_v56 = vcombine.high %v396_v48, %v400_v49 }
 0x103   :  { %2721 = vmatprep.subr.bf16.mxu1 %v3789_v3  ;;  %v184_v3 = vld [vmem:[#allocation4 + $0x330] sm:$0xff] }
 0x104   :  { %v3724_v14 = vcombine.low %v180_v2, %v184_v3  ;;  %v388_v61 = vld [vmem:[#allocation4 + $0x990] sm:$0xff] }
 0x105   :  { %2681 = vmatpush1.bf16.msra.mxu0 %v3660_v8  ;;  %v3725_v8 = vcombine.high %v180_v2, %v184_v3  ;;  %v3940_v2 = vcombine.low %v396_v48, %v400_v49  ;;  %v3686_v3 = vcombine.low %v141_v50, %v145_v51  ;;  %v360_v48 = vld [vmem:[#allocation4 + $0x8b0] sm:$0xff]  ;;  %v101_v49 = vld [vmem:[#allocation4 + $0x98] sm:$0xff] }
 0x106   :  { %2722 = vmatpush1.bf16.msra.mxu1 %v3788_v9  ;;  %2682 = vmatprep.subr.bf16.mxu0 %v3653_v10  ;;  %v3853_v9 = vcombine.high %v308_v4, %v312_v5  ;;  %v172_v10 = vld [vmem:[#allocation4 + $0x2d0] sm:$0xff]  ;;  %v105_v50 = vld [vmem:[#allocation4 + $0xb8] sm:$0xff] }
 0x107   :  { %2723 = vmatprep.subr.bf16.mxu1 %v3781_v11  ;;  %v176_v11 = vld [vmem:[#allocation4 + $0x2f0] sm:$0xff] }
 0x108   :  { %v3716_v24 = vcombine.low %v172_v10, %v176_v11 }
 0x109   :  { %2683 = vmatpush1.bf16.msra.mxu0 %v3652_v17  ;;  %v3717_v17 = vcombine.high %v172_v10, %v176_v11  ;;  %v125_v10 = vld [vmem:[#allocation4 + $0x158] sm:$0xff] }
 0x10a   :  { %2724 = vmatpush1.bf16.msra.mxu1 %v3780_v18  ;;  %2684 = vmatprep.subr.bf16.mxu0 %v3645_v19  ;;  %v3845_v18 = vcombine.high %v300_v12, %v304_v13  ;;  %v164_v19 = vld [vmem:[#allocation4 + $0x290] sm:$0xff]  ;;  %v129_v11 = vld [vmem:[#allocation4 + $0x178] sm:$0xff] }
 0x10b   :  { %2725 = vmatprep.subr.bf16.mxu1 %v3773_v21  ;;  %v168_v21 = vld [vmem:[#allocation4 + $0x2b0] sm:$0xff] }
 0x10c   :  { %v3708_v34 = vcombine.low %v164_v19, %v168_v21 }
 0x10d   :  { %2685 = vmatpush1.bf16.msra.mxu0 %v3644_v26  ;;  %v3709_v26 = vcombine.high %v164_v19, %v168_v21 }
 0x10e   :  { %2726 = vmatpush1.bf16.msra.mxu1 %v3772_v27  ;;  %2686 = vmatprep.subr.bf16.mxu0 %v3637_v29  ;;  %v3837_v27 = vcombine.high %v292_v22, %v296_v23  ;;  %v156_v29 = vld [vmem:[#allocation4 + $0x250] sm:$0xff] }
 0x10f   :  { %2727 = vmatprep.subr.bf16.mxu1 %v3765_v30  ;;  %v160_v30 = vld [vmem:[#allocation4 + $0x270] sm:$0xff] }
 0x110   :  { %v3700_v43 = vcombine.low %v156_v29, %v160_v30 }
 0x111   :  { %2687 = vmatpush1.bf16.msra.mxu0 %v3636_v36  ;;  %v3836_v36 = vcombine.low %v292_v22, %v296_v23  ;;  %v3671_v23 = vcombine.high %v125_v10, %v129_v11 }
 0x112   :  { %2728 = vmatpush1.bf16.msra.mxu1 %v3764_v37  ;;  %2688 = vmatprep.subr.bf16.mxu0 %v3629_v38  ;;  %v3701_v37 = vcombine.high %v156_v29, %v160_v30  ;;  %v3829_v38 = vcombine.high %v284_v31, %v288_v32  ;;  %v121_v29 = vld [vmem:[#allocation4 + $0x138] sm:$0xff] }
 0x113   :  { %2729 = vmatprep.subr.bf16.mxu1 %v3757_v39  ;;  %v148_v39 = vld [vmem:[#allocation4 + $0x210] sm:$0xff] }
 0x115   :  { %2689 = vmatpush1.bf16.msra.mxu0 %v3628_v44  ;;  %v4392_v44 = vshrl.u32 %v468_v35, 7  ;;  %v3670_v35 = vcombine.low %v125_v10, %v129_v11  ;;  %v460_v10 = vld [vmem:[#allocation4 + $0xbd0] sm:$0xff] }
 0x116   :  { %2730 = vmatpush1.bf16.msra.mxu1 %v3756_v45  ;;  %2690 = vmatprep.subr.bf16.mxu0 %v3749_v46  ;;  %v3828_v45 = vcombine.low %v284_v31, %v288_v32  ;;  %v3693_v46 = vcombine.high %v148_v39, %v152_v40  ;;  %v464_v11 = vld [vmem:[#allocation4 + $0xbf0] sm:$0xff] }
 0x117   :  { %2731 = vmatprep.subr.bf16.mxu1 %v3877_v47  ;;  %v3821_v47 = vcombine.high %v276_v41, %v280_v42  ;;  %v474_v60 = vsub.s32 1, %v4392_v44 }
 0x119   :  { %2691 = vmatpush2.bf16.msra.mxu0 %v3748_v52  ;;  %v3692_v52 = vcombine.low %v148_v39, %v152_v40  ;;  %v364_v39 = vld [vmem:[#allocation4 + $0x8d0] sm:$0xff] }
 0x11a   :  { %2732 = vmatpush2.bf16.msra.mxu1 %v3876_v53  ;;  %2692 = vmatprep.subr.bf16.mxu0 %v3741_v54  ;;  %v470_v53 = vsub.s32 0, %v4392_v44  ;;  %v3820_v54 = vcombine.low %v276_v41, %v280_v42  ;;  %v368_v40 = vld [vmem:[#allocation4 + $0x8f0] sm:$0xff]  ;;  %v109_v41 = vld [vmem:[#allocation4 + $0xd8] sm:$0xff] }
 0x11b   :  { %2733 = vmatprep.subr.bf16.mxu1 %v3869_v55  ;;  %v4395_v55 = vld [vmem:[#allocation6] sm:$0xff]  ;;  %v113_v42 = vld [vmem:[#allocation4 + $0xf8] sm:$0xff]  ;;  %v3908_v51 = vcombine.low %v364_v39, %v368_v40 }
 0x11c   :  { %v475_v5 = vrot.slane %v4395_v55, %v474_v60  ;;  %v93_v60 = vld [vmem:[#allocation4 + $0x58] sm:$0xff] }
 0x11d   :  { %2693 = vmatpush2.bf16.msra.mxu0 %v3740_v62  ;;  %v392_v62 = vld [vmem:[#allocation4 + $0x9b0] sm:$0xff] }
 0x11e   :  { %2734 = vmatpush2.bf16.msra.mxu1 %v3868_v63  ;;  %2694 = vmatprep.subr.bf16.mxu0 %v3733_v0  ;;  %v133_v63 = vld [vmem:[#allocation4 + $0x198] sm:$0xff]  ;;  %v3933_v4 = vcombine.high %v388_v61, %v392_v62 }
 0x11f   :  { %2735 = vmatprep.subr.bf16.mxu1 %v3861_v1  ;;  %v137_v0 = vld [vmem:[#allocation4 + $0x1b8] sm:$0xff]  ;;  %v471_v1 = vrot.slane %v4395_v55, %v470_v53 }
 0x121   :  { %2695 = vmatpush2.bf16.msra.mxu0 %v3732_v6  ;;  %v3679_v6 = vcombine.high %v133_v63, %v137_v0 }
 0x122   :  { %2736 = vmatpush2.bf16.msra.mxu1 %v3860_v7  ;;  %2696 = vmatprep.subr.bf16.mxu0 %v3725_v8  ;;  %v380_v7 = vld [vmem:[#allocation4 + $0x950] sm:$0xff] }
 0x123   :  { %2737 = vmatprep.subr.bf16.mxu1 %v3853_v9  ;;  %v384_v8 = vld [vmem:[#allocation4 + $0x970] sm:$0xff] }
 0x124   :  { %v3924_v32 = vcombine.low %v380_v7, %v384_v8 }
 0x125   :  { %2697 = vmatpush2.bf16.msra.mxu0 %v3724_v14  ;;  %v3932_v14 = vcombine.low %v388_v61, %v392_v62  ;;  %v97_v61 = vld [vmem:[#allocation4 + $0x78] sm:$0xff] }
 0x126   :  { %2738 = vmatpush2.bf16.msra.mxu1 %v3852_v15  ;;  %2698 = vmatprep.subr.bf16.mxu0 %v3717_v17  ;;  %v3678_v17 = vcombine.low %v133_v63, %v137_v0  ;;  %v3646_v63 = vcombine.low %v101_v49, %v105_v50 }
 0x127   :  { %2739 = vmatprep.subr.bf16.mxu1 %v3845_v18  ;;  %v3925_v18 = vcombine.high %v380_v7, %v384_v8  ;;  %v3638_v7 = vcombine.low %v93_v60, %v97_v61 }
 0x129   :  { %2699 = vmatpush2.bf16.msra.mxu0 %v3716_v24  ;;  %v372_v24 = vld [vmem:[#allocation4 + $0x910] sm:$0xff] }
 0x12a   :  { %2740 = vmatpush2.bf16.msra.mxu1 %v3844_v25  ;;  %2700 = vmatprep.subr.bf16.mxu0 %v3709_v26  ;;  %v376_v25 = vld [vmem:[#allocation4 + $0x930] sm:$0xff] }
 0x12b   :  { %2741 = vmatprep.subr.bf16.mxu1 %v3837_v27  ;;  %v117_v27 = vld [vmem:[#allocation4 + $0x118] sm:$0xff] }
 0x12d   :  { %2701 = vmatpush2.bf16.msra.mxu0 %v3708_v34 }
 0x12e   :  { %2742 = vmatpush2.bf16.msra.mxu1 %v3836_v36  ;;  %2702 = vmatprep.subr.bf16.mxu0 %v3701_v37  ;;  %v3917_v36 = vcombine.high %v372_v24, %v376_v25 }
 0x12f   :  { %2743 = vmatprep.subr.bf16.mxu1 %v3829_v38  ;;  %v3663_v38 = vcombine.high %v117_v27, %v121_v29 }
 0x131   :  { %2703 = vmatpush2.bf16.msra.mxu0 %v3700_v43  ;;  %v3916_v43 = vcombine.low %v372_v24, %v376_v25  ;;  %v201_v24 = vld [vmem:[#allocation4 + $0x3b8] sm:$0xff]  ;;  %v4004_v25 = vcombine.low %v460_v10, %v464_v11 }
 0x132   :  { %2744 = vmatpush2.bf16.msra.mxu1 %v3828_v45  ;;  %2704 = vmatprep.subr.bf16.mxu0 %v3693_v46  ;;  %v3909_v45 = vcombine.high %v364_v39, %v368_v40  ;;  %v3655_v46 = vcombine.high %v109_v41, %v113_v42  ;;  %v436_v40 = vld [vmem:[#allocation4 + $0xb10] sm:$0xff] }
 0x133   :  { %2745 = vmatprep.subr.bf16.mxu1 %v3821_v47  ;;  %v356_v47 = vld [vmem:[#allocation4 + $0x890] sm:$0xff] }
 0x134   :  { %v3901_v53 = vcombine.high %v356_v47, %v360_v48  ;;  %v3900_v62 = vcombine.low %v356_v47, %v360_v48  ;;  %v428_v48 = vld [vmem:[#allocation4 + $0xad0] sm:$0xff] }
 0x135   :  { %2705 = vmatpush2.bf16.msra.mxu0 %v3692_v52  ;;  %v3654_v52 = vcombine.low %v109_v41, %v113_v42  ;;  %v440_v41 = vld [vmem:[#allocation4 + $0xb30] sm:$0xff]  ;;  %v181_v42 = vld [vmem:[#allocation4 + $0x318] sm:$0xff] }
 0x136   :  { %2746 = vmatpush2.bf16.msra.mxu1 %v3820_v54  ;;  %2756 = vmatprep.subr.bf16.mxu0 %v3941_v56  ;;  %v3647_v54 = vcombine.high %v101_v49, %v105_v50  ;;  %v348_v56 = vld [vmem:[#allocation4 + $0x850] sm:$0xff]  ;;  %v173_v50 = vld [vmem:[#allocation4 + $0x2d8] sm:$0xff] }
 0x137   :  { %2797 = vmatprep.subr.bf16.mxu1 %v3687_v57  ;;  %v352_v57 = vld [vmem:[#allocation4 + $0x870] sm:$0xff] }
 0x138   :  { %v2462_v9 = vpop.f32.mrf.mxu0  ;;  %2707 = vmatmul.mubr.bf16.vlgmr.msra.gmra.mxu0 %v4372_v16  ;;  %v3893_v0 = vcombine.high %v348_v56, %v352_v57  ;;  %v432_v49 = vld [vmem:[#allocation4 + $0xaf0] sm:$0xff] }
 0x139   :  { %v2463_v12 = vadd.f32 %v2462_v9, %v471_v1  ;;  %v2503_v13 = vpop.f32.mrf.mxu1  ;;  %2748 = vmatmul.mubr.bf16.vlgmr.msra.gmra.mxu1 %v4374_v20  ;;  %2757 = vmatpush1.bf16.msra.mxu0 %v3940_v2  ;;  %v3639_v1 = vcombine.high %v93_v60, %v97_v61  ;;  %v340_v2 = vld [vmem:[#allocation4 + $0x810] sm:$0xff]  ;;  %v165_v61 = vld [vmem:[#allocation4 + $0x298] sm:$0xff] }
 0x13a   :  { %2798 = vmatpush1.bf16.msra.mxu1 %v3686_v3  ;;  %v2464_v15 = vpop.f32.mrf.mxu0  ;;  %2758 = vmatprep.subr.bf16.mxu0 %v3933_v4  ;;  %v344_v3 = vld [vmem:[#allocation4 + $0x830] sm:$0xff]  ;;  %v85_v4 = vld [vmem:[#allocation4 + $0x18] sm:$0xff] }
 0x13b   :  { %v4402_v19 = vadd.f32 %v2503_v13, %v2463_v12  ;;  %v2465_v21 = vadd.f32 %v2464_v15, %v475_v5  ;;  %v2505_v22 = vpop.f32.mrf.mxu1  ;;  %2799 = vmatprep.subr.bf16.mxu1 %v3679_v6  ;;  %2788 = vmatprep.mubr.bf16.mxu0 %v4376_v28  ;;  %v89_v5 = vld [vmem:[#allocation4 + $0x38] sm:$0xff]  ;;  %v3892_v6 = vcombine.low %v348_v56, %v352_v57  ;;  %v420_v57 = vld [vmem:[#allocation4 + $0xa90] sm:$0xff] }
 0x13c   :  { %v2466_v26 = vpop.f32.mrf.mxu0  ;;  %2829 = vmatprep.mubr.bf16.mxu1 %v4366_v58  ;;  %v3662_v58 = vcombine.low %v117_v27, %v121_v29  ;;  %v3885_v8 = vcombine.high %v340_v2, %v344_v3  ;;  %v3631_v9 = vcombine.high %v85_v4, %v89_v5  ;;  %v205_v12 = vld [vmem:[#allocation4 + $0x3d8] sm:$0xff]  ;;  %v3630_v15 = vcombine.low %v85_v4, %v89_v5  ;;  %v424_v60 = vld [vmem:[#allocation4 + $0xab0] sm:$0xff] }
 0x13d   :  { %v4406_v30 = vadd.f32 %v2505_v22, %v2465_v21  ;;  %v2507_v31 = vpop.f32.mrf.mxu1  ;;  %2759 = vmatpush1.bf16.msra.mxu0 %v3932_v14  ;;  %v209_v13 = vld [vmem:[#allocation4 + $0x3f8] sm:$0xff]  ;;  %v3884_v14 = vcombine.low %v340_v2, %v344_v3  ;;  %v452_v21 = vld [vmem:[#allocation4 + $0xb90] sm:$0xff] }
 0x13e   :  { %2800 = vmatpush1.bf16.msra.mxu1 %v3678_v17  ;;  %v2467_v34 = vpop.f32.mrf.mxu0  ;;  %2760 = vmatprep.subr.bf16.mxu0 %v3925_v18  ;;  %v4005_v17 = vcombine.high %v460_v10, %v464_v11  ;;  %v3751_v18 = vcombine.high %v205_v12, %v209_v13  ;;  %v456_v22 = vld [vmem:[#allocation4 + $0xbb0] sm:$0xff]  ;;  %v3750_v26 = vcombine.low %v205_v12, %v209_v13  ;;  %v157_v5 = vld [vmem:[#allocation4 + $0x258] sm:$0xff] }
 0x13f   :  { %v2508_v37 = vpop.f32.mrf.mxu1  ;;  %2801 = vmatprep.subr.bf16.mxu1 %v3671_v23  ;;  %v197_v23 = vld [vmem:[#allocation4 + $0x398] sm:$0xff]  ;;  %v3997_v27 = vcombine.high %v452_v21, %v456_v22  ;;  %v444_v31 = vld [vmem:[#allocation4 + $0xb50] sm:$0xff] }
 0x140   :  { %v3743_v29 = vcombine.high %v197_v23, %v201_v24  ;;  %v189_v34 = vld [vmem:[#allocation4 + $0x358] sm:$0xff]  ;;  %v3742_v37 = vcombine.low %v197_v23, %v201_v24  ;;  %v412_v3 = vld [vmem:[#allocation4 + $0xa50] sm:$0xff] }
 0x141   :  { %2761 = vmatpush1.bf16.msra.mxu0 %v3924_v32  ;;  %v448_v32 = vld [vmem:[#allocation4 + $0xb70] sm:$0xff]  ;;  %v149_v13 = vld [vmem:[#allocation4 + $0x218] sm:$0xff] }
 0x142   :  { %2802 = vmatpush1.bf16.msra.mxu1 %v3670_v35  ;;  %2762 = vmatprep.subr.bf16.mxu0 %v3917_v36  ;;  %v193_v35 = vld [vmem:[#allocation4 + $0x378] sm:$0xff]  ;;  %v3996_v36 = vcombine.low %v452_v21, %v456_v22  ;;  %v416_v4 = vld [vmem:[#allocation4 + $0xa70] sm:$0xff] }
 0x143   :  { %2803 = vmatprep.subr.bf16.mxu1 %v3663_v38  ;;  %v3989_v38 = vcombine.high %v444_v31, %v448_v32  ;;  %v3735_v39 = vcombine.high %v189_v34, %v193_v35  ;;  %v404_v11 = vld [vmem:[#allocation4 + $0xa10] sm:$0xff]  ;;  %v269_v22 = vld [vmem:[#allocation4 + $0x5d8] sm:$0xff] }
 0x144   :  { %v408_v12 = vld [vmem:[#allocation4 + $0xa30] sm:$0xff]  ;;  %v273_v23 = vld [vmem:[#allocation4 + $0x5f8] sm:$0xff] }
 0x145   :  { %2763 = vmatpush1.bf16.msra.mxu0 %v3916_v43  ;;  %v185_v43 = vld [vmem:[#allocation4 + $0x338] sm:$0xff] }
 0x146   :  { %2804 = vmatpush1.bf16.msra.mxu1 %v3662_v58  ;;  %2764 = vmatprep.subr.bf16.mxu0 %v3909_v45  ;;  %v3988_v58 = vcombine.low %v444_v31, %v448_v32  ;;  %v3734_v45 = vcombine.low %v189_v34, %v193_v35  ;;  %v3727_v47 = vcombine.high %v181_v42, %v185_v43  ;;  %v397_v24 = vld [vmem:[#allocation4 + $0x9d8] sm:$0xff] }
 0x147   :  { %2805 = vmatprep.subr.bf16.mxu1 %v3655_v46  ;;  %v3981_v46 = vcombine.high %v436_v40, %v440_v41  ;;  %v261_v32 = vld [vmem:[#allocation4 + $0x598] sm:$0xff] }
 0x148   :  { %v265_v34 = vld [vmem:[#allocation4 + $0x5b8] sm:$0xff] }
 0x149   :  { %2765 = vmatpush1.bf16.msra.mxu0 %v3908_v51  ;;  %v177_v51 = vld [vmem:[#allocation4 + $0x2f8] sm:$0xff] }
 0x14a   :  { %2806 = vmatpush1.bf16.msra.mxu1 %v3654_v52  ;;  %2766 = vmatprep.subr.bf16.mxu0 %v3901_v53  ;;  %v3980_v52 = vcombine.low %v436_v40, %v440_v41  ;;  %v3726_v53 = vcombine.low %v181_v42, %v185_v43  ;;  %v3719_v56 = vcombine.high %v173_v50, %v177_v51  ;;  %v389_v35 = vld [vmem:[#allocation4 + $0x998] sm:$0xff] }
 0x14b   :  { %2807 = vmatprep.subr.bf16.mxu1 %v3647_v54  ;;  %v3973_v54 = vcombine.high %v428_v48, %v432_v49  ;;  %v253_v41 = vld [vmem:[#allocation4 + $0x558] sm:$0xff] }
 0x14c   :  { %v257_v42 = vld [vmem:[#allocation4 + $0x578] sm:$0xff] }
 0x14d   :  { %2767 = vmatpush1.bf16.msra.mxu0 %v3900_v62  ;;  %v169_v62 = vld [vmem:[#allocation4 + $0x2b8] sm:$0xff] }
 0x14e   :  { %2808 = vmatpush1.bf16.msra.mxu1 %v3646_v63  ;;  %2768 = vmatprep.subr.bf16.mxu0 %v3893_v0  ;;  %v3972_v63 = vcombine.low %v428_v48, %v432_v49  ;;  %v3718_v0 = vcombine.low %v173_v50, %v177_v51  ;;  %v3711_v2 = vcombine.high %v165_v61, %v169_v62 }
 0x14f   :  { %2809 = vmatprep.subr.bf16.mxu1 %v3639_v1  ;;  %v3965_v1 = vcombine.high %v420_v57, %v424_v60  ;;  %v3806_v48 = vcombine.low %v261_v32, %v265_v34  ;;  %v3799_v51 = vcombine.high %v253_v41, %v257_v42 }
 0x151   :  { %2769 = vmatpush1.bf16.msra.mxu0 %v3892_v6  ;;  %v161_v6 = vld [vmem:[#allocation4 + $0x278] sm:$0xff] }
 0x152   :  { %2810 = vmatpush1.bf16.msra.mxu1 %v3638_v7  ;;  %2770 = vmatprep.subr.bf16.mxu0 %v3885_v8  ;;  %v3964_v7 = vcombine.low %v420_v57, %v424_v60  ;;  %v3710_v8 = vcombine.low %v165_v61, %v169_v62  ;;  %v3703_v10 = vcombine.high %v157_v5, %v161_v6  ;;  %v373_v57 = vld [vmem:[#allocation4 + $0x918] sm:$0xff] }
 0x153   :  { %2811 = vmatprep.subr.bf16.mxu1 %v3631_v9  ;;  %v3957_v9 = vcombine.high %v412_v3, %v416_v4  ;;  %v377_v60 = vld [vmem:[#allocation4 + $0x938] sm:$0xff]  ;;  %v3798_v61 = vcombine.low %v253_v41, %v257_v42 }
 0x154   :  { %v461_v41 = vld [vmem:[#allocation4 + $0xbd8] sm:$0xff] }
 0x155   :  { %2771 = vmatpush1.bf16.msra.mxu0 %v3884_v14  ;;  %v153_v14 = vld [vmem:[#allocation4 + $0x238] sm:$0xff] }
 0x156   :  { %2812 = vmatpush1.bf16.msra.mxu1 %v3630_v15  ;;  %2772 = vmatprep.subr.bf16.mxu0 %v4005_v17  ;;  %v3956_v15 = vcombine.low %v412_v3, %v416_v4  ;;  %v3702_v17 = vcombine.low %v157_v5, %v161_v6  ;;  %v3695_v21 = vcombine.high %v149_v13, %v153_v14  ;;  %v237_v3 = vld [vmem:[#allocation4 + $0x4d8] sm:$0xff] }
 0x157   :  { %2813 = vmatprep.subr.bf16.mxu1 %v3751_v18  ;;  %v3949_v18 = vcombine.high %v404_v11, %v408_v12  ;;  %v241_v4 = vld [vmem:[#allocation4 + $0x4f8] sm:$0xff] }
 0x158   :  { %v365_v5 = vld [vmem:[#allocation4 + $0x8d8] sm:$0xff] }
 0x159   :  { %2773 = vmatpush2.bf16.msra.mxu0 %v4004_v25  ;;  %v401_v25 = vld [vmem:[#allocation4 + $0x9f8] sm:$0xff] }
 0x15a   :  { %2814 = vmatpush2.bf16.msra.mxu1 %v3750_v26  ;;  %2774 = vmatprep.subr.bf16.mxu0 %v3997_v27  ;;  %v3948_v26 = vcombine.low %v404_v11, %v408_v12  ;;  %v3694_v27 = vcombine.low %v149_v13, %v153_v14  ;;  %v3943_v31 = vcombine.high %v397_v24, %v401_v25  ;;  %v357_v11 = vld [vmem:[#allocation4 + $0x898] sm:$0xff] }
 0x15b   :  { %2815 = vmatprep.subr.bf16.mxu1 %v3743_v29  ;;  %v3815_v29 = vcombine.high %v269_v22, %v273_v23  ;;  %v361_v12 = vld [vmem:[#allocation4 + $0x8b8] sm:$0xff]  ;;  %v3782_v13 = vcombine.low %v237_v3, %v241_v4 }
 0x15c   :  { %v465_v42 = vld [vmem:[#allocation4 + $0xbf8] sm:$0xff] }
 0x15d   :  { %2775 = vmatpush2.bf16.msra.mxu0 %v3996_v36  ;;  %v393_v36 = vld [vmem:[#allocation4 + $0x9b8] sm:$0xff] }
 0x15e   :  { %2816 = vmatpush2.bf16.msra.mxu1 %v3742_v37  ;;  %2776 = vmatprep.subr.bf16.mxu0 %v3989_v38  ;;  %v3814_v37 = vcombine.low %v269_v22, %v273_v23  ;;  %v3942_v38 = vcombine.low %v397_v24, %v401_v25  ;;  %v3935_v40 = vcombine.high %v389_v35, %v393_v36  ;;  %v349_v22 = vld [vmem:[#allocation4 + $0x858] sm:$0xff] }
 0x15f   :  { %2817 = vmatprep.subr.bf16.mxu1 %v3735_v39  ;;  %v3807_v39 = vcombine.high %v261_v32, %v265_v34  ;;  %v3934_v50 = vcombine.low %v389_v35, %v393_v36  ;;  %v353_v23 = vld [vmem:[#allocation4 + $0x878] sm:$0xff]  ;;  %v3902_v25 = vcombine.low %v357_v11, %v361_v12 }
 0x160   :  { %v341_v32 = vld [vmem:[#allocation4 + $0x818] sm:$0xff]  ;;  %v3894_v36 = vcombine.low %v349_v22, %v353_v23 }
 0x161   :  { %2777 = vmatpush2.bf16.msra.mxu0 %v3988_v58  ;;  %v381_v58 = vld [vmem:[#allocation4 + $0x958] sm:$0xff] }
 0x162   :  { %2818 = vmatpush2.bf16.msra.mxu1 %v3734_v45  ;;  %2778 = vmatprep.subr.bf16.mxu0 %v3981_v46  ;;  %v385_v45 = vld [vmem:[#allocation4 + $0x978] sm:$0xff] }
 0x163   :  { %2819 = vmatprep.subr.bf16.mxu1 %v3727_v47  ;;  %v345_v34 = vld [vmem:[#allocation4 + $0x838] sm:$0xff] }
 0x165   :  { %2779 = vmatpush2.bf16.msra.mxu0 %v3980_v52 }
 0x166   :  { %2820 = vmatpush2.bf16.msra.mxu1 %v3726_v53  ;;  %2780 = vmatprep.subr.bf16.mxu0 %v3973_v54  ;;  %v3927_v53 = vcombine.high %v381_v58, %v385_v45  ;;  %v245_v54 = vld [vmem:[#allocation4 + $0x518] sm:$0xff] }
 0x167   :  { %2821 = vmatprep.subr.bf16.mxu1 %v3719_v56  ;;  %v249_v56 = vld [vmem:[#allocation4 + $0x538] sm:$0xff] }
 0x168   :  { %v3790_v6 = vcombine.low %v245_v54, %v249_v56 }
 0x169   :  { %2781 = vmatpush2.bf16.msra.mxu0 %v3972_v63  ;;  %v3926_v63 = vcombine.low %v381_v58, %v385_v45  ;;  %v3886_v58 = vcombine.low %v341_v32, %v345_v34 }
 0x16a   :  { %2822 = vmatpush2.bf16.msra.mxu1 %v3718_v0  ;;  %2782 = vmatprep.subr.bf16.mxu0 %v3965_v1  ;;  %v3791_v0 = vcombine.high %v245_v54, %v249_v56  ;;  %v457_v54 = vld [vmem:[#allocation4 + $0xbb8] sm:$0xff] }
 0x16b   :  { %2823 = vmatprep.subr.bf16.mxu1 %v3711_v2  ;;  %v3919_v2 = vcombine.high %v373_v57, %v377_v60 }
 0x16d   :  { %2783 = vmatpush2.bf16.msra.mxu0 %v3964_v7  ;;  %v3783_v7 = vcombine.high %v237_v3, %v241_v4  ;;  %v309_v4 = vld [vmem:[#allocation4 + $0x718] sm:$0xff] }
 0x16e   :  { %2824 = vmatpush2.bf16.msra.mxu1 %v3710_v8  ;;  %2784 = vmatprep.subr.bf16.mxu0 %v3957_v9  ;;  %v229_v9 = vld [vmem:[#allocation4 + $0x498] sm:$0xff] }
 0x16f   :  { %2825 = vmatprep.subr.bf16.mxu1 %v3703_v10  ;;  %v233_v10 = vld [vmem:[#allocation4 + $0x4b8] sm:$0xff] }
 0x170   :  { %v3774_v24 = vcombine.low %v229_v9, %v233_v10 }
 0x171   :  { %2785 = vmatpush2.bf16.msra.mxu0 %v3956_v15  ;;  %v3775_v15 = vcombine.high %v229_v9, %v233_v10  ;;  %v301_v10 = vld [vmem:[#allocation4 + $0x6d8] sm:$0xff] }
 0x172   :  { %2826 = vmatpush2.bf16.msra.mxu1 %v3702_v17  ;;  %2786 = vmatprep.subr.bf16.mxu0 %v3949_v18  ;;  %v3903_v17 = vcombine.high %v357_v11, %v361_v12  ;;  %v221_v18 = vld [vmem:[#allocation4 + $0x458] sm:$0xff] }
 0x173   :  { %2827 = vmatprep.subr.bf16.mxu1 %v3695_v21  ;;  %v225_v21 = vld [vmem:[#allocation4 + $0x478] sm:$0xff] }
 0x174   :  { %v3766_v35 = vcombine.low %v221_v18, %v225_v21  ;;  %v305_v11 = vld [vmem:[#allocation4 + $0x6f8] sm:$0xff] }
 0x175   :  { %2787 = vmatpush2.bf16.msra.mxu0 %v3948_v26  ;;  %v3767_v26 = vcombine.high %v221_v18, %v225_v21  ;;  %v429_v12 = vld [vmem:[#allocation4 + $0xad8] sm:$0xff] }
 0x176   :  { %2828 = vmatpush2.bf16.msra.mxu1 %v3694_v27  ;;  %2838 = vmatprep.subr.bf16.mxu0 %v3815_v29  ;;  %v3895_v27 = vcombine.high %v349_v22, %v353_v23  ;;  %v213_v29 = vld [vmem:[#allocation4 + $0x418] sm:$0xff] }
 0x177   :  { %2879 = vmatprep.subr.bf16.mxu1 %v3943_v31  ;;  %v217_v31 = vld [vmem:[#allocation4 + $0x438] sm:$0xff] }
 0x178   :  { %v2544_v43 = vpop.f32.mrf.mxu0  ;;  %2789 = vmatmul.mubr.bf16.vlgmr.msra.gmra.mxu0 %v4382_v33  ;;  %v293_v21 = vld [vmem:[#allocation4 + $0x698] sm:$0xff] }
 0x179   :  { %v4410_v46 = vadd.f32 %v2544_v43, %v4402_v19  ;;  %v4412_v47 = vpop.f32.mrf.mxu1  ;;  %2830 = vmatmul.mubr.bf16.vlgmr.msra.gmra.mxu1 %v4372_v16  ;;  %2839 = vmatpush1.bf16.msra.mxu0 %v3814_v37  ;;  %v3759_v37 = vcombine.high %v213_v29, %v217_v31  ;;  %v3758_v43 = vcombine.low %v213_v29, %v217_v31  ;;  %v297_v22 = vld [vmem:[#allocation4 + $0x6b8] sm:$0xff] }
 0x17a   :  { %2880 = vmatpush1.bf16.msra.mxu1 %v3942_v38  ;;  %v4415_v49 = vpop.f32.mrf.mxu0  ;;  %2840 = vmatprep.subr.bf16.mxu0 %v3807_v39  ;;  %v3887_v38 = vcombine.high %v341_v32, %v345_v34  ;;  %v333_v39 = vld [vmem:[#allocation4 + $0x7d8] sm:$0xff] }
 0x17b   :  { %v4417_v52 = vpop.f32.mrf.mxu1  ;;  %2881 = vmatprep.subr.bf16.mxu1 %v3935_v40  ;;  %2870 = vmatprep.mubr.bf16.mxu0 %v4368_v59  ;;  %v369_v59 = vld [vmem:[#allocation4 + $0x8f8] sm:$0xff] }
 0x17c   :  { %v2548_v19 = vpop.f32.mrf.mxu0  ;;  %2911 = vmatprep.mubr.bf16.mxu1 %v4376_v28  ;;  %v3918_v28 = vcombine.low %v373_v57, %v377_v60  ;;  %v3911_v8 = vcombine.high %v365_v5, %v369_v59  ;;  %v3910_v14 = vcombine.low %v365_v5, %v369_v59  ;;  %v337_v40 = vld [vmem:[#allocation4 + $0x7f8] sm:$0xff] }
 0x17d   :  { %v2589_v16 = vpop.f32.mrf.mxu1  ;;  %2841 = vmatpush1.bf16.msra.mxu0 %v3806_v48  ;;  %v3879_v45 = vcombine.high %v333_v39, %v337_v40  ;;  %v4007_v48 = vcombine.high %v461_v41, %v465_v42  ;;  %v3878_v56 = vcombine.low %v333_v39, %v337_v40  ;;  %v4006_v19 = vcombine.low %v461_v41, %v465_v42  ;;  %v313_v5 = vld [vmem:[#allocation4 + $0x738] sm:$0xff] }
 0x17e   :  { %2882 = vmatpush1.bf16.msra.mxu1 %v3934_v50  ;;  %v2549_v62 = vpop.f32.mrf.mxu0  ;;  %2842 = vmatprep.subr.bf16.mxu0 %v3799_v51  ;;  %v325_v50 = vld [vmem:[#allocation4 + $0x798] sm:$0xff] }
 0x17f   :  { %v2590_v1 = vpop.f32.mrf.mxu1  ;;  %2883 = vmatprep.subr.bf16.mxu1 %v3927_v53  ;;  %v329_v51 = vld [vmem:[#allocation4 + $0x7b8] sm:$0xff] }
 0x180   :  { %v453_v53 = vld [vmem:[#allocation4 + $0xb98] sm:$0xff]  ;;  %v3871_v57 = vcombine.high %v325_v50, %v329_v51 }
 0x181   :  { %2843 = vmatpush1.bf16.msra.mxu0 %v3798_v61  ;;  %v3999_v60 = vcombine.high %v453_v53, %v457_v54  ;;  %v317_v16 = vld [vmem:[#allocation4 + $0x758] sm:$0xff]  ;;  %v3998_v1 = vcombine.low %v453_v53, %v457_v54  ;;  %v482_v53 = vsub.s32 3, %v4392_v44 }
 0x182   :  { %2884 = vmatpush1.bf16.msra.mxu1 %v3926_v63  ;;  %2844 = vmatprep.subr.bf16.mxu0 %v3791_v0  ;;  %v321_v61 = vld [vmem:[#allocation4 + $0x778] sm:$0xff]  ;;  %v3870_v0 = vcombine.low %v325_v50, %v329_v51  ;;  %v2547_v51 = vadd.f32 %v4415_v49, %v4406_v30  ;;  %v4169_v30 = vld [vmem:[%s4637_s3 + $0x38] sm:$0xff]  }
 0x183   :  { %2885 = vmatprep.subr.bf16.mxu1 %v3919_v2  ;;  %v445_v62 = vld [vmem:[#allocation4 + $0xb58] sm:$0xff]  ;;  %v3863_v2 = vcombine.high %v317_v16, %v321_v61  ;;  %v4170_v49 = vld [vmem:[%s4637_s3 + $0xb8] sm:$0xff]  }
 0x184   :  { %v449_v63 = vld [vmem:[#allocation4 + $0xb78] sm:$0xff] }
 0x185   :  { %2845 = vmatpush1.bf16.msra.mxu0 %v3790_v6  ;;  %v3991_v3 = vcombine.high %v445_v62, %v449_v63  ;;  %v437_v59 = vld [vmem:[#allocation4 + $0xb18] sm:$0xff] }
 0x186   :  { %2886 = vmatpush1.bf16.msra.mxu1 %v3918_v28  ;;  %2846 = vmatprep.subr.bf16.mxu0 %v3783_v7  ;;  %v441_v6 = vld [vmem:[#allocation4 + $0xb38] sm:$0xff]  ;;  %v3862_v28 = vcombine.low %v317_v16, %v321_v61  ;;  %v3990_v7 = vcombine.low %v445_v62, %v449_v63  ;;  %v483_v16 = vrot.slane %v4395_v55, %v482_v53  ;;  %v4171_v61 = vld [vmem:[%s4637_s3 + $0x70] sm:$0xff]   ;;  %v4216_v53 = vld [vmem:[%s4637_s3 + $0x1b8] sm:$0xff]  }
 0x187   :  { %2887 = vmatprep.subr.bf16.mxu1 %v3911_v8  ;;  %v3855_v8 = vcombine.high %v309_v4, %v313_v5  ;;  %v3983_v9 = vcombine.high %v437_v59, %v441_v6  ;;  %v421_v23 = vld [vmem:[#allocation4 + $0xa98] sm:$0xff]  ;;  %v4172_v62 = vld [vmem:[%s4637_s3 + $0xf0] sm:$0xff]  }
 0x188   :  { %v285_v31 = vld [vmem:[#allocation4 + $0x658] sm:$0xff] }
 0x189   :  { %2847 = vmatpush1.bf16.msra.mxu0 %v3782_v13  ;;  %v433_v13 = vld [vmem:[#allocation4 + $0xaf8] sm:$0xff] }
 0x18a   :  { %2888 = vmatpush1.bf16.msra.mxu1 %v3910_v14  ;;  %2848 = vmatprep.subr.bf16.mxu0 %v3775_v15  ;;  %v3854_v14 = vcombine.low %v309_v4, %v313_v5  ;;  %v3982_v15 = vcombine.low %v437_v59, %v441_v6  ;;  %v3975_v18 = vcombine.high %v429_v12, %v433_v13  ;;  %v289_v32 = vld [vmem:[#allocation4 + $0x678] sm:$0xff]  ;;  %v4174_v5 = vld [vmem:[%s4637_s3 + $0xb0] sm:$0xff]  }
 0x18b   :  { %2889 = vmatprep.subr.bf16.mxu1 %v3903_v17  ;;  %v3847_v17 = vcombine.high %v301_v10, %v305_v11  ;;  %v413_v34 = vld [vmem:[#allocation4 + $0xa58] sm:$0xff] }
 0x18c   :  { %v277_v40 = vld [vmem:[#allocation4 + $0x618] sm:$0xff] }
 0x18d   :  { %2849 = vmatpush1.bf16.msra.mxu0 %v3774_v24  ;;  %v425_v24 = vld [vmem:[#allocation4 + $0xab8] sm:$0xff] }
 0x18e   :  { %2890 = vmatpush1.bf16.msra.mxu1 %v3902_v25  ;;  %2850 = vmatprep.subr.bf16.mxu0 %v3767_v26  ;;  %v3846_v25 = vcombine.low %v301_v10, %v305_v11  ;;  %v3974_v26 = vcombine.low %v429_v12, %v433_v13  ;;  %v3967_v29 = vcombine.high %v421_v23, %v425_v24  ;;  %v281_v41 = vld [vmem:[#allocation4 + $0x638] sm:$0xff]  ;;  %v4179_v11 = vld [vmem:[%s4637_s3 + $0x60] sm:$0xff]  }
 0x18f   :  { %2891 = vmatprep.subr.bf16.mxu1 %v3895_v27  ;;  %v3839_v27 = vcombine.high %v293_v21, %v297_v22  ;;  %v405_v42 = vld [vmem:[#allocation4 + $0xa18] sm:$0xff]  ;;  %v3822_v54 = vcombine.low %v277_v40, %v281_v41 }
 0x190   :  { %v4178_v10 = vld [vmem:[%s4637_s3 + $0xa8] sm:$0xff]  }
 0x191   :  { %2851 = vmatpush1.bf16.msra.mxu0 %v3766_v35  ;;  %v417_v35 = vld [vmem:[#allocation4 + $0xa78] sm:$0xff] }
 0x192   :  { %2892 = vmatpush1.bf16.msra.mxu1 %v3894_v36  ;;  %2852 = vmatprep.subr.bf16.mxu0 %v3759_v37  ;;  %v3838_v36 = vcombine.low %v293_v21, %v297_v22  ;;  %v3966_v37 = vcombine.low %v421_v23, %v425_v24  ;;  %v3959_v39 = vcombine.high %v413_v34, %v417_v35  ;;  %v4182_v21 = vld [vmem:[%s4637_s3 + $0xa0] sm:$0xff]   ;;  %v4183_v22 = vld [vmem:[%s4637_s3 + $0x58] sm:$0xff]  }
 0x193   :  { %2893 = vmatprep.subr.bf16.mxu1 %v3887_v38  ;;  %v3831_v38 = vcombine.high %v285_v31, %v289_v32  ;;  %v4184_v23 = vld [vmem:[%s4637_s3 + $0xd8] sm:$0xff]  }
 0x195   :  { %2853 = vmatpush1.bf16.msra.mxu0 %v3758_v43  ;;  %v409_v43 = vld [vmem:[#allocation4 + $0xa38] sm:$0xff] }
 0x196   :  { %2894 = vmatpush1.bf16.msra.mxu1 %v3886_v58  ;;  %2854 = vmatprep.subr.bf16.mxu0 %v3879_v45  ;;  %v3830_v58 = vcombine.low %v285_v31, %v289_v32  ;;  %v3958_v45 = vcombine.low %v413_v34, %v417_v35  ;;  %v3951_v50 = vcombine.high %v405_v42, %v409_v43  ;;  %v4189_v31 = vld [vmem:[%s4637_s3 + $0x10] sm:$0xff]   ;;  %v4191_v34 = vld [vmem:[%s4637_s3 + $0x48] sm:$0xff]  }
 0x197   :  { %2895 = vmatprep.subr.bf16.mxu1 %v4007_v48  ;;  %v3823_v48 = vcombine.high %v277_v40, %v281_v41  ;;  %v4190_v32 = vld [vmem:[%s4637_s3 + $0x90] sm:$0xff]   ;;  %v4196_v40 = vld [vmem:[%s4637_s3 + $0xc0] sm:$0xff]  }
 0x198   :  { %v4197_v41 = vld [vmem:[%s4637_s3] sm:$0xff]  }
 0x199   :  { %2855 = vmatpush2.bf16.msra.mxu0 %v3878_v56  ;;  %v3950_v56 = vcombine.low %v405_v42, %v409_v43  ;;  %v2920_v42 = vmax.f32 %v4410_v46, 0.0  ;;  %v4198_v43 = vld [vmem:[%s4637_s3 + $0x80] sm:$0xff]   ;;  %v4200_v46 = vld [vmem:[%s4637_s3 + $0x138] sm:$0xff]  }
 0x19a   :  { %2896 = vmatpush2.bf16.msra.mxu1 %v4006_v19  ;;  %2856 = vmatprep.subr.bf16.mxu0 %v3871_v57  ;;  %v4167_v19 = vld [vmem:[%s4637_s3 + $0x78] sm:$0xff]  }
 0x19b   :  { %2897 = vmatprep.subr.bf16.mxu1 %v3999_v60  ;;  %v4168_v57 = vld [vmem:[%s4637_s3 + $0xf8] sm:$0xff]   ;;  %v2921_v60 = vmax.f32 %v2547_v51, 0.0  ;;  %v4201_v51 = vld [vmem:[%s4637_s3 + $0x170] sm:$0xff]  }
 0x19d   :  { %2857 = vmatpush2.bf16.msra.mxu0 %v3870_v0  ;;  %v2929_v63 = vpack.c.bf16 %v2921_v60, %v2921_v60  ;;  %v4218_v60 = vld [vmem:[%s4637_s3 + $0x1b0] sm:$0xff]  }
 0x19e   :  { %2898 = vmatpush2.bf16.msra.mxu1 %v3998_v1  ;;  %2858 = vmatprep.subr.bf16.mxu0 %v3863_v2  ;;  %v2588_v1 = vadd.f32 %v4417_v52, %v483_v16  ;;  %v4219_v16 = vld [vmem:[%s4637_s3 + $0x1e8] sm:$0xff]  }
 0x19f   :  { %2899 = vmatprep.subr.bf16.mxu1 %v3991_v3  ;;  %v4173_v3 = vld [vmem:[%s4637_s3 + $0x30] sm:$0xff]  }
 0x1a1   :  { %2859 = vmatpush2.bf16.msra.mxu0 %v3862_v28 }
 0x1a2   :  { %2900 = vmatpush2.bf16.msra.mxu1 %v3990_v7  ;;  %2860 = vmatprep.subr.bf16.mxu0 %v3855_v8  ;;  %v4177_v8 = vld [vmem:[%s4637_s3 + $0x28] sm:$0xff]  }
 0x1a3   :  { %2901 = vmatprep.subr.bf16.mxu1 %v3983_v9 }
 0x1a5   :  { %2861 = vmatpush2.bf16.msra.mxu0 %v3854_v14  ;;  %v4180_v14 = vld [vmem:[%s4637_s3 + $0xe0] sm:$0xff]  }
 0x1a6   :  { %2902 = vmatpush2.bf16.msra.mxu1 %v3982_v15  ;;  %2862 = vmatprep.subr.bf16.mxu0 %v3847_v17  ;;  %v478_v15 = vsub.s32 2, %v4392_v44 }
 0x1a7   :  { %2903 = vmatprep.subr.bf16.mxu1 %v3975_v18  ;;  %v4181_v18 = vld [vmem:[%s4637_s3 + $0x20] sm:$0xff]  }
 0x1a8   :  { %v479_v24 = vrot.slane %v4395_v55, %v478_v15  ;;  %v4188_v55 = vld [vmem:[%s4637_s3 + $0xd0] sm:$0xff]  }
 0x1a9   :  { %2863 = vmatpush2.bf16.msra.mxu0 %v3846_v25  ;;  %v4185_v25 = vld [vmem:[%s4637_s3 + $0x18] sm:$0xff]  }
 0x1aa   :  { %2904 = vmatpush2.bf16.msra.mxu1 %v3974_v26  ;;  %2864 = vmatprep.subr.bf16.mxu0 %v3839_v27  ;;  %v4186_v26 = vld [vmem:[%s4637_s3 + $0x98] sm:$0xff]   ;;  %v4187_v27 = vld [vmem:[%s4637_s3 + $0x50] sm:$0xff]  }
 0x1ab   :  { %2905 = vmatprep.subr.bf16.mxu1 %v3967_v29  ;;  %v2586_v29 = vadd.f32 %v4412_v47, %v479_v24  ;;  %v4192_v47 = vld [vmem:[%s4637_s3 + $0xc8] sm:$0xff]   ;;  %v490_v24 = vsub.s32 5, %v4392_v44 }
 0x1ad   :  { %2865 = vmatpush2.bf16.msra.mxu0 %v3838_v36  ;;  %v4193_v36 = vld [vmem:[%s4637_s3 + $0x8] sm:$0xff]  }
 0x1ae   :  { %2906 = vmatpush2.bf16.msra.mxu1 %v3966_v37  ;;  %2866 = vmatprep.subr.bf16.mxu0 %v3831_v38  ;;  %v4194_v37 = vld [vmem:[%s4637_s3 + $0x88] sm:$0xff]   ;;  %v4195_v38 = vld [vmem:[%s4637_s3 + $0x40] sm:$0xff]  }
 0x1af   :  { %2907 = vmatprep.subr.bf16.mxu1 %v3959_v39 }
 0x1b1   :  { %2867 = vmatpush2.bf16.msra.mxu0 %v3830_v58  ;;  %v4199_v58 = vld [vmem:[%s4637_s3 + $0x178] sm:$0xff]  }
 0x1b2   :  { %2908 = vmatpush2.bf16.msra.mxu1 %v3958_v45  ;;  %2868 = vmatprep.subr.bf16.mxu0 %v3823_v48  ;;  %v4215_v48 = vld [vmem:[%s4637_s3 + $0x1f8] sm:$0xff]  }
 0x1b3   :  { %2909 = vmatprep.subr.bf16.mxu1 %v3951_v50  ;;  %v2928_v50 = vpack.c.bf16 %v2920_v42, %v2920_v42 }
 0x1b5   :  { %2869 = vmatpush2.bf16.msra.mxu0 %v3822_v54 }
 0x1b6   :  { %2910 = vmatpush2.bf16.msra.mxu1 %v3950_v56  ;;  %4073 = vmatprep.subr.bf16.mxu0 %v4167_v19  ;;  %v4217_v56 = vld [vmem:[%s4637_s3 + $0x1f0] sm:$0xff]  }
 0x1b7   :  { %4095 = vmatprep.subr.bf16.mxu1 %v4168_v57  ;;  %v4202_v19 = vld [vmem:[%s4637_s3 + $0x130] sm:$0xff]   ;;  %v4203_v57 = vld [vmem:[%s4637_s3 + $0x168] sm:$0xff]  }
 0x1b8   :  { %v2626_v0 = vpop.f32.mrf.mxu0  ;;  %2871 = vmatmul.mubr.bf16.vlgmr.msra.gmra.mxu0 %v4374_v20  ;;  %v4175_v20 = vld [vmem:[%s4637_s3 + $0x68] sm:$0xff]  }
 0x1b9   :  { %v4445_v2 = vpop.f32.mrf.mxu1  ;;  %2912 = vmatmul.mubr.bf16.vlgmr.msra.gmra.mxu1 %v4382_v33  ;;  %4074 = vmatpush3.bf16.msra.mxu0 %v4169_v30  ;;  %v4176_v33 = vld [vmem:[%s4637_s3 + $0xe8] sm:$0xff]   ;;  %v2627_v35 = vadd.f32 %v2626_v0, %v2586_v29  ;;  %v4207_v0 = vld [vmem:[%s4637_s3 + $0x158] sm:$0xff]  }
 0x1ba   :  { %3487 = vmatprep.mubr.bf16.mxu0 %v2929_v63  ;;  %4096 = vmatpush3.bf16.msra.mxu1 %v4170_v49  ;;  %v2628_v4 = vpop.f32.mrf.mxu0  ;;  %v4204_v30 = vld [vmem:[%s4637_s3 + $0x128] sm:$0xff]   ;;  %v4205_v49 = vld [vmem:[%s4637_s3 + $0x160] sm:$0xff]  }
 0x1bb   :  { %v2629_v52 = vadd.f32 %v2628_v4, %v2588_v1  ;;  %v2669_v59 = vpop.f32.mrf.mxu1  ;;  %4075 = vmatprep.subr.bf16.mxu0 %v4171_v61  ;;  %4097 = vmatprep.subr.bf16.mxu1 %v4172_v62  ;;  %v2668_v39 = vadd.f32 %v4445_v2, %v2627_v35  ;;  %v4220_v61 = vld [vmem:[%s4637_s3 + $0x1a8] sm:$0xff]   ;;  %v4221_v62 = vld [vmem:[%s4637_s3 + $0x1e0] sm:$0xff]   ;;  %v4223_v2 = vld [vmem:[%s4637_s3 + $0x1d8] sm:$0xff]  }
 0x1bc   :  { %v2630_v6 = vpop.f32.mrf.mxu0  ;;  %v4206_v63 = vld [vmem:[%s4637_s3 + $0x120] sm:$0xff]   ;;  %v4209_v4 = vld [vmem:[%s4637_s3 + $0x150] sm:$0xff]  }
 0x1bd   :  { %v2670_v28 = vadd.f32 %v2669_v59, %v2629_v52  ;;  %v2671_v7 = vpop.f32.mrf.mxu1  ;;  %4076 = vmatpush3.bf16.msra.mxu0 %v4173_v3  ;;  %v2922_v45 = vmax.f32 %v2668_v39, 0.0  ;;  %v4222_v1 = vld [vmem:[%s4637_s3 + $0x1a0] sm:$0xff]   ;;  %v4208_v3 = vld [vmem:[%s4637_s3 + $0x118] sm:$0xff]   ;;  %v4211_v52 = vld [vmem:[%s4637_s3 + $0x148] sm:$0xff]  }
 0x1be   :  { %4098 = vmatpush3.bf16.msra.mxu1 %v4174_v5  ;;  %v2631_v9 = vpop.f32.mrf.mxu0  ;;  %4077 = vmatprep.subr.bf16.mxu0 %v4175_v20  ;;  %v4224_v5 = vld [vmem:[%s4637_s3 + $0x198] sm:$0xff]   ;;  %v4210_v20 = vld [vmem:[%s4637_s3 + $0x110] sm:$0xff]   ;;  %v4212_v59 = vld [vmem:[%s4637_s3 + $0x108] sm:$0xff]  }
 0x1bf   :  { %v2923_v12 = vmax.f32 %v2670_v28, 0.0  ;;  %v2672_v13 = vpop.f32.mrf.mxu1  ;;  %4099 = vmatprep.subr.bf16.mxu1 %v4176_v33  ;;  %v2930_v54 = vpack.c.bf16 %v2922_v45, %v2922_v45  ;;  %v4213_v33 = vld [vmem:[%s4637_s3 + $0x140] sm:$0xff]   ;;  %v4225_v28 = vld [vmem:[%s4637_s3 + $0x1d0] sm:$0xff]  }
 0x1c0   :  { %v4214_v6 = vld [vmem:[%s4637_s3 + $0x100] sm:$0xff]  }
 0x1c1   :  { %v2931_v17 = vpack.c.bf16 %v2923_v12, %v2923_v12  ;;  %4078 = vmatpush3.bf16.msra.mxu0 %v4177_v8  ;;  %v4226_v8 = vld [vmem:[%s4637_s3 + $0x190] sm:$0xff]   ;;  %v4227_v12 = vld [vmem:[%s4637_s3 + $0x1c8] sm:$0xff]  }
 0x1c2   :  { %4100 = vmatpush3.bf16.msra.mxu1 %v4178_v10  ;;  %4079 = vmatprep.subr.bf16.mxu0 %v4179_v11 }
 0x1c3   :  { %3527 = vmatprep.mubr.bf16.mxu1 %v2931_v17  ;;  %4101 = vmatprep.subr.bf16.mxu1 %v4180_v14  ;;  %v4228_v14 = vld [vmem:[%s4637_s3 + $0x188] sm:$0xff]  }
 0x1c5   :  { %4080 = vmatpush3.bf16.msra.mxu0 %v4181_v18 }
 0x1c6   :  { %4102 = vmatpush3.bf16.msra.mxu1 %v4182_v21  ;;  %4081 = vmatprep.subr.bf16.mxu0 %v4183_v22  ;;  %v4229_v21 = vld [vmem:[%s4637_s3 + $0x1c0] sm:$0xff]  }
 0x1c7   :  { %4103 = vmatprep.subr.bf16.mxu1 %v4184_v23  ;;  %v4230_v22 = vld [vmem:[%s4637_s3 + $0x180] sm:$0xff]   ;;  %v486_v23 = vsub.s32 4, %v4392_v44 }
 0x1c9   :  { %4082 = vmatpush3.bf16.msra.mxu0 %v4185_v25  ;;  %v4231_v25 = vld [vmem:[#allocation6] sm:$0xff] }
 0x1ca   :  { %4104 = vmatpush3.bf16.msra.mxu1 %v4186_v26  ;;  %4083 = vmatprep.subr.bf16.mxu0 %v4187_v27  ;;  %v487_v26 = vrot.slane %v4231_v25, %v486_v23  ;;  %v491_v27 = vrot.slane %v4231_v25, %v490_v24 }
 0x1cb   :  { %4105 = vmatprep.subr.bf16.mxu1 %v4188_v55 }
 0x1cd   :  { %4084 = vmatpush3.bf16.msra.mxu0 %v4189_v31 }
 0x1ce   :  { %4106 = vmatpush3.bf16.msra.mxu1 %v4190_v32  ;;  %4085 = vmatprep.subr.bf16.mxu0 %v4191_v34 }
 0x1cf   :  { %4107 = vmatprep.subr.bf16.mxu1 %v4192_v47 }
 0x1d1   :  { %4086 = vmatpush3.bf16.msra.mxu0 %v4193_v36 }
 0x1d2   :  { %4108 = vmatpush3.bf16.msra.mxu1 %v4194_v37  ;;  %4087 = vmatprep.subr.bf16.mxu0 %v4195_v38 }
 0x1d3   :  { %4109 = vmatprep.subr.bf16.mxu1 %v4196_v40 }
 0x1d5   :  { %4088 = vmatpush3.bf16.msra.mxu0 %v4197_v41 }
 0x1d6   :  { %4110 = vmatpush3.bf16.msra.mxu1 %v4198_v43  ;;  %4117 = vmatprep.subr.bf16.mxu0 %v4199_v58 }
 0x1d7   :  { %4139 = vmatprep.subr.bf16.mxu1 %v4215_v48 }
 0x1d8   :  { %3488 = vmatmul.mubr.bf16.vlgmr.msra.gmra.mxu0 %v2928_v50  ;;  %v498_v50 = vsub.s32 7, %v4392_v44 }
 0x1d9   :  { %3528 = vmatmul.mubr.bf16.vlgmr.msra.gmra.mxu1 %v2930_v54  ;;  %4118 = vmatpush3.bf16.msra.mxu0 %v4200_v46  ;;  %v494_v46 = vsub.s32 6, %v4392_v44 }
 0x1da   :  { %4119 = vmatprep.subr.bf16.mxu0 %v4201_v51  ;;  %4140 = vmatpush3.bf16.msra.mxu1 %v4216_v53  ;;  %v499_v53 = vrot.slane %v4231_v25, %v498_v50 }
 0x1db   :  { %4141 = vmatprep.subr.bf16.mxu1 %v4217_v56  ;;  %v495_v51 = vrot.slane %v4231_v25, %v494_v46 }
 0x1dd   :  { %4120 = vmatpush3.bf16.msra.mxu0 %v4202_v19 }
 0x1de   :  { %4121 = vmatprep.subr.bf16.mxu0 %v4203_v57  ;;  %4142 = vmatpush3.bf16.msra.mxu1 %v4218_v60 }
 0x1df   :  { %4143 = vmatprep.subr.bf16.mxu1 %v4219_v16 }
 0x1e1   :  { %4122 = vmatpush3.bf16.msra.mxu0 %v4204_v30 }
 0x1e2   :  { %4123 = vmatprep.subr.bf16.mxu0 %v4205_v49  ;;  %4144 = vmatpush3.bf16.msra.mxu1 %v4220_v61 }
 0x1e3   :  { %4145 = vmatprep.subr.bf16.mxu1 %v4221_v62 }
 0x1e5   :  { %4124 = vmatpush3.bf16.msra.mxu0 %v4206_v63 }
 0x1e6   :  { %4125 = vmatprep.subr.bf16.mxu0 %v4207_v0  ;;  %4146 = vmatpush3.bf16.msra.mxu1 %v4222_v1 }
 0x1e7   :  { %4147 = vmatprep.subr.bf16.mxu1 %v4223_v2 }
 0x1e9   :  { %4126 = vmatpush3.bf16.msra.mxu0 %v4208_v3 }
 0x1ea   :  { %4127 = vmatprep.subr.bf16.mxu0 %v4209_v4  ;;  %4148 = vmatpush3.bf16.msra.mxu1 %v4224_v5 }
 0x1eb   :  { %4149 = vmatprep.subr.bf16.mxu1 %v4225_v28 }
 0x1ed   :  { %4128 = vmatpush3.bf16.msra.mxu0 %v4210_v20 }
 0x1ee   :  { %4129 = vmatprep.subr.bf16.mxu0 %v4211_v52  ;;  %4150 = vmatpush3.bf16.msra.mxu1 %v4226_v8 }
 0x1ef   :  { %4151 = vmatprep.subr.bf16.mxu1 %v4227_v12 }
 0x1f1   :  { %4130 = vmatpush3.bf16.msra.mxu0 %v4212_v59  ;;  %v4008_v59 = vld [vmem:[#allocation7] ss:$0 sm:$0xff] }
 0x1f2   :  { %4131 = vmatprep.subr.bf16.mxu0 %v4213_v33  ;;  %4152 = vmatpush3.bf16.msra.mxu1 %v4228_v14 }
 0x1f3   :  { %4153 = vmatprep.subr.bf16.mxu1 %v4229_v21 }
 0x1f5   :  { %4132 = vmatpush3.bf16.msra.mxu0 %v4214_v6 }
 0x1f6   :  { %4154 = vmatpush3.bf16.msra.mxu1 %v4230_v22 }
 0x1f8   :  { %v2708_v7 = vpop.f32.mrf.mxu0 }
 0x1f9   :  { %v2749_v9 = vpop.f32.mrf.mxu1  ;;  %v2709_v55 = vadd.f32 %v2708_v7, %v487_v26 }
 0x1fa   :  { %v2710_v10 = vpop.f32.mrf.mxu0 }
 0x1fb   :  { %v2751_v11 = vpop.f32.mrf.mxu1  ;;  %v2711_v29 = vadd.f32 %v2710_v10, %v491_v27  ;;  %v2750_v31 = vadd.f32 %v2749_v9, %v2709_v55 }
 0x1fc   :  { %v2712_v13 = vpop.f32.mrf.mxu0 }
 0x1fd   :  { %v2753_v15 = vpop.f32.mrf.mxu1  ;;  %v2752_v34 = vadd.f32 %v2751_v11, %v2711_v29 }
 0x1fe   :  { %v2713_v17 = vpop.f32.mrf.mxu0 }
 0x1ff   :  { %v2754_v18 = vpop.f32.mrf.mxu1 }
 0x238   :  { %v2790_v32 = vpop.f32.mrf.mxu0 }
 0x239   :  { %v2791_v35 = vadd.f32 %v2790_v32, %v2750_v31  ;;  %v2831_v47 = vpop.f32.mrf.mxu1 }
 0x23a   :  { %v2792_v36 = vpop.f32.mrf.mxu0  ;;  %v2832_v54 = vadd.f32 %v2831_v47, %v495_v51 }
 0x23b   :  { %v2793_v37 = vadd.f32 %v2792_v36, %v2752_v34  ;;  %v2833_v38 = vpop.f32.mrf.mxu1  ;;  %v2924_v39 = vmax.f32 %v2791_v35, 0.0 }
 0x23c   :  { %v2794_v40 = vpop.f32.mrf.mxu0  ;;  %v2834_v19 = vadd.f32 %v2833_v38, %v499_v53 }
 0x23d   :  { %v2925_v41 = vmax.f32 %v2793_v37, 0.0  ;;  %v2835_v42 = vpop.f32.mrf.mxu1  ;;  %v2932_v48 = vpack.c.bf16 %v2924_v39, %v2924_v39 }
 0x23e   :  { %v2795_v43 = vpop.f32.mrf.mxu0 }
 0x23f   :  { %v2933_v58 = vpack.c.bf16 %v2925_v41, %v2925_v41  ;;  %v2836_v45 = vpop.f32.mrf.mxu1 }
 0x241   :  { %3567 = vmatprep.mubr.bf16.mxu0 %v2933_v58 }
 0x242   :  { %3568 = vmatmul.mubr.bf16.vlgmr.msra.gmra.mxu0 %v2932_v48 }
 0x278   :  { %v2872_v56 = vpop.f32.mrf.mxu0 }
 0x279   :  { %v2873_v57 = vadd.f32 %v2872_v56, %v2832_v54  ;;  %v2913_v60 = vpop.f32.mrf.mxu1 }
 0x27a   :  { %v2874_v16 = vpop.f32.mrf.mxu0 }
 0x27b   :  { %v2914_v30 = vadd.f32 %v2913_v60, %v2873_v57  ;;  %v2875_v49 = vadd.f32 %v2874_v16, %v2834_v19  ;;  %v2915_v61 = vpop.f32.mrf.mxu1 }
 0x27c   :  { %v2876_v62 = vpop.f32.mrf.mxu0 }
 0x27d   :  { %v2916_v63 = vadd.f32 %v2915_v61, %v2875_v49  ;;  %v2917_v0 = vpop.f32.mrf.mxu1  ;;  %v2926_v1 = vmax.f32 %v2914_v30, 0.0 }
 0x27e   :  { %v2877_v2 = vpop.f32.mrf.mxu0 }
 0x27f   :  { %v2927_v3 = vmax.f32 %v2916_v63, 0.0  ;;  %v2918_v4 = vpop.f32.mrf.mxu1  ;;  %v2934_v44 = vpack.c.bf16 %v2926_v1, %v2926_v1 }
 0x281   :  { %v2935_v5 = vpack.c.bf16 %v2927_v3, %v2927_v3 }
 0x283   :  { %3607 = vmatprep.mubr.bf16.mxu1 %v2935_v5 }
 0x284   :  { %3608 = vmatmul.mubr.bf16.vlgmr.msra.gmra.mxu1 %v2934_v44 }
 0x298   :  { %v4089_v20 = vpop.f32.mrf.mxu0 }
 0x299   :  { %v4111_v52 = vpop.f32.mrf.mxu1 }
 0x29a   :  { %v4090_v33 = vpop.f32.mrf.mxu0 }
 0x29b   :  { %v4091_v6 = vadd.f32 %v4090_v33, %v4089_v20  ;;  %v4112_v28 = vpop.f32.mrf.mxu1 }
 0x29c   :  { %v4113_v7 = vadd.f32 %v4112_v28, %v4111_v52  ;;  %v4092_v8 = vpop.f32.mrf.mxu0 }
 0x29d   :  { %v3490_v9 = vadd.f32 %v4091_v6, %v4008_v59  ;;  %v4114_v10 = vpop.f32.mrf.mxu1 }
 0x29e   :  { %v4093_v11 = vpop.f32.mrf.mxu0 }
 0x29f   :  { %v3530_v12 = vadd.f32 %v4113_v7, %v3490_v9  ;;  %v4115_v13 = vpop.f32.mrf.mxu1 }
 0x302   :  { %v4133_v14 = vpop.f32.mrf.mxu0 }
 0x304   :  { %v4134_v15 = vpop.f32.mrf.mxu0 }
 0x305   :  { %v4135_v17 = vadd.f32 %v4134_v15, %v4133_v14 }
 0x306   :  { %v4136_v18 = vpop.f32.mrf.mxu0 }
 0x307   :  { %v3570_v21 = vadd.f32 %v4135_v17, %v3530_v12 }
 0x308   :  { %v4137_v22 = vpop.f32.mrf.mxu0 }
 0x344   :  { %v4155_v23 = vpop.f32.mrf.mxu1 }
 0x346   :  { %v4156_v24 = vpop.f32.mrf.mxu1 }
 0x347   :  { %v4157_v25 = vadd.f32 %v4156_v24, %v4155_v23 }
 0x348   :  { %v4158_v26 = vpop.f32.mrf.mxu1 }
 0x349   :  { %v3610_v27 = vadd.f32 %v4157_v25, %v3570_v21 }
 0x34a   :  { %v4159_v55 = vpop.f32.mrf.mxu1 }
 0x34b   :  { %3616 = vst.msk [vmem:[%s4639_s5] sm:$0xff] %vm3615_vm0, %v3610_v27 }
 0x34c   :  { %3621 = vsyncpa [#allocation3], 1 }
 0x34d   :  { %3622 = vsyncpa [#allocation5], 1 }
 0x34e   :  { %3623 = vsyncpa [#allocation8], 1 }

</bundles_post_ra>
